<compile_context>
chip_gen: v6e
topology: v6e:2x2x1
jax: 0.10.0
libtpu: 0.0.40
codegen_flags: <defaults>
</compile_context>

<pallas_src>
import jax
import jax.numpy as jnp
from jax import lax
from jax.experimental import pallas as pl
from jax.experimental.pallas import tpu as pltpu

B = 8            # batch_size
D = 128          # vec_size
C = 4            # num_classes
MAX_ITERS = 10
OVERSHOOT = 0.02
LBL_LANES = 128  # lane-dense int32 label slab (wrapper slices column 0)
BIG = 1e30       # finite +/- sentinel (safer than inf under selects)


def deepfool_kernel(sent_ref, w_ref, b_ref, grad_ref, cf_ref, label_ref):
    sent = sent_ref[...]                    # [B, D]  original vectors (sent_vecs)
    W = w_ref[...]                          # [C, D]  classifier weight
    bias = b_ref[...]                       # [1, C]  classifier bias

    # ---------------- one-time precompute (hoisted out of the loop) ----------------
    # f0 = sent @ W.T + b ; WWt = W @ W.T   (the only MXU ops in the kernel)
    f0 = lax.dot_general(sent, W, (((1,), (1,)), ((), ())),
                         preferred_element_type=jnp.float32) + bias     # [B, C]
    WWt = lax.dot_general(W, W, (((1,), (1,)), ((), ())),
                          preferred_element_type=jnp.float32)           # [C, C]

    # Per-class [B,1] columns of f0 (static lane slices, done once).
    f0_c = [f0[:, j:j + 1] for j in range(C)]

    # label = argmax_j f0_j (ties -> smallest index), unrolled compare chain.
    label_idx = jnp.zeros((B, 1), jnp.int32)
    f0_label = f0_c[0]
    for j in range(1, C):
        better = f0_c[j] > f0_label
        f0_label = jnp.where(better, f0_c[j], f0_label)
        label_idx = jnp.where(better, jnp.int32(j), label_idx)
    is_label = [label_idx == j for j in range(C)]                       # [B,1] bool
    df0 = [f0_c[j] - f0_label for j in range(C)]                        # f0_j - f0_label

    # Gram entries W[m].W[j] broadcast over the batch (symmetric by construction;
    # 10 unique slices of the tiny [C,C] MXU result, hoisted once).
    wwt = [[None] * C for _ in range(C)]
    for m in range(C):
        for j in range(m, C):
            v = jnp.broadcast_to(WWt[m:m + 1, j:j + 1], (B, 1))
            wwt[m][j] = v
            wwt[j][m] = v

    # gram_j = W[label].W[j], gnorm2 = ||W[label]||^2 (per-row selects by label).
    gram = []
    for j in range(C):
        g = wwt[0][j]
        for m in range(1, C):
            g = jnp.where(is_label[m], wwt[m][j], g)
        gram.append(g)
    gnorm2 = gram[0]
    for j in range(1, C):
        gnorm2 = jnp.where(is_label[j], gram[j], gnorm2)

    # With r_tot = sum_m A_m*W[m] - s*W[label], the label-relative logits of
    # sent + r_tot are:  f_all_j = df0_j + sum_m A_m*dwwt[m][j] - s*dgram_j,
    # which keeps the whole loop in per-class scalar space (no D-dim work).
    dgram = [gram[j] - gnorm2 for j in range(C)]
    dwwt = [[wwt[m][j] - gram[m] for j in range(C)] for m in range(C)]

    # 1 / ||W[j] - W[label]||  (label column is masked out later, never used).
    inv_norm = [lax.rsqrt(jnp.maximum(wwt[j][j] + gnorm2 - 2.0 * gram[j], 1e-20))
                for j in range(C)]

    # ------------- DeepFool iterations: pure-VPU ops on [B,1] columns -------------
    A = [jnp.zeros((B, 1), jnp.float32) for _ in range(C)]   # per-class accumulated scale
    s = jnp.zeros((B, 1), jnp.float32)                       # total accumulated scale
    finish = jnp.zeros((B, 1), jnp.float32)                  # finish_mask
    f_all = list(df0)                                        # logits_j - logits_label @ sent + r_tot
    fcf = list(df0)                                          # same @ sent + (1+overshoot)*r_tot

    # Running all MAX_ITERS with masked updates matches the reference's early-exit
    # while-loop: finished rows stop changing, so their r_tot / k_i / check_fool
    # are frozen at the value they had when they first got fooled.
    for _ in range(MAX_ITERS):
        upd = finish < 1.0                                   # cur_update_mask

        # per-class perturbation size; label class excluded via a finite sentinel
        pert = [jnp.where(is_label[j], BIG, jnp.abs(f_all[j]) * inv_norm[j])
                for j in range(C)]

        # argmin over the C classes (unrolled compare chain, ties -> smaller index)
        pmin = pert[0]
        midx = jnp.zeros((B, 1), jnp.int32)
        for j in range(1, C):
            better = pert[j] < pmin
            pmin = jnp.where(better, pert[j], pmin)
            midx = jnp.where(better, jnp.int32(j), midx)

        # one shared compare set drives every "selected class" quantity
        hit = [midx == j for j in range(C)]
        inv_sel = inv_norm[0]
        for j in range(1, C):
            inv_sel = jnp.where(hit[j], inv_norm[j], inv_sel)

        # r_i = clamp(pert, min=1e-4) * (W[k_min]-W[label]) / ||W[k_min]-W[label]||
        # (this reference module uses clamp(min=1e-4), not an additive epsilon).
        scale = jnp.maximum(pmin, 1e-4) * inv_sel
        scale = jnp.where(upd, scale, 0.0)                   # freeze finished rows

        A = [A[j] + jnp.where(hit[j], scale, 0.0) for j in range(C)]
        s = s + scale

        # recompute label-relative logits from (A, s); also the overshoot version
        for j in range(C):
            acc = df0[j] - s * dgram[j]
            for m in range(C):
                acc = acc + A[m] * dwwt[m][j]
            f_all[j] = acc
            fcf[j] = df0[j] + (1.0 + OVERSHOOT) * (acc - df0[j])

        # k_i != label  <=>  some non-label overshoot logit exceeds the label's
        mx = jnp.where(is_label[0], -BIG, fcf[0])
        for j in range(1, C):
            mx = jnp.maximum(mx, jnp.where(is_label[j], -BIG, fcf[j]))
        finish = finish + jnp.where(mx > 0.0, 1.0, 0.0)

    # ---------------- finalize (one-time [B,D] work) ----------------
    # k_i = argmax_j overshoot logits (label-relative; label entry is exactly 0).
    kbest = fcf[0]
    kidx = jnp.zeros((B, 1), jnp.int32)
    for j in range(1, C):
        better = fcf[j] > kbest
        kbest = jnp.where(better, fcf[j], kbest)
        kidx = jnp.where(better, jnp.int32(j), kidx)
    hit_k = [kidx == j for j in range(C)]

    w_rows = [jnp.broadcast_to(W[j:j + 1, :], (B, D)) for j in range(C)]
    w_ki = w_rows[0]
    w_lbl = w_rows[0]
    for j in range(1, C):
        w_ki = jnp.where(hit_k[j], w_rows[j], w_ki)
        w_lbl = jnp.where(is_label[j], w_rows[j], w_lbl)

    # grad of sum(fs[k_i] - fs[label]) wrt pert_vecs == W[k_i] - W[label], L2-normed.
    # Rows never fooled give grad == 0 -> NaN after normalization, matching the
    # reference's 0/0 failure mode.
    grad = w_ki - w_lbl
    gsq = jnp.sum(grad * grad, axis=1, keepdims=True)
    grad_ref[...] = grad * lax.rsqrt(gsq)

    # r_tot = sum_j A_j * W[j] - s * W[label]
    r_tot = -s * w_lbl
    for j in range(C):
        r_tot = r_tot + A[j] * w_rows[j]
    cf_ref[...] = sent + (1.0 + OVERSHOOT) * r_tot            # check_fool_vecs
    label_ref[...] = jnp.broadcast_to(label_idx, (B, LBL_LANES))

    # TODO(synk): `self.loops_needed` / `self.loops` module-state bookkeeping and the
    # targeted-attack branch (`target is not None`) are not emitted.


@jax.jit
def deepfool(sent_vecs, W, b):
    # At this demo size (B=8) a single gridless VMEM-resident call is optimal
    # (the kernel is launch/overhead bound).  For large batches: add a grid over
    # the batch axis with block_shape=(TB, D) (TB a multiple of 8) and
    # compiler_params=pltpu.CompilerParams(dimension_semantics=("parallel",)) so
    # both v7x TensorCores split the rows; keep the per-block VMEM footprint well
    # under the scoped limit (v7x: 64 MiB physical / 32 MiB default scoped).
    b2 = b.reshape(1, C).astype(jnp.float32)
    vmem = pltpu.MemorySpace.VMEM
    grad, check_fool, label = pl.pallas_call(
        deepfool_kernel,
        in_specs=[
            pl.BlockSpec(memory_space=vmem),
            pl.BlockSpec(memory_space=vmem),
            pl.BlockSpec(memory_space=vmem),
        ],
        out_specs=(
            pl.BlockSpec(memory_space=vmem),
            pl.BlockSpec(memory_space=vmem),
            pl.BlockSpec(memory_space=vmem),
        ),
        out_shape=(
            jax.ShapeDtypeStruct((B, D), jnp.float32),
            jax.ShapeDtypeStruct((B, D), jnp.float32),
            jax.ShapeDtypeStruct((B, LBL_LANES), jnp.int32),
        ),
        cost_estimate=pl.CostEstimate(
            flops=2 * B * C * D + 2 * C * C * D
                  + MAX_ITERS * B * (20 * C + 12 * C * C) + 10 * B * D,
            transcendentals=B * (C + 1),
            bytes_accessed=4 * (B * D + C * D + C + 2 * B * D + B * LBL_LANES),
        ),
    )(sent_vecs.astype(jnp.float32), W.astype(jnp.float32), b2)
    return grad, check_fool, label[:, 0]


if __name__ == "__main__":
    key = jax.random.PRNGKey(0)
    k_x, k_w, k_b = jax.random.split(key, 3)

    sent_vecs = jax.random.normal(k_x, (B, D), dtype=jnp.float32)        # [batch, vec_size]
    W = 0.1 * jax.random.normal(k_w, (C, D), dtype=jnp.float32)          # linear classifier weight
    b = 0.01 * jax.random.normal(k_b, (C,), dtype=jnp.float32)           # linear classifier bias

    grad, check_fool_vecs, label = deepfool(sent_vecs, W, b)
    jax.block_until_ready((grad, check_fool_vecs, label))

    assert grad.shape == (B, D) and check_fool_vecs.shape == (B, D) and label.shape == (B,)
    print("KERNEL_OK")
</pallas_src>

<mosaic_0001>
module attributes {stable_mosaic.version = 11 : i64} {
  func.func @deepfool_kernel(%arg0: memref<8x128xf32, #tpu.memory_space<vmem>>, %arg1: memref<4x128xf32, #tpu.memory_space<vmem>>, %arg2: memref<1x4xf32, #tpu.memory_space<vmem>>, %arg3: memref<8x128xf32, #tpu.memory_space<vmem>>, %arg4: memref<8x128xf32, #tpu.memory_space<vmem>>, %arg5: memref<8x128xi32, #tpu.memory_space<vmem>>) attributes {dimension_semantics = [], scalar_prefetch = 0 : i64, scratch_operands = 0 : i64, tpu.core_type = #tpu.core_type<tc>} {
    %c0 = arith.constant 0 : index
    %c0_0 = arith.constant 0 : index
    %0 = vector.load %arg0[%c0, %c0_0] : memref<8x128xf32, #tpu.memory_space<vmem>>, vector<8x128xf32>
    %c0_1 = arith.constant 0 : index
    %c0_2 = arith.constant 0 : index
    %1 = vector.load %arg1[%c0_1, %c0_2] : memref<4x128xf32, #tpu.memory_space<vmem>>, vector<4x128xf32>
    %c0_3 = arith.constant 0 : index
    %c0_4 = arith.constant 0 : index
    %2 = vector.load %arg2[%c0_3, %c0_4] : memref<1x4xf32, #tpu.memory_space<vmem>>, vector<1x4xf32>
    %cst = arith.constant dense<0.000000e+00> : vector<8x4xf32>
    %3 = tpu.matmul %0, %1, %cst {dimension_numbers = #tpu.dot_dimension_numbers<[1], [1], [0], [0], [0, 0, 1, 0], [], []>} : vector<8x128xf32>, vector<4x128xf32>, vector<8x4xf32> -> vector<8x4xf32>
    %4 = vector.broadcast %2 : vector<1x4xf32> to vector<8x4xf32>
    %5 = arith.addf %3, %4 : vector<8x4xf32>
    %cst_5 = arith.constant dense<0.000000e+00> : vector<4x4xf32>
    %6 = tpu.matmul %1, %1, %cst_5 {dimension_numbers = #tpu.dot_dimension_numbers<[1], [1], [0], [0], [0, 0, 1, 0], [], []>} : vector<4x128xf32>, vector<4x128xf32>, vector<4x4xf32> -> vector<4x4xf32>
    %7 = vector.extract_strided_slice %5 {offsets = [0, 0], sizes = [8, 1], strides = [1, 1]} : vector<8x4xf32> to vector<8x1xf32>
    %8 = vector.extract_strided_slice %5 {offsets = [0, 1], sizes = [8, 1], strides = [1, 1]} : vector<8x4xf32> to vector<8x1xf32>
    %9 = vector.extract_strided_slice %5 {offsets = [0, 2], sizes = [8, 1], strides = [1, 1]} : vector<8x4xf32> to vector<8x1xf32>
    %10 = vector.extract_strided_slice %5 {offsets = [0, 3], sizes = [8, 1], strides = [1, 1]} : vector<8x4xf32> to vector<8x1xf32>
    %c0_i32 = arith.constant 0 : i32
    %11 = vector.broadcast %c0_i32 : i32 to vector<8x1xi32>
    %12 = arith.cmpf ogt, %8, %7 : vector<8x1xf32>
    %13 = arith.select %12, %8, %7 : vector<8x1xi1>, vector<8x1xf32>
    %c1_i32 = arith.constant 1 : i32
    %14 = vector.broadcast %c1_i32 : i32 to vector<8x1xi32>
    %15 = arith.select %12, %14, %11 : vector<8x1xi1>, vector<8x1xi32>
    %16 = arith.cmpf ogt, %9, %13 : vector<8x1xf32>
    %17 = arith.select %16, %9, %13 : vector<8x1xi1>, vector<8x1xf32>
    %c2_i32 = arith.constant 2 : i32
    %18 = vector.broadcast %c2_i32 : i32 to vector<8x1xi32>
    %19 = arith.select %16, %18, %15 : vector<8x1xi1>, vector<8x1xi32>
    %20 = arith.cmpf ogt, %10, %17 : vector<8x1xf32>
    %21 = arith.select %20, %10, %17 : vector<8x1xi1>, vector<8x1xf32>
    %c3_i32 = arith.constant 3 : i32
    %22 = vector.broadcast %c3_i32 : i32 to vector<8x1xi32>
    %23 = arith.select %20, %22, %19 : vector<8x1xi1>, vector<8x1xi32>
    %c0_i32_6 = arith.constant 0 : i32
    %24 = vector.broadcast %c0_i32_6 : i32 to vector<8x1xi32>
    %25 = arith.cmpi eq, %23, %24 : vector<8x1xi32>
    %c1_i32_7 = arith.constant 1 : i32
    %26 = vector.broadcast %c1_i32_7 : i32 to vector<8x1xi32>
    %27 = arith.cmpi eq, %23, %26 : vector<8x1xi32>
    %c2_i32_8 = arith.constant 2 : i32
    %28 = vector.broadcast %c2_i32_8 : i32 to vector<8x1xi32>
    %29 = arith.cmpi eq, %23, %28 : vector<8x1xi32>
    %c3_i32_9 = arith.constant 3 : i32
    %30 = vector.broadcast %c3_i32_9 : i32 to vector<8x1xi32>
    %31 = arith.cmpi eq, %23, %30 : vector<8x1xi32>
    %32 = arith.subf %7, %21 : vector<8x1xf32>
    %33 = arith.subf %8, %21 : vector<8x1xf32>
    %34 = arith.subf %9, %21 : vector<8x1xf32>
    %35 = arith.subf %10, %21 : vector<8x1xf32>
    %36 = vector.extract_strided_slice %6 {offsets = [0, 0], sizes = [1, 1], strides = [1, 1]} : vector<4x4xf32> to vector<1x1xf32>
    %37 = vector.shape_cast %36 : vector<1x1xf32> to vector<1x1xf32>
    %38 = vector.broadcast %37 : vector<1x1xf32> to vector<8x1xf32>
    %39 = vector.extract_strided_slice %6 {offsets = [0, 1], sizes = [1, 1], strides = [1, 1]} : vector<4x4xf32> to vector<1x1xf32>
    %40 = vector.shape_cast %39 : vector<1x1xf32> to vector<1x1xf32>
    %41 = vector.broadcast %40 : vector<1x1xf32> to vector<8x1xf32>
    %42 = vector.extract_strided_slice %6 {offsets = [0, 2], sizes = [1, 1], strides = [1, 1]} : vector<4x4xf32> to vector<1x1xf32>
    %43 = vector.shape_cast %42 : vector<1x1xf32> to vector<1x1xf32>
    %44 = vector.broadcast %43 : vector<1x1xf32> to vector<8x1xf32>
    %45 = vector.extract_strided_slice %6 {offsets = [0, 3], sizes = [1, 1], strides = [1, 1]} : vector<4x4xf32> to vector<1x1xf32>
    %46 = vector.shape_cast %45 : vector<1x1xf32> to vector<1x1xf32>
    %47 = vector.broadcast %46 : vector<1x1xf32> to vector<8x1xf32>
    %48 = vector.extract_strided_slice %6 {offsets = [1, 1], sizes = [1, 1], strides = [1, 1]} : vector<4x4xf32> to vector<1x1xf32>
    %49 = vector.shape_cast %48 : vector<1x1xf32> to vector<1x1xf32>
    %50 = vector.broadcast %49 : vector<1x1xf32> to vector<8x1xf32>
    %51 = vector.extract_strided_slice %6 {offsets = [1, 2], sizes = [1, 1], strides = [1, 1]} : vector<4x4xf32> to vector<1x1xf32>
    %52 = vector.shape_cast %51 : vector<1x1xf32> to vector<1x1xf32>
    %53 = vector.broadcast %52 : vector<1x1xf32> to vector<8x1xf32>
    %54 = vector.extract_strided_slice %6 {offsets = [1, 3], sizes = [1, 1], strides = [1, 1]} : vector<4x4xf32> to vector<1x1xf32>
    %55 = vector.shape_cast %54 : vector<1x1xf32> to vector<1x1xf32>
    %56 = vector.broadcast %55 : vector<1x1xf32> to vector<8x1xf32>
    %57 = vector.extract_strided_slice %6 {offsets = [2, 2], sizes = [1, 1], strides = [1, 1]} : vector<4x4xf32> to vector<1x1xf32>
    %58 = vector.shape_cast %57 : vector<1x1xf32> to vector<1x1xf32>
    %59 = vector.broadcast %58 : vector<1x1xf32> to vector<8x1xf32>
    %60 = vector.extract_strided_slice %6 {offsets = [2, 3], sizes = [1, 1], strides = [1, 1]} : vector<4x4xf32> to vector<1x1xf32>
    %61 = vector.shape_cast %60 : vector<1x1xf32> to vector<1x1xf32>
    %62 = vector.broadcast %61 : vector<1x1xf32> to vector<8x1xf32>
    %63 = vector.extract_strided_slice %6 {offsets = [3, 3], sizes = [1, 1], strides = [1, 1]} : vector<4x4xf32> to vector<1x1xf32>
    %64 = vector.shape_cast %63 : vector<1x1xf32> to vector<1x1xf32>
    %65 = vector.broadcast %64 : vector<1x1xf32> to vector<8x1xf32>
    %66 = arith.select %27, %41, %38 : vector<8x1xi1>, vector<8x1xf32>
    %67 = arith.select %29, %44, %66 : vector<8x1xi1>, vector<8x1xf32>
    %68 = arith.select %31, %47, %67 : vector<8x1xi1>, vector<8x1xf32>
    %69 = arith.select %27, %50, %41 : vector<8x1xi1>, vector<8x1xf32>
    %70 = arith.select %29, %53, %69 : vector<8x1xi1>, vector<8x1xf32>
    %71 = arith.select %31, %56, %70 : vector<8x1xi1>, vector<8x1xf32>
    %72 = arith.select %27, %53, %44 : vector<8x1xi1>, vector<8x1xf32>
    %73 = arith.select %29, %59, %72 : vector<8x1xi1>, vector<8x1xf32>
    %74 = arith.select %31, %62, %73 : vector<8x1xi1>, vector<8x1xf32>
    %75 = arith.select %27, %56, %47 : vector<8x1xi1>, vector<8x1xf32>
    %76 = arith.select %29, %62, %75 : vector<8x1xi1>, vector<8x1xf32>
    %77 = arith.select %31, %65, %76 : vector<8x1xi1>, vector<8x1xf32>
    %78 = arith.select %27, %71, %68 : vector<8x1xi1>, vector<8x1xf32>
    %79 = arith.select %29, %74, %78 : vector<8x1xi1>, vector<8x1xf32>
    %80 = arith.select %31, %77, %79 : vector<8x1xi1>, vector<8x1xf32>
    %81 = arith.subf %68, %80 : vector<8x1xf32>
    %82 = arith.subf %71, %80 : vector<8x1xf32>
    %83 = arith.subf %74, %80 : vector<8x1xf32>
    %84 = arith.subf %77, %80 : vector<8x1xf32>
    %85 = arith.subf %38, %68 : vector<8x1xf32>
    %86 = arith.subf %41, %68 : vector<8x1xf32>
    %87 = arith.subf %44, %68 : vector<8x1xf32>
    %88 = arith.subf %47, %68 : vector<8x1xf32>
    %89 = arith.subf %41, %71 : vector<8x1xf32>
    %90 = arith.subf %50, %71 : vector<8x1xf32>
    %91 = arith.subf %53, %71 : vector<8x1xf32>
    %92 = arith.subf %56, %71 : vector<8x1xf32>
    %93 = arith.subf %44, %74 : vector<8x1xf32>
    %94 = arith.subf %53, %74 : vector<8x1xf32>
    %95 = arith.subf %59, %74 : vector<8x1xf32>
    %96 = arith.subf %62, %74 : vector<8x1xf32>
    %97 = arith.subf %47, %77 : vector<8x1xf32>
    %98 = arith.subf %56, %77 : vector<8x1xf32>
    %99 = arith.subf %62, %77 : vector<8x1xf32>
    %100 = arith.subf %65, %77 : vector<8x1xf32>
    %101 = arith.addf %38, %80 : vector<8x1xf32>
    %cst_10 = arith.constant 2.000000e+00 : f32
    %102 = vector.broadcast %cst_10 : f32 to vector<8x1xf32>
    %103 = arith.mulf %102, %68 : vector<8x1xf32>
    %104 = arith.subf %101, %103 : vector<8x1xf32>
    %cst_11 = arith.constant 9.99999968E-21 : f32
    %105 = vector.broadcast %cst_11 : f32 to vector<8x1xf32>
    %106 = arith.maximumf %104, %105 : vector<8x1xf32>
    %107 = math.rsqrt %106 : vector<8x1xf32>
    %108 = arith.addf %50, %80 : vector<8x1xf32>
    %cst_12 = arith.constant 2.000000e+00 : f32
    %109 = vector.broadcast %cst_12 : f32 to vector<8x1xf32>
    %110 = arith.mulf %109, %71 : vector<8x1xf32>
    %111 = arith.subf %108, %110 : vector<8x1xf32>
    %cst_13 = arith.constant 9.99999968E-21 : f32
    %112 = vector.broadcast %cst_13 : f32 to vector<8x1xf32>
    %113 = arith.maximumf %111, %112 : vector<8x1xf32>
    %114 = math.rsqrt %113 : vector<8x1xf32>
    %115 = arith.addf %59, %80 : vector<8x1xf32>
    %cst_14 = arith.constant 2.000000e+00 : f32
    %116 = vector.broadcast %cst_14 : f32 to vector<8x1xf32>
    %117 = arith.mulf %116, %74 : vector<8x1xf32>
    %118 = arith.subf %115, %117 : vector<8x1xf32>
    %cst_15 = arith.constant 9.99999968E-21 : f32
    %119 = vector.broadcast %cst_15 : f32 to vector<8x1xf32>
    %120 = arith.maximumf %118, %119 : vector<8x1xf32>
    %121 = math.rsqrt %120 : vector<8x1xf32>
    %122 = arith.addf %65, %80 : vector<8x1xf32>
    %cst_16 = arith.constant 2.000000e+00 : f32
    %123 = vector.broadcast %cst_16 : f32 to vector<8x1xf32>
    %124 = arith.mulf %123, %77 : vector<8x1xf32>
    %125 = arith.subf %122, %124 : vector<8x1xf32>
    %cst_17 = arith.constant 9.99999968E-21 : f32
    %126 = vector.broadcast %cst_17 : f32 to vector<8x1xf32>
    %127 = arith.maximumf %125, %126 : vector<8x1xf32>
    %128 = math.rsqrt %127 : vector<8x1xf32>
    %cst_18 = arith.constant 0.000000e+00 : f32
    %129 = vector.broadcast %cst_18 : f32 to vector<8x1xf32>
    %cst_19 = arith.constant 0.000000e+00 : f32
    %130 = vector.broadcast %cst_19 : f32 to vector<8x1xf32>
    %cst_20 = arith.constant 0.000000e+00 : f32
    %131 = vector.broadcast %cst_20 : f32 to vector<8x1xf32>
    %cst_21 = arith.constant 0.000000e+00 : f32
    %132 = vector.broadcast %cst_21 : f32 to vector<8x1xf32>
    %cst_22 = arith.constant 0.000000e+00 : f32
    %133 = vector.broadcast %cst_22 : f32 to vector<8x1xf32>
    %cst_23 = arith.constant 0.000000e+00 : f32
    %134 = vector.broadcast %cst_23 : f32 to vector<8x1xf32>
    %cst_24 = arith.constant 1.000000e+00 : f32
    %135 = vector.broadcast %cst_24 : f32 to vector<8x1xf32>
    %136 = arith.cmpf olt, %134, %135 : vector<8x1xf32>
    %137 = math.absf %32 : vector<8x1xf32>
    %138 = arith.mulf %137, %107 : vector<8x1xf32>
    %cst_25 = arith.constant 1.000000e+30 : f32
    %139 = vector.broadcast %cst_25 : f32 to vector<8x1xf32>
    %140 = arith.select %25, %139, %138 : vector<8x1xi1>, vector<8x1xf32>
    %141 = math.absf %33 : vector<8x1xf32>
    %142 = arith.mulf %141, %114 : vector<8x1xf32>
    %cst_26 = arith.constant 1.000000e+30 : f32
    %143 = vector.broadcast %cst_26 : f32 to vector<8x1xf32>
    %144 = arith.select %27, %143, %142 : vector<8x1xi1>, vector<8x1xf32>
    %145 = math.absf %34 : vector<8x1xf32>
    %146 = arith.mulf %145, %121 : vector<8x1xf32>
    %cst_27 = arith.constant 1.000000e+30 : f32
    %147 = vector.broadcast %cst_27 : f32 to vector<8x1xf32>
    %148 = arith.select %29, %147, %146 : vector<8x1xi1>, vector<8x1xf32>
    %149 = math.absf %35 : vector<8x1xf32>
    %150 = arith.mulf %149, %128 : vector<8x1xf32>
    %cst_28 = arith.constant 1.000000e+30 : f32
    %151 = vector.broadcast %cst_28 : f32 to vector<8x1xf32>
    %152 = arith.select %31, %151, %150 : vector<8x1xi1>, vector<8x1xf32>
    %c0_i32_29 = arith.constant 0 : i32
    %153 = vector.broadcast %c0_i32_29 : i32 to vector<8x1xi32>
    %154 = arith.cmpf olt, %144, %140 : vector<8x1xf32>
    %155 = arith.select %154, %144, %140 : vector<8x1xi1>, vector<8x1xf32>
    %c1_i32_30 = arith.constant 1 : i32
    %156 = vector.broadcast %c1_i32_30 : i32 to vector<8x1xi32>
    %157 = arith.select %154, %156, %153 : vector<8x1xi1>, vector<8x1xi32>
    %158 = arith.cmpf olt, %148, %155 : vector<8x1xf32>
    %159 = arith.select %158, %148, %155 : vector<8x1xi1>, vector<8x1xf32>
    %c2_i32_31 = arith.constant 2 : i32
    %160 = vector.broadcast %c2_i32_31 : i32 to vector<8x1xi32>
    %161 = arith.select %158, %160, %157 : vector<8x1xi1>, vector<8x1xi32>
    %162 = arith.cmpf olt, %152, %159 : vector<8x1xf32>
    %163 = arith.select %162, %152, %159 : vector<8x1xi1>, vector<8x1xf32>
    %c3_i32_32 = arith.constant 3 : i32
    %164 = vector.broadcast %c3_i32_32 : i32 to vector<8x1xi32>
    %165 = arith.select %162, %164, %161 : vector<8x1xi1>, vector<8x1xi32>
    %c0_i32_33 = arith.constant 0 : i32
    %166 = vector.broadcast %c0_i32_33 : i32 to vector<8x1xi32>
    %167 = arith.cmpi eq, %165, %166 : vector<8x1xi32>
    %c1_i32_34 = arith.constant 1 : i32
    %168 = vector.broadcast %c1_i32_34 : i32 to vector<8x1xi32>
    %169 = arith.cmpi eq, %165, %168 : vector<8x1xi32>
    %c2_i32_35 = arith.constant 2 : i32
    %170 = vector.broadcast %c2_i32_35 : i32 to vector<8x1xi32>
    %171 = arith.cmpi eq, %165, %170 : vector<8x1xi32>
    %c3_i32_36 = arith.constant 3 : i32
    %172 = vector.broadcast %c3_i32_36 : i32 to vector<8x1xi32>
    %173 = arith.cmpi eq, %165, %172 : vector<8x1xi32>
    %174 = arith.select %169, %114, %107 : vector<8x1xi1>, vector<8x1xf32>
    %175 = arith.select %171, %121, %174 : vector<8x1xi1>, vector<8x1xf32>
    %176 = arith.select %173, %128, %175 : vector<8x1xi1>, vector<8x1xf32>
    %cst_37 = arith.constant 9.99999974E-5 : f32
    %177 = vector.broadcast %cst_37 : f32 to vector<8x1xf32>
    %178 = arith.maximumf %163, %177 : vector<8x1xf32>
    %179 = arith.mulf %178, %176 : vector<8x1xf32>
    %cst_38 = arith.constant 0.000000e+00 : f32
    %180 = vector.broadcast %cst_38 : f32 to vector<8x1xf32>
    %181 = arith.select %136, %179, %180 : vector<8x1xi1>, vector<8x1xf32>
    %cst_39 = arith.constant 0.000000e+00 : f32
    %182 = vector.broadcast %cst_39 : f32 to vector<8x1xf32>
    %183 = arith.select %167, %181, %182 : vector<8x1xi1>, vector<8x1xf32>
    %184 = arith.addf %129, %183 : vector<8x1xf32>
    %cst_40 = arith.constant 0.000000e+00 : f32
    %185 = vector.broadcast %cst_40 : f32 to vector<8x1xf32>
    %186 = arith.select %169, %181, %185 : vector<8x1xi1>, vector<8x1xf32>
    %187 = arith.addf %130, %186 : vector<8x1xf32>
    %cst_41 = arith.constant 0.000000e+00 : f32
    %188 = vector.broadcast %cst_41 : f32 to vector<8x1xf32>
    %189 = arith.select %171, %181, %188 : vector<8x1xi1>, vector<8x1xf32>
    %190 = arith.addf %131, %189 : vector<8x1xf32>
    %cst_42 = arith.constant 0.000000e+00 : f32
    %191 = vector.broadcast %cst_42 : f32 to vector<8x1xf32>
    %192 = arith.select %173, %181, %191 : vector<8x1xi1>, vector<8x1xf32>
    %193 = arith.addf %132, %192 : vector<8x1xf32>
    %194 = arith.addf %133, %181 : vector<8x1xf32>
    %195 = arith.mulf %194, %81 : vector<8x1xf32>
    %196 = arith.subf %32, %195 : vector<8x1xf32>
    %197 = arith.mulf %184, %85 : vector<8x1xf32>
    %198 = arith.addf %196, %197 : vector<8x1xf32>
    %199 = arith.mulf %187, %89 : vector<8x1xf32>
    %200 = arith.addf %198, %199 : vector<8x1xf32>
    %201 = arith.mulf %190, %93 : vector<8x1xf32>
    %202 = arith.addf %200, %201 : vector<8x1xf32>
    %203 = arith.mulf %193, %97 : vector<8x1xf32>
    %204 = arith.addf %202, %203 : vector<8x1xf32>
    %205 = arith.subf %204, %32 : vector<8x1xf32>
    %cst_43 = arith.constant 1.020000e+00 : f32
    %206 = vector.broadcast %cst_43 : f32 to vector<8x1xf32>
    %207 = arith.mulf %206, %205 : vector<8x1xf32>
    %208 = arith.addf %32, %207 : vector<8x1xf32>
    %209 = arith.mulf %194, %82 : vector<8x1xf32>
    %210 = arith.subf %33, %209 : vector<8x1xf32>
    %211 = arith.mulf %184, %86 : vector<8x1xf32>
    %212 = arith.addf %210, %211 : vector<8x1xf32>
    %213 = arith.mulf %187, %90 : vector<8x1xf32>
    %214 = arith.addf %212, %213 : vector<8x1xf32>
    %215 = arith.mulf %190, %94 : vector<8x1xf32>
    %216 = arith.addf %214, %215 : vector<8x1xf32>
    %217 = arith.mulf %193, %98 : vector<8x1xf32>
    %218 = arith.addf %216, %217 : vector<8x1xf32>
    %219 = arith.subf %218, %33 : vector<8x1xf32>
    %cst_44 = arith.constant 1.020000e+00 : f32
    %220 = vector.broadcast %cst_44 : f32 to vector<8x1xf32>
    %221 = arith.mulf %220, %219 : vector<8x1xf32>
    %222 = arith.addf %33, %221 : vector<8x1xf32>
    %223 = arith.mulf %194, %83 : vector<8x1xf32>
    %224 = arith.subf %34, %223 : vector<8x1xf32>
    %225 = arith.mulf %184, %87 : vector<8x1xf32>
    %226 = arith.addf %224, %225 : vector<8x1xf32>
    %227 = arith.mulf %187, %91 : vector<8x1xf32>
    %228 = arith.addf %226, %227 : vector<8x1xf32>
    %229 = arith.mulf %190, %95 : vector<8x1xf32>
    %230 = arith.addf %228, %229 : vector<8x1xf32>
    %231 = arith.mulf %193, %99 : vector<8x1xf32>
    %232 = arith.addf %230, %231 : vector<8x1xf32>
    %233 = arith.subf %232, %34 : vector<8x1xf32>
    %cst_45 = arith.constant 1.020000e+00 : f32
    %234 = vector.broadcast %cst_45 : f32 to vector<8x1xf32>
    %235 = arith.mulf %234, %233 : vector<8x1xf32>
    %236 = arith.addf %34, %235 : vector<8x1xf32>
    %237 = arith.mulf %194, %84 : vector<8x1xf32>
    %238 = arith.subf %35, %237 : vector<8x1xf32>
    %239 = arith.mulf %184, %88 : vector<8x1xf32>
    %240 = arith.addf %238, %239 : vector<8x1xf32>
    %241 = arith.mulf %187, %92 : vector<8x1xf32>
    %242 = arith.addf %240, %241 : vector<8x1xf32>
    %243 = arith.mulf %190, %96 : vector<8x1xf32>
    %244 = arith.addf %242, %243 : vector<8x1xf32>
    %245 = arith.mulf %193, %100 : vector<8x1xf32>
    %246 = arith.addf %244, %245 : vector<8x1xf32>
    %247 = arith.subf %246, %35 : vector<8x1xf32>
    %cst_46 = arith.constant 1.020000e+00 : f32
    %248 = vector.broadcast %cst_46 : f32 to vector<8x1xf32>
    %249 = arith.mulf %248, %247 : vector<8x1xf32>
    %250 = arith.addf %35, %249 : vector<8x1xf32>
    %cst_47 = arith.constant -1.000000e+30 : f32
    %251 = vector.broadcast %cst_47 : f32 to vector<8x1xf32>
    %252 = arith.select %25, %251, %208 : vector<8x1xi1>, vector<8x1xf32>
    %cst_48 = arith.constant -1.000000e+30 : f32
    %253 = vector.broadcast %cst_48 : f32 to vector<8x1xf32>
    %254 = arith.select %27, %253, %222 : vector<8x1xi1>, vector<8x1xf32>
    %255 = arith.maximumf %252, %254 : vector<8x1xf32>
    %cst_49 = arith.constant -1.000000e+30 : f32
    %256 = vector.broadcast %cst_49 : f32 to vector<8x1xf32>
    %257 = arith.select %29, %256, %236 : vector<8x1xi1>, vector<8x1xf32>
    %258 = arith.maximumf %255, %257 : vector<8x1xf32>
    %cst_50 = arith.constant -1.000000e+30 : f32
    %259 = vector.broadcast %cst_50 : f32 to vector<8x1xf32>
    %260 = arith.select %31, %259, %250 : vector<8x1xi1>, vector<8x1xf32>
    %261 = arith.maximumf %258, %260 : vector<8x1xf32>
    %cst_51 = arith.constant 0.000000e+00 : f32
    %262 = vector.broadcast %cst_51 : f32 to vector<8x1xf32>
    %263 = arith.cmpf ogt, %261, %262 : vector<8x1xf32>
    %cst_52 = arith.constant 1.000000e+00 : f32
    %cst_53 = arith.constant 0.000000e+00 : f32
    %264 = vector.broadcast %cst_52 : f32 to vector<8x1xf32>
    %265 = vector.broadcast %cst_53 : f32 to vector<8x1xf32>
    %266 = arith.select %263, %264, %265 : vector<8x1xi1>, vector<8x1xf32>
    %267 = arith.addf %134, %266 : vector<8x1xf32>
    %cst_54 = arith.constant 1.000000e+00 : f32
    %268 = vector.broadcast %cst_54 : f32 to vector<8x1xf32>
    %269 = arith.cmpf olt, %267, %268 : vector<8x1xf32>
    %270 = math.absf %204 : vector<8x1xf32>
    %271 = arith.mulf %270, %107 : vector<8x1xf32>
    %cst_55 = arith.constant 1.000000e+30 : f32
    %272 = vector.broadcast %cst_55 : f32 to vector<8x1xf32>
    %273 = arith.select %25, %272, %271 : vector<8x1xi1>, vector<8x1xf32>
    %274 = math.absf %218 : vector<8x1xf32>
    %275 = arith.mulf %274, %114 : vector<8x1xf32>
    %cst_56 = arith.constant 1.000000e+30 : f32
    %276 = vector.broadcast %cst_56 : f32 to vector<8x1xf32>
    %277 = arith.select %27, %276, %275 : vector<8x1xi1>, vector<8x1xf32>
    %278 = math.absf %232 : vector<8x1xf32>
    %279 = arith.mulf %278, %121 : vector<8x1xf32>
    %cst_57 = arith.constant 1.000000e+30 : f32
    %280 = vector.broadcast %cst_57 : f32 to vector<8x1xf32>
    %281 = arith.select %29, %280, %279 : vector<8x1xi1>, vector<8x1xf32>
    %282 = math.absf %246 : vector<8x1xf32>
    %283 = arith.mulf %282, %128 : vector<8x1xf32>
    %cst_58 = arith.constant 1.000000e+30 : f32
    %284 = vector.broadcast %cst_58 : f32 to vector<8x1xf32>
    %285 = arith.select %31, %284, %283 : vector<8x1xi1>, vector<8x1xf32>
    %c0_i32_59 = arith.constant 0 : i32
    %286 = vector.broadcast %c0_i32_59 : i32 to vector<8x1xi32>
    %287 = arith.cmpf olt, %277, %273 : vector<8x1xf32>
    %288 = arith.select %287, %277, %273 : vector<8x1xi1>, vector<8x1xf32>
    %c1_i32_60 = arith.constant 1 : i32
    %289 = vector.broadcast %c1_i32_60 : i32 to vector<8x1xi32>
    %290 = arith.select %287, %289, %286 : vector<8x1xi1>, vector<8x1xi32>
    %291 = arith.cmpf olt, %281, %288 : vector<8x1xf32>
    %292 = arith.select %291, %281, %288 : vector<8x1xi1>, vector<8x1xf32>
    %c2_i32_61 = arith.constant 2 : i32
    %293 = vector.broadcast %c2_i32_61 : i32 to vector<8x1xi32>
    %294 = arith.select %291, %293, %290 : vector<8x1xi1>, vector<8x1xi32>
    %295 = arith.cmpf olt, %285, %292 : vector<8x1xf32>
    %296 = arith.select %295, %285, %292 : vector<8x1xi1>, vector<8x1xf32>
    %c3_i32_62 = arith.constant 3 : i32
    %297 = vector.broadcast %c3_i32_62 : i32 to vector<8x1xi32>
    %298 = arith.select %295, %297, %294 : vector<8x1xi1>, vector<8x1xi32>
    %c0_i32_63 = arith.constant 0 : i32
    %299 = vector.broadcast %c0_i32_63 : i32 to vector<8x1xi32>
    %300 = arith.cmpi eq, %298, %299 : vector<8x1xi32>
    %c1_i32_64 = arith.constant 1 : i32
    %301 = vector.broadcast %c1_i32_64 : i32 to vector<8x1xi32>
    %302 = arith.cmpi eq, %298, %301 : vector<8x1xi32>
    %c2_i32_65 = arith.constant 2 : i32
    %303 = vector.broadcast %c2_i32_65 : i32 to vector<8x1xi32>
    %304 = arith.cmpi eq, %298, %303 : vector<8x1xi32>
    %c3_i32_66 = arith.constant 3 : i32
    %305 = vector.broadcast %c3_i32_66 : i32 to vector<8x1xi32>
    %306 = arith.cmpi eq, %298, %305 : vector<8x1xi32>
    %307 = arith.select %302, %114, %107 : vector<8x1xi1>, vector<8x1xf32>
    %308 = arith.select %304, %121, %307 : vector<8x1xi1>, vector<8x1xf32>
    %309 = arith.select %306, %128, %308 : vector<8x1xi1>, vector<8x1xf32>
    %cst_67 = arith.constant 9.99999974E-5 : f32
    %310 = vector.broadcast %cst_67 : f32 to vector<8x1xf32>
    %311 = arith.maximumf %296, %310 : vector<8x1xf32>
    %312 = arith.mulf %311, %309 : vector<8x1xf32>
    %cst_68 = arith.constant 0.000000e+00 : f32
    %313 = vector.broadcast %cst_68 : f32 to vector<8x1xf32>
    %314 = arith.select %269, %312, %313 : vector<8x1xi1>, vector<8x1xf32>
    %cst_69 = arith.constant 0.000000e+00 : f32
    %315 = vector.broadcast %cst_69 : f32 to vector<8x1xf32>
    %316 = arith.select %300, %314, %315 : vector<8x1xi1>, vector<8x1xf32>
    %317 = arith.addf %184, %316 : vector<8x1xf32>
    %cst_70 = arith.constant 0.000000e+00 : f32
    %318 = vector.broadcast %cst_70 : f32 to vector<8x1xf32>
    %319 = arith.select %302, %314, %318 : vector<8x1xi1>, vector<8x1xf32>
    %320 = arith.addf %187, %319 : vector<8x1xf32>
    %cst_71 = arith.constant 0.000000e+00 : f32
    %321 = vector.broadcast %cst_71 : f32 to vector<8x1xf32>
    %322 = arith.select %304, %314, %321 : vector<8x1xi1>, vector<8x1xf32>
    %323 = arith.addf %190, %322 : vector<8x1xf32>
    %cst_72 = arith.constant 0.000000e+00 : f32
    %324 = vector.broadcast %cst_72 : f32 to vector<8x1xf32>
    %325 = arith.select %306, %314, %324 : vector<8x1xi1>, vector<8x1xf32>
    %326 = arith.addf %193, %325 : vector<8x1xf32>
    %327 = arith.addf %194, %314 : vector<8x1xf32>
    %328 = arith.mulf %327, %81 : vector<8x1xf32>
    %329 = arith.subf %32, %328 : vector<8x1xf32>
    %330 = arith.mulf %317, %85 : vector<8x1xf32>
    %331 = arith.addf %329, %330 : vector<8x1xf32>
    %332 = arith.mulf %320, %89 : vector<8x1xf32>
    %333 = arith.addf %331, %332 : vector<8x1xf32>
    %334 = arith.mulf %323, %93 : vector<8x1xf32>
    %335 = arith.addf %333, %334 : vector<8x1xf32>
    %336 = arith.mulf %326, %97 : vector<8x1xf32>
    %337 = arith.addf %335, %336 : vector<8x1xf32>
    %338 = arith.subf %337, %32 : vector<8x1xf32>
    %cst_73 = arith.constant 1.020000e+00 : f32
    %339 = vector.broadcast %cst_73 : f32 to vector<8x1xf32>
    %340 = arith.mulf %339, %338 : vector<8x1xf32>
    %341 = arith.addf %32, %340 : vector<8x1xf32>
    %342 = arith.mulf %327, %82 : vector<8x1xf32>
    %343 = arith.subf %33, %342 : vector<8x1xf32>
    %344 = arith.mulf %317, %86 : vector<8x1xf32>
    %345 = arith.addf %343, %344 : vector<8x1xf32>
    %346 = arith.mulf %320, %90 : vector<8x1xf32>
    %347 = arith.addf %345, %346 : vector<8x1xf32>
    %348 = arith.mulf %323, %94 : vector<8x1xf32>
    %349 = arith.addf %347, %348 : vector<8x1xf32>
    %350 = arith.mulf %326, %98 : vector<8x1xf32>
    %351 = arith.addf %349, %350 : vector<8x1xf32>
    %352 = arith.subf %351, %33 : vector<8x1xf32>
    %cst_74 = arith.constant 1.020000e+00 : f32
    %353 = vector.broadcast %cst_74 : f32 to vector<8x1xf32>
    %354 = arith.mulf %353, %352 : vector<8x1xf32>
    %355 = arith.addf %33, %354 : vector<8x1xf32>
    %356 = arith.mulf %327, %83 : vector<8x1xf32>
    %357 = arith.subf %34, %356 : vector<8x1xf32>
    %358 = arith.mulf %317, %87 : vector<8x1xf32>
    %359 = arith.addf %357, %358 : vector<8x1xf32>
    %360 = arith.mulf %320, %91 : vector<8x1xf32>
    %361 = arith.addf %359, %360 : vector<8x1xf32>
    %362 = arith.mulf %323, %95 : vector<8x1xf32>
    %363 = arith.addf %361, %362 : vector<8x1xf32>
    %364 = arith.mulf %326, %99 : vector<8x1xf32>
    %365 = arith.addf %363, %364 : vector<8x1xf32>
    %366 = arith.subf %365, %34 : vector<8x1xf32>
    %cst_75 = arith.constant 1.020000e+00 : f32
    %367 = vector.broadcast %cst_75 : f32 to vector<8x1xf32>
    %368 = arith.mulf %367, %366 : vector<8x1xf32>
    %369 = arith.addf %34, %368 : vector<8x1xf32>
    %370 = arith.mulf %327, %84 : vector<8x1xf32>
    %371 = arith.subf %35, %370 : vector<8x1xf32>
    %372 = arith.mulf %317, %88 : vector<8x1xf32>
    %373 = arith.addf %371, %372 : vector<8x1xf32>
    %374 = arith.mulf %320, %92 : vector<8x1xf32>
    %375 = arith.addf %373, %374 : vector<8x1xf32>
    %376 = arith.mulf %323, %96 : vector<8x1xf32>
    %377 = arith.addf %375, %376 : vector<8x1xf32>
    %378 = arith.mulf %326, %100 : vector<8x1xf32>
    %379 = arith.addf %377, %378 : vector<8x1xf32>
    %380 = arith.subf %379, %35 : vector<8x1xf32>
    %cst_76 = arith.constant 1.020000e+00 : f32
    %381 = vector.broadcast %cst_76 : f32 to vector<8x1xf32>
    %382 = arith.mulf %381, %380 : vector<8x1xf32>
    %383 = arith.addf %35, %382 : vector<8x1xf32>
    %cst_77 = arith.constant -1.000000e+30 : f32
    %384 = vector.broadcast %cst_77 : f32 to vector<8x1xf32>
    %385 = arith.select %25, %384, %341 : vector<8x1xi1>, vector<8x1xf32>
    %cst_78 = arith.constant -1.000000e+30 : f32
    %386 = vector.broadcast %cst_78 : f32 to vector<8x1xf32>
    %387 = arith.select %27, %386, %355 : vector<8x1xi1>, vector<8x1xf32>
    %388 = arith.maximumf %385, %387 : vector<8x1xf32>
    %cst_79 = arith.constant -1.000000e+30 : f32
    %389 = vector.broadcast %cst_79 : f32 to vector<8x1xf32>
    %390 = arith.select %29, %389, %369 : vector<8x1xi1>, vector<8x1xf32>
    %391 = arith.maximumf %388, %390 : vector<8x1xf32>
    %cst_80 = arith.constant -1.000000e+30 : f32
    %392 = vector.broadcast %cst_80 : f32 to vector<8x1xf32>
    %393 = arith.select %31, %392, %383 : vector<8x1xi1>, vector<8x1xf32>
    %394 = arith.maximumf %391, %393 : vector<8x1xf32>
    %cst_81 = arith.constant 0.000000e+00 : f32
    %395 = vector.broadcast %cst_81 : f32 to vector<8x1xf32>
    %396 = arith.cmpf ogt, %394, %395 : vector<8x1xf32>
    %cst_82 = arith.constant 1.000000e+00 : f32
    %cst_83 = arith.constant 0.000000e+00 : f32
    %397 = vector.broadcast %cst_82 : f32 to vector<8x1xf32>
    %398 = vector.broadcast %cst_83 : f32 to vector<8x1xf32>
    %399 = arith.select %396, %397, %398 : vector<8x1xi1>, vector<8x1xf32>
    %400 = arith.addf %267, %399 : vector<8x1xf32>
    %cst_84 = arith.constant 1.000000e+00 : f32
    %401 = vector.broadcast %cst_84 : f32 to vector<8x1xf32>
    %402 = arith.cmpf olt, %400, %401 : vector<8x1xf32>
    %403 = math.absf %337 : vector<8x1xf32>
    %404 = arith.mulf %403, %107 : vector<8x1xf32>
    %cst_85 = arith.constant 1.000000e+30 : f32
    %405 = vector.broadcast %cst_85 : f32 to vector<8x1xf32>
    %406 = arith.select %25, %405, %404 : vector<8x1xi1>, vector<8x1xf32>
    %407 = math.absf %351 : vector<8x1xf32>
    %408 = arith.mulf %407, %114 : vector<8x1xf32>
    %cst_86 = arith.constant 1.000000e+30 : f32
    %409 = vector.broadcast %cst_86 : f32 to vector<8x1xf32>
    %410 = arith.select %27, %409, %408 : vector<8x1xi1>, vector<8x1xf32>
    %411 = math.absf %365 : vector<8x1xf32>
    %412 = arith.mulf %411, %121 : vector<8x1xf32>
    %cst_87 = arith.constant 1.000000e+30 : f32
    %413 = vector.broadcast %cst_87 : f32 to vector<8x1xf32>
    %414 = arith.select %29, %413, %412 : vector<8x1xi1>, vector<8x1xf32>
    %415 = math.absf %379 : vector<8x1xf32>
    %416 = arith.mulf %415, %128 : vector<8x1xf32>
    %cst_88 = arith.constant 1.000000e+30 : f32
    %417 = vector.broadcast %cst_88 : f32 to vector<8x1xf32>
    %418 = arith.select %31, %417, %416 : vector<8x1xi1>, vector<8x1xf32>
    %c0_i32_89 = arith.constant 0 : i32
    %419 = vector.broadcast %c0_i32_89 : i32 to vector<8x1xi32>
    %420 = arith.cmpf olt, %410, %406 : vector<8x1xf32>
    %421 = arith.select %420, %410, %406 : vector<8x1xi1>, vector<8x1xf32>
    %c1_i32_90 = arith.constant 1 : i32
    %422 = vector.broadcast %c1_i32_90 : i32 to vector<8x1xi32>
    %423 = arith.select %420, %422, %419 : vector<8x1xi1>, vector<8x1xi32>
    %424 = arith.cmpf olt, %414, %421 : vector<8x1xf32>
    %425 = arith.select %424, %414, %421 : vector<8x1xi1>, vector<8x1xf32>
    %c2_i32_91 = arith.constant 2 : i32
    %426 = vector.broadcast %c2_i32_91 : i32 to vector<8x1xi32>
    %427 = arith.select %424, %426, %423 : vector<8x1xi1>, vector<8x1xi32>
    %428 = arith.cmpf olt, %418, %425 : vector<8x1xf32>
    %429 = arith.select %428, %418, %425 : vector<8x1xi1>, vector<8x1xf32>
    %c3_i32_92 = arith.constant 3 : i32
    %430 = vector.broadcast %c3_i32_92 : i32 to vector<8x1xi32>
    %431 = arith.select %428, %430, %427 : vector<8x1xi1>, vector<8x1xi32>
    %c0_i32_93 = arith.constant 0 : i32
    %432 = vector.broadcast %c0_i32_93 : i32 to vector<8x1xi32>
    %433 = arith.cmpi eq, %431, %432 : vector<8x1xi32>
    %c1_i32_94 = arith.constant 1 : i32
    %434 = vector.broadcast %c1_i32_94 : i32 to vector<8x1xi32>
    %435 = arith.cmpi eq, %431, %434 : vector<8x1xi32>
    %c2_i32_95 = arith.constant 2 : i32
    %436 = vector.broadcast %c2_i32_95 : i32 to vector<8x1xi32>
    %437 = arith.cmpi eq, %431, %436 : vector<8x1xi32>
    %c3_i32_96 = arith.constant 3 : i32
    %438 = vector.broadcast %c3_i32_96 : i32 to vector<8x1xi32>
    %439 = arith.cmpi eq, %431, %438 : vector<8x1xi32>
    %440 = arith.select %435, %114, %107 : vector<8x1xi1>, vector<8x1xf32>
    %441 = arith.select %437, %121, %440 : vector<8x1xi1>, vector<8x1xf32>
    %442 = arith.select %439, %128, %441 : vector<8x1xi1>, vector<8x1xf32>
    %cst_97 = arith.constant 9.99999974E-5 : f32
    %443 = vector.broadcast %cst_97 : f32 to vector<8x1xf32>
    %444 = arith.maximumf %429, %443 : vector<8x1xf32>
    %445 = arith.mulf %444, %442 : vector<8x1xf32>
    %cst_98 = arith.constant 0.000000e+00 : f32
    %446 = vector.broadcast %cst_98 : f32 to vector<8x1xf32>
    %447 = arith.select %402, %445, %446 : vector<8x1xi1>, vector<8x1xf32>
    %cst_99 = arith.constant 0.000000e+00 : f32
    %448 = vector.broadcast %cst_99 : f32 to vector<8x1xf32>
    %449 = arith.select %433, %447, %448 : vector<8x1xi1>, vector<8x1xf32>
    %450 = arith.addf %317, %449 : vector<8x1xf32>
    %cst_100 = arith.constant 0.000000e+00 : f32
    %451 = vector.broadcast %cst_100 : f32 to vector<8x1xf32>
    %452 = arith.select %435, %447, %451 : vector<8x1xi1>, vector<8x1xf32>
    %453 = arith.addf %320, %452 : vector<8x1xf32>
    %cst_101 = arith.constant 0.000000e+00 : f32
    %454 = vector.broadcast %cst_101 : f32 to vector<8x1xf32>
    %455 = arith.select %437, %447, %454 : vector<8x1xi1>, vector<8x1xf32>
    %456 = arith.addf %323, %455 : vector<8x1xf32>
    %cst_102 = arith.constant 0.000000e+00 : f32
    %457 = vector.broadcast %cst_102 : f32 to vector<8x1xf32>
    %458 = arith.select %439, %447, %457 : vector<8x1xi1>, vector<8x1xf32>
    %459 = arith.addf %326, %458 : vector<8x1xf32>
    %460 = arith.addf %327, %447 : vector<8x1xf32>
    %461 = arith.mulf %460, %81 : vector<8x1xf32>
    %462 = arith.subf %32, %461 : vector<8x1xf32>
    %463 = arith.mulf %450, %85 : vector<8x1xf32>
    %464 = arith.addf %462, %463 : vector<8x1xf32>
    %465 = arith.mulf %453, %89 : vector<8x1xf32>
    %466 = arith.addf %464, %465 : vector<8x1xf32>
    %467 = arith.mulf %456, %93 : vector<8x1xf32>
    %468 = arith.addf %466, %467 : vector<8x1xf32>
    %469 = arith.mulf %459, %97 : vector<8x1xf32>
    %470 = arith.addf %468, %469 : vector<8x1xf32>
    %471 = arith.subf %470, %32 : vector<8x1xf32>
    %cst_103 = arith.constant 1.020000e+00 : f32
    %472 = vector.broadcast %cst_103 : f32 to vector<8x1xf32>
    %473 = arith.mulf %472, %471 : vector<8x1xf32>
    %474 = arith.addf %32, %473 : vector<8x1xf32>
    %475 = arith.mulf %460, %82 : vector<8x1xf32>
    %476 = arith.subf %33, %475 : vector<8x1xf32>
    %477 = arith.mulf %450, %86 : vector<8x1xf32>
    %478 = arith.addf %476, %477 : vector<8x1xf32>
    %479 = arith.mulf %453, %90 : vector<8x1xf32>
    %480 = arith.addf %478, %479 : vector<8x1xf32>
    %481 = arith.mulf %456, %94 : vector<8x1xf32>
    %482 = arith.addf %480, %481 : vector<8x1xf32>
    %483 = arith.mulf %459, %98 : vector<8x1xf32>
    %484 = arith.addf %482, %483 : vector<8x1xf32>
    %485 = arith.subf %484, %33 : vector<8x1xf32>
    %cst_104 = arith.constant 1.020000e+00 : f32
    %486 = vector.broadcast %cst_104 : f32 to vector<8x1xf32>
    %487 = arith.mulf %486, %485 : vector<8x1xf32>
    %488 = arith.addf %33, %487 : vector<8x1xf32>
    %489 = arith.mulf %460, %83 : vector<8x1xf32>
    %490 = arith.subf %34, %489 : vector<8x1xf32>
    %491 = arith.mulf %450, %87 : vector<8x1xf32>
    %492 = arith.addf %490, %491 : vector<8x1xf32>
    %493 = arith.mulf %453, %91 : vector<8x1xf32>
    %494 = arith.addf %492, %493 : vector<8x1xf32>
    %495 = arith.mulf %456, %95 : vector<8x1xf32>
    %496 = arith.addf %494, %495 : vector<8x1xf32>
    %497 = arith.mulf %459, %99 : vector<8x1xf32>
    %498 = arith.addf %496, %497 : vector<8x1xf32>
    %499 = arith.subf %498, %34 : vector<8x1xf32>
    %cst_105 = arith.constant 1.020000e+00 : f32
    %500 = vector.broadcast %cst_105 : f32 to vector<8x1xf32>
    %501 = arith.mulf %500, %499 : vector<8x1xf32>
    %502 = arith.addf %34, %501 : vector<8x1xf32>
    %503 = arith.mulf %460, %84 : vector<8x1xf32>
    %504 = arith.subf %35, %503 : vector<8x1xf32>
    %505 = arith.mulf %450, %88 : vector<8x1xf32>
    %506 = arith.addf %504, %505 : vector<8x1xf32>
    %507 = arith.mulf %453, %92 : vector<8x1xf32>
    %508 = arith.addf %506, %507 : vector<8x1xf32>
    %509 = arith.mulf %456, %96 : vector<8x1xf32>
    %510 = arith.addf %508, %509 : vector<8x1xf32>
    %511 = arith.mulf %459, %100 : vector<8x1xf32>
    %512 = arith.addf %510, %511 : vector<8x1xf32>
    %513 = arith.subf %512, %35 : vector<8x1xf32>
    %cst_106 = arith.constant 1.020000e+00 : f32
    %514 = vector.broadcast %cst_106 : f32 to vector<8x1xf32>
    %515 = arith.mulf %514, %513 : vector<8x1xf32>
    %516 = arith.addf %35, %515 : vector<8x1xf32>
    %cst_107 = arith.constant -1.000000e+30 : f32
    %517 = vector.broadcast %cst_107 : f32 to vector<8x1xf32>
    %518 = arith.select %25, %517, %474 : vector<8x1xi1>, vector<8x1xf32>
    %cst_108 = arith.constant -1.000000e+30 : f32
    %519 = vector.broadcast %cst_108 : f32 to vector<8x1xf32>
    %520 = arith.select %27, %519, %488 : vector<8x1xi1>, vector<8x1xf32>
    %521 = arith.maximumf %518, %520 : vector<8x1xf32>
    %cst_109 = arith.constant -1.000000e+30 : f32
    %522 = vector.broadcast %cst_109 : f32 to vector<8x1xf32>
    %523 = arith.select %29, %522, %502 : vector<8x1xi1>, vector<8x1xf32>
    %524 = arith.maximumf %521, %523 : vector<8x1xf32>
    %cst_110 = arith.constant -1.000000e+30 : f32
    %525 = vector.broadcast %cst_110 : f32 to vector<8x1xf32>
    %526 = arith.select %31, %525, %516 : vector<8x1xi1>, vector<8x1xf32>
    %527 = arith.maximumf %524, %526 : vector<8x1xf32>
    %cst_111 = arith.constant 0.000000e+00 : f32
    %528 = vector.broadcast %cst_111 : f32 to vector<8x1xf32>
    %529 = arith.cmpf ogt, %527, %528 : vector<8x1xf32>
    %cst_112 = arith.constant 1.000000e+00 : f32
    %cst_113 = arith.constant 0.000000e+00 : f32
    %530 = vector.broadcast %cst_112 : f32 to vector<8x1xf32>
    %531 = vector.broadcast %cst_113 : f32 to vector<8x1xf32>
    %532 = arith.select %529, %530, %531 : vector<8x1xi1>, vector<8x1xf32>
    %533 = arith.addf %400, %532 : vector<8x1xf32>
    %cst_114 = arith.constant 1.000000e+00 : f32
    %534 = vector.broadcast %cst_114 : f32 to vector<8x1xf32>
    %535 = arith.cmpf olt, %533, %534 : vector<8x1xf32>
    %536 = math.absf %470 : vector<8x1xf32>
    %537 = arith.mulf %536, %107 : vector<8x1xf32>
    %cst_115 = arith.constant 1.000000e+30 : f32
    %538 = vector.broadcast %cst_115 : f32 to vector<8x1xf32>
    %539 = arith.select %25, %538, %537 : vector<8x1xi1>, vector<8x1xf32>
    %540 = math.absf %484 : vector<8x1xf32>
    %541 = arith.mulf %540, %114 : vector<8x1xf32>
    %cst_116 = arith.constant 1.000000e+30 : f32
    %542 = vector.broadcast %cst_116 : f32 to vector<8x1xf32>
    %543 = arith.select %27, %542, %541 : vector<8x1xi1>, vector<8x1xf32>
    %544 = math.absf %498 : vector<8x1xf32>
    %545 = arith.mulf %544, %121 : vector<8x1xf32>
    %cst_117 = arith.constant 1.000000e+30 : f32
    %546 = vector.broadcast %cst_117 : f32 to vector<8x1xf32>
    %547 = arith.select %29, %546, %545 : vector<8x1xi1>, vector<8x1xf32>
    %548 = math.absf %512 : vector<8x1xf32>
    %549 = arith.mulf %548, %128 : vector<8x1xf32>
    %cst_118 = arith.constant 1.000000e+30 : f32
    %550 = vector.broadcast %cst_118 : f32 to vector<8x1xf32>
    %551 = arith.select %31, %550, %549 : vector<8x1xi1>, vector<8x1xf32>
    %c0_i32_119 = arith.constant 0 : i32
    %552 = vector.broadcast %c0_i32_119 : i32 to vector<8x1xi32>
    %553 = arith.cmpf olt, %543, %539 : vector<8x1xf32>
    %554 = arith.select %553, %543, %539 : vector<8x1xi1>, vector<8x1xf32>
    %c1_i32_120 = arith.constant 1 : i32
    %555 = vector.broadcast %c1_i32_120 : i32 to vector<8x1xi32>
    %556 = arith.select %553, %555, %552 : vector<8x1xi1>, vector<8x1xi32>
    %557 = arith.cmpf olt, %547, %554 : vector<8x1xf32>
    %558 = arith.select %557, %547, %554 : vector<8x1xi1>, vector<8x1xf32>
    %c2_i32_121 = arith.constant 2 : i32
    %559 = vector.broadcast %c2_i32_121 : i32 to vector<8x1xi32>
    %560 = arith.select %557, %559, %556 : vector<8x1xi1>, vector<8x1xi32>
    %561 = arith.cmpf olt, %551, %558 : vector<8x1xf32>
    %562 = arith.select %561, %551, %558 : vector<8x1xi1>, vector<8x1xf32>
    %c3_i32_122 = arith.constant 3 : i32
    %563 = vector.broadcast %c3_i32_122 : i32 to vector<8x1xi32>
    %564 = arith.select %561, %563, %560 : vector<8x1xi1>, vector<8x1xi32>
    %c0_i32_123 = arith.constant 0 : i32
    %565 = vector.broadcast %c0_i32_123 : i32 to vector<8x1xi32>
    %566 = arith.cmpi eq, %564, %565 : vector<8x1xi32>
    %c1_i32_124 = arith.constant 1 : i32
    %567 = vector.broadcast %c1_i32_124 : i32 to vector<8x1xi32>
    %568 = arith.cmpi eq, %564, %567 : vector<8x1xi32>
    %c2_i32_125 = arith.constant 2 : i32
    %569 = vector.broadcast %c2_i32_125 : i32 to vector<8x1xi32>
    %570 = arith.cmpi eq, %564, %569 : vector<8x1xi32>
    %c3_i32_126 = arith.constant 3 : i32
    %571 = vector.broadcast %c3_i32_126 : i32 to vector<8x1xi32>
    %572 = arith.cmpi eq, %564, %571 : vector<8x1xi32>
    %573 = arith.select %568, %114, %107 : vector<8x1xi1>, vector<8x1xf32>
    %574 = arith.select %570, %121, %573 : vector<8x1xi1>, vector<8x1xf32>
    %575 = arith.select %572, %128, %574 : vector<8x1xi1>, vector<8x1xf32>
    %cst_127 = arith.constant 9.99999974E-5 : f32
    %576 = vector.broadcast %cst_127 : f32 to vector<8x1xf32>
    %577 = arith.maximumf %562, %576 : vector<8x1xf32>
    %578 = arith.mulf %577, %575 : vector<8x1xf32>
    %cst_128 = arith.constant 0.000000e+00 : f32
    %579 = vector.broadcast %cst_128 : f32 to vector<8x1xf32>
    %580 = arith.select %535, %578, %579 : vector<8x1xi1>, vector<8x1xf32>
    %cst_129 = arith.constant 0.000000e+00 : f32
    %581 = vector.broadcast %cst_129 : f32 to vector<8x1xf32>
    %582 = arith.select %566, %580, %581 : vector<8x1xi1>, vector<8x1xf32>
    %583 = arith.addf %450, %582 : vector<8x1xf32>
    %cst_130 = arith.constant 0.000000e+00 : f32
    %584 = vector.broadcast %cst_130 : f32 to vector<8x1xf32>
    %585 = arith.select %568, %580, %584 : vector<8x1xi1>, vector<8x1xf32>
    %586 = arith.addf %453, %585 : vector<8x1xf32>
    %cst_131 = arith.constant 0.000000e+00 : f32
    %587 = vector.broadcast %cst_131 : f32 to vector<8x1xf32>
    %588 = arith.select %570, %580, %587 : vector<8x1xi1>, vector<8x1xf32>
    %589 = arith.addf %456, %588 : vector<8x1xf32>
    %cst_132 = arith.constant 0.000000e+00 : f32
    %590 = vector.broadcast %cst_132 : f32 to vector<8x1xf32>
    %591 = arith.select %572, %580, %590 : vector<8x1xi1>, vector<8x1xf32>
    %592 = arith.addf %459, %591 : vector<8x1xf32>
    %593 = arith.addf %460, %580 : vector<8x1xf32>
    %594 = arith.mulf %593, %81 : vector<8x1xf32>
    %595 = arith.subf %32, %594 : vector<8x1xf32>
    %596 = arith.mulf %583, %85 : vector<8x1xf32>
    %597 = arith.addf %595, %596 : vector<8x1xf32>
    %598 = arith.mulf %586, %89 : vector<8x1xf32>
    %599 = arith.addf %597, %598 : vector<8x1xf32>
    %600 = arith.mulf %589, %93 : vector<8x1xf32>
    %601 = arith.addf %599, %600 : vector<8x1xf32>
    %602 = arith.mulf %592, %97 : vector<8x1xf32>
    %603 = arith.addf %601, %602 : vector<8x1xf32>
    %604 = arith.subf %603, %32 : vector<8x1xf32>
    %cst_133 = arith.constant 1.020000e+00 : f32
    %605 = vector.broadcast %cst_133 : f32 to vector<8x1xf32>
    %606 = arith.mulf %605, %604 : vector<8x1xf32>
    %607 = arith.addf %32, %606 : vector<8x1xf32>
    %608 = arith.mulf %593, %82 : vector<8x1xf32>
    %609 = arith.subf %33, %608 : vector<8x1xf32>
    %610 = arith.mulf %583, %86 : vector<8x1xf32>
    %611 = arith.addf %609, %610 : vector<8x1xf32>
    %612 = arith.mulf %586, %90 : vector<8x1xf32>
    %613 = arith.addf %611, %612 : vector<8x1xf32>
    %614 = arith.mulf %589, %94 : vector<8x1xf32>
    %615 = arith.addf %613, %614 : vector<8x1xf32>
    %616 = arith.mulf %592, %98 : vector<8x1xf32>
    %617 = arith.addf %615, %616 : vector<8x1xf32>
    %618 = arith.subf %617, %33 : vector<8x1xf32>
    %cst_134 = arith.constant 1.020000e+00 : f32
    %619 = vector.broadcast %cst_134 : f32 to vector<8x1xf32>
    %620 = arith.mulf %619, %618 : vector<8x1xf32>
    %621 = arith.addf %33, %620 : vector<8x1xf32>
    %622 = arith.mulf %593, %83 : vector<8x1xf32>
    %623 = arith.subf %34, %622 : vector<8x1xf32>
    %624 = arith.mulf %583, %87 : vector<8x1xf32>
    %625 = arith.addf %623, %624 : vector<8x1xf32>
    %626 = arith.mulf %586, %91 : vector<8x1xf32>
    %627 = arith.addf %625, %626 : vector<8x1xf32>
    %628 = arith.mulf %589, %95 : vector<8x1xf32>
    %629 = arith.addf %627, %628 : vector<8x1xf32>
    %630 = arith.mulf %592, %99 : vector<8x1xf32>
    %631 = arith.addf %629, %630 : vector<8x1xf32>
    %632 = arith.subf %631, %34 : vector<8x1xf32>
    %cst_135 = arith.constant 1.020000e+00 : f32
    %633 = vector.broadcast %cst_135 : f32 to vector<8x1xf32>
    %634 = arith.mulf %633, %632 : vector<8x1xf32>
    %635 = arith.addf %34, %634 : vector<8x1xf32>
    %636 = arith.mulf %593, %84 : vector<8x1xf32>
    %637 = arith.subf %35, %636 : vector<8x1xf32>
    %638 = arith.mulf %583, %88 : vector<8x1xf32>
    %639 = arith.addf %637, %638 : vector<8x1xf32>
    %640 = arith.mulf %586, %92 : vector<8x1xf32>
    %641 = arith.addf %639, %640 : vector<8x1xf32>
    %642 = arith.mulf %589, %96 : vector<8x1xf32>
    %643 = arith.addf %641, %642 : vector<8x1xf32>
    %644 = arith.mulf %592, %100 : vector<8x1xf32>
    %645 = arith.addf %643, %644 : vector<8x1xf32>
    %646 = arith.subf %645, %35 : vector<8x1xf32>
    %cst_136 = arith.constant 1.020000e+00 : f32
    %647 = vector.broadcast %cst_136 : f32 to vector<8x1xf32>
    %648 = arith.mulf %647, %646 : vector<8x1xf32>
    %649 = arith.addf %35, %648 : vector<8x1xf32>
    %cst_137 = arith.constant -1.000000e+30 : f32
    %650 = vector.broadcast %cst_137 : f32 to vector<8x1xf32>
    %651 = arith.select %25, %650, %607 : vector<8x1xi1>, vector<8x1xf32>
    %cst_138 = arith.constant -1.000000e+30 : f32
    %652 = vector.broadcast %cst_138 : f32 to vector<8x1xf32>
    %653 = arith.select %27, %652, %621 : vector<8x1xi1>, vector<8x1xf32>
    %654 = arith.maximumf %651, %653 : vector<8x1xf32>
    %cst_139 = arith.constant -1.000000e+30 : f32
    %655 = vector.broadcast %cst_139 : f32 to vector<8x1xf32>
    %656 = arith.select %29, %655, %635 : vector<8x1xi1>, vector<8x1xf32>
    %657 = arith.maximumf %654, %656 : vector<8x1xf32>
    %cst_140 = arith.constant -1.000000e+30 : f32
    %658 = vector.broadcast %cst_140 : f32 to vector<8x1xf32>
    %659 = arith.select %31, %658, %649 : vector<8x1xi1>, vector<8x1xf32>
    %660 = arith.maximumf %657, %659 : vector<8x1xf32>
    %cst_141 = arith.constant 0.000000e+00 : f32
    %661 = vector.broadcast %cst_141 : f32 to vector<8x1xf32>
    %662 = arith.cmpf ogt, %660, %661 : vector<8x1xf32>
    %cst_142 = arith.constant 1.000000e+00 : f32
    %cst_143 = arith.constant 0.000000e+00 : f32
    %663 = vector.broadcast %cst_142 : f32 to vector<8x1xf32>
    %664 = vector.broadcast %cst_143 : f32 to vector<8x1xf32>
    %665 = arith.select %662, %663, %664 : vector<8x1xi1>, vector<8x1xf32>
    %666 = arith.addf %533, %665 : vector<8x1xf32>
    %cst_144 = arith.constant 1.000000e+00 : f32
    %667 = vector.broadcast %cst_144 : f32 to vector<8x1xf32>
    %668 = arith.cmpf olt, %666, %667 : vector<8x1xf32>
    %669 = math.absf %603 : vector<8x1xf32>
    %670 = arith.mulf %669, %107 : vector<8x1xf32>
    %cst_145 = arith.constant 1.000000e+30 : f32
    %671 = vector.broadcast %cst_145 : f32 to vector<8x1xf32>
    %672 = arith.select %25, %671, %670 : vector<8x1xi1>, vector<8x1xf32>
    %673 = math.absf %617 : vector<8x1xf32>
    %674 = arith.mulf %673, %114 : vector<8x1xf32>
    %cst_146 = arith.constant 1.000000e+30 : f32
    %675 = vector.broadcast %cst_146 : f32 to vector<8x1xf32>
    %676 = arith.select %27, %675, %674 : vector<8x1xi1>, vector<8x1xf32>
    %677 = math.absf %631 : vector<8x1xf32>
    %678 = arith.mulf %677, %121 : vector<8x1xf32>
    %cst_147 = arith.constant 1.000000e+30 : f32
    %679 = vector.broadcast %cst_147 : f32 to vector<8x1xf32>
    %680 = arith.select %29, %679, %678 : vector<8x1xi1>, vector<8x1xf32>
    %681 = math.absf %645 : vector<8x1xf32>
    %682 = arith.mulf %681, %128 : vector<8x1xf32>
    %cst_148 = arith.constant 1.000000e+30 : f32
    %683 = vector.broadcast %cst_148 : f32 to vector<8x1xf32>
    %684 = arith.select %31, %683, %682 : vector<8x1xi1>, vector<8x1xf32>
    %c0_i32_149 = arith.constant 0 : i32
    %685 = vector.broadcast %c0_i32_149 : i32 to vector<8x1xi32>
    %686 = arith.cmpf olt, %676, %672 : vector<8x1xf32>
    %687 = arith.select %686, %676, %672 : vector<8x1xi1>, vector<8x1xf32>
    %c1_i32_150 = arith.constant 1 : i32
    %688 = vector.broadcast %c1_i32_150 : i32 to vector<8x1xi32>
    %689 = arith.select %686, %688, %685 : vector<8x1xi1>, vector<8x1xi32>
    %690 = arith.cmpf olt, %680, %687 : vector<8x1xf32>
    %691 = arith.select %690, %680, %687 : vector<8x1xi1>, vector<8x1xf32>
    %c2_i32_151 = arith.constant 2 : i32
    %692 = vector.broadcast %c2_i32_151 : i32 to vector<8x1xi32>
    %693 = arith.select %690, %692, %689 : vector<8x1xi1>, vector<8x1xi32>
    %694 = arith.cmpf olt, %684, %691 : vector<8x1xf32>
    %695 = arith.select %694, %684, %691 : vector<8x1xi1>, vector<8x1xf32>
    %c3_i32_152 = arith.constant 3 : i32
    %696 = vector.broadcast %c3_i32_152 : i32 to vector<8x1xi32>
    %697 = arith.select %694, %696, %693 : vector<8x1xi1>, vector<8x1xi32>
    %c0_i32_153 = arith.constant 0 : i32
    %698 = vector.broadcast %c0_i32_153 : i32 to vector<8x1xi32>
    %699 = arith.cmpi eq, %697, %698 : vector<8x1xi32>
    %c1_i32_154 = arith.constant 1 : i32
    %700 = vector.broadcast %c1_i32_154 : i32 to vector<8x1xi32>
    %701 = arith.cmpi eq, %697, %700 : vector<8x1xi32>
    %c2_i32_155 = arith.constant 2 : i32
    %702 = vector.broadcast %c2_i32_155 : i32 to vector<8x1xi32>
    %703 = arith.cmpi eq, %697, %702 : vector<8x1xi32>
    %c3_i32_156 = arith.constant 3 : i32
    %704 = vector.broadcast %c3_i32_156 : i32 to vector<8x1xi32>
    %705 = arith.cmpi eq, %697, %704 : vector<8x1xi32>
    %706 = arith.select %701, %114, %107 : vector<8x1xi1>, vector<8x1xf32>
    %707 = arith.select %703, %121, %706 : vector<8x1xi1>, vector<8x1xf32>
    %708 = arith.select %705, %128, %707 : vector<8x1xi1>, vector<8x1xf32>
    %cst_157 = arith.constant 9.99999974E-5 : f32
    %709 = vector.broadcast %cst_157 : f32 to vector<8x1xf32>
    %710 = arith.maximumf %695, %709 : vector<8x1xf32>
    %711 = arith.mulf %710, %708 : vector<8x1xf32>
    %cst_158 = arith.constant 0.000000e+00 : f32
    %712 = vector.broadcast %cst_158 : f32 to vector<8x1xf32>
    %713 = arith.select %668, %711, %712 : vector<8x1xi1>, vector<8x1xf32>
    %cst_159 = arith.constant 0.000000e+00 : f32
    %714 = vector.broadcast %cst_159 : f32 to vector<8x1xf32>
    %715 = arith.select %699, %713, %714 : vector<8x1xi1>, vector<8x1xf32>
    %716 = arith.addf %583, %715 : vector<8x1xf32>
    %cst_160 = arith.constant 0.000000e+00 : f32
    %717 = vector.broadcast %cst_160 : f32 to vector<8x1xf32>
    %718 = arith.select %701, %713, %717 : vector<8x1xi1>, vector<8x1xf32>
    %719 = arith.addf %586, %718 : vector<8x1xf32>
    %cst_161 = arith.constant 0.000000e+00 : f32
    %720 = vector.broadcast %cst_161 : f32 to vector<8x1xf32>
    %721 = arith.select %703, %713, %720 : vector<8x1xi1>, vector<8x1xf32>
    %722 = arith.addf %589, %721 : vector<8x1xf32>
    %cst_162 = arith.constant 0.000000e+00 : f32
    %723 = vector.broadcast %cst_162 : f32 to vector<8x1xf32>
    %724 = arith.select %705, %713, %723 : vector<8x1xi1>, vector<8x1xf32>
    %725 = arith.addf %592, %724 : vector<8x1xf32>
    %726 = arith.addf %593, %713 : vector<8x1xf32>
    %727 = arith.mulf %726, %81 : vector<8x1xf32>
    %728 = arith.subf %32, %727 : vector<8x1xf32>
    %729 = arith.mulf %716, %85 : vector<8x1xf32>
    %730 = arith.addf %728, %729 : vector<8x1xf32>
    %731 = arith.mulf %719, %89 : vector<8x1xf32>
    %732 = arith.addf %730, %731 : vector<8x1xf32>
    %733 = arith.mulf %722, %93 : vector<8x1xf32>
    %734 = arith.addf %732, %733 : vector<8x1xf32>
    %735 = arith.mulf %725, %97 : vector<8x1xf32>
    %736 = arith.addf %734, %735 : vector<8x1xf32>
    %737 = arith.subf %736, %32 : vector<8x1xf32>
    %cst_163 = arith.constant 1.020000e+00 : f32
    %738 = vector.broadcast %cst_163 : f32 to vector<8x1xf32>
    %739 = arith.mulf %738, %737 : vector<8x1xf32>
    %740 = arith.addf %32, %739 : vector<8x1xf32>
    %741 = arith.mulf %726, %82 : vector<8x1xf32>
    %742 = arith.subf %33, %741 : vector<8x1xf32>
    %743 = arith.mulf %716, %86 : vector<8x1xf32>
    %744 = arith.addf %742, %743 : vector<8x1xf32>
    %745 = arith.mulf %719, %90 : vector<8x1xf32>
    %746 = arith.addf %744, %745 : vector<8x1xf32>
    %747 = arith.mulf %722, %94 : vector<8x1xf32>
    %748 = arith.addf %746, %747 : vector<8x1xf32>
    %749 = arith.mulf %725, %98 : vector<8x1xf32>
    %750 = arith.addf %748, %749 : vector<8x1xf32>
    %751 = arith.subf %750, %33 : vector<8x1xf32>
    %cst_164 = arith.constant 1.020000e+00 : f32
    %752 = vector.broadcast %cst_164 : f32 to vector<8x1xf32>
    %753 = arith.mulf %752, %751 : vector<8x1xf32>
    %754 = arith.addf %33, %753 : vector<8x1xf32>
    %755 = arith.mulf %726, %83 : vector<8x1xf32>
    %756 = arith.subf %34, %755 : vector<8x1xf32>
    %757 = arith.mulf %716, %87 : vector<8x1xf32>
    %758 = arith.addf %756, %757 : vector<8x1xf32>
    %759 = arith.mulf %719, %91 : vector<8x1xf32>
    %760 = arith.addf %758, %759 : vector<8x1xf32>
    %761 = arith.mulf %722, %95 : vector<8x1xf32>
    %762 = arith.addf %760, %761 : vector<8x1xf32>
    %763 = arith.mulf %725, %99 : vector<8x1xf32>
    %764 = arith.addf %762, %763 : vector<8x1xf32>
    %765 = arith.subf %764, %34 : vector<8x1xf32>
    %cst_165 = arith.constant 1.020000e+00 : f32
    %766 = vector.broadcast %cst_165 : f32 to vector<8x1xf32>
    %767 = arith.mulf %766, %765 : vector<8x1xf32>
    %768 = arith.addf %34, %767 : vector<8x1xf32>
    %769 = arith.mulf %726, %84 : vector<8x1xf32>
    %770 = arith.subf %35, %769 : vector<8x1xf32>
    %771 = arith.mulf %716, %88 : vector<8x1xf32>
    %772 = arith.addf %770, %771 : vector<8x1xf32>
    %773 = arith.mulf %719, %92 : vector<8x1xf32>
    %774 = arith.addf %772, %773 : vector<8x1xf32>
    %775 = arith.mulf %722, %96 : vector<8x1xf32>
    %776 = arith.addf %774, %775 : vector<8x1xf32>
    %777 = arith.mulf %725, %100 : vector<8x1xf32>
    %778 = arith.addf %776, %777 : vector<8x1xf32>
    %779 = arith.subf %778, %35 : vector<8x1xf32>
    %cst_166 = arith.constant 1.020000e+00 : f32
    %780 = vector.broadcast %cst_166 : f32 to vector<8x1xf32>
    %781 = arith.mulf %780, %779 : vector<8x1xf32>
    %782 = arith.addf %35, %781 : vector<8x1xf32>
    %cst_167 = arith.constant -1.000000e+30 : f32
    %783 = vector.broadcast %cst_167 : f32 to vector<8x1xf32>
    %784 = arith.select %25, %783, %740 : vector<8x1xi1>, vector<8x1xf32>
    %cst_168 = arith.constant -1.000000e+30 : f32
    %785 = vector.broadcast %cst_168 : f32 to vector<8x1xf32>
    %786 = arith.select %27, %785, %754 : vector<8x1xi1>, vector<8x1xf32>
    %787 = arith.maximumf %784, %786 : vector<8x1xf32>
    %cst_169 = arith.constant -1.000000e+30 : f32
    %788 = vector.broadcast %cst_169 : f32 to vector<8x1xf32>
    %789 = arith.select %29, %788, %768 : vector<8x1xi1>, vector<8x1xf32>
    %790 = arith.maximumf %787, %789 : vector<8x1xf32>
    %cst_170 = arith.constant -1.000000e+30 : f32
    %791 = vector.broadcast %cst_170 : f32 to vector<8x1xf32>
    %792 = arith.select %31, %791, %782 : vector<8x1xi1>, vector<8x1xf32>
    %793 = arith.maximumf %790, %792 : vector<8x1xf32>
    %cst_171 = arith.constant 0.000000e+00 : f32
    %794 = vector.broadcast %cst_171 : f32 to vector<8x1xf32>
    %795 = arith.cmpf ogt, %793, %794 : vector<8x1xf32>
    %cst_172 = arith.constant 1.000000e+00 : f32
    %cst_173 = arith.constant 0.000000e+00 : f32
    %796 = vector.broadcast %cst_172 : f32 to vector<8x1xf32>
    %797 = vector.broadcast %cst_173 : f32 to vector<8x1xf32>
    %798 = arith.select %795, %796, %797 : vector<8x1xi1>, vector<8x1xf32>
    %799 = arith.addf %666, %798 : vector<8x1xf32>
    %cst_174 = arith.constant 1.000000e+00 : f32
    %800 = vector.broadcast %cst_174 : f32 to vector<8x1xf32>
    %801 = arith.cmpf olt, %799, %800 : vector<8x1xf32>
    %802 = math.absf %736 : vector<8x1xf32>
    %803 = arith.mulf %802, %107 : vector<8x1xf32>
    %cst_175 = arith.constant 1.000000e+30 : f32
    %804 = vector.broadcast %cst_175 : f32 to vector<8x1xf32>
    %805 = arith.select %25, %804, %803 : vector<8x1xi1>, vector<8x1xf32>
    %806 = math.absf %750 : vector<8x1xf32>
    %807 = arith.mulf %806, %114 : vector<8x1xf32>
    %cst_176 = arith.constant 1.000000e+30 : f32
    %808 = vector.broadcast %cst_176 : f32 to vector<8x1xf32>
    %809 = arith.select %27, %808, %807 : vector<8x1xi1>, vector<8x1xf32>
    %810 = math.absf %764 : vector<8x1xf32>
    %811 = arith.mulf %810, %121 : vector<8x1xf32>
    %cst_177 = arith.constant 1.000000e+30 : f32
    %812 = vector.broadcast %cst_177 : f32 to vector<8x1xf32>
    %813 = arith.select %29, %812, %811 : vector<8x1xi1>, vector<8x1xf32>
    %814 = math.absf %778 : vector<8x1xf32>
    %815 = arith.mulf %814, %128 : vector<8x1xf32>
    %cst_178 = arith.constant 1.000000e+30 : f32
    %816 = vector.broadcast %cst_178 : f32 to vector<8x1xf32>
    %817 = arith.select %31, %816, %815 : vector<8x1xi1>, vector<8x1xf32>
    %c0_i32_179 = arith.constant 0 : i32
    %818 = vector.broadcast %c0_i32_179 : i32 to vector<8x1xi32>
    %819 = arith.cmpf olt, %809, %805 : vector<8x1xf32>
    %820 = arith.select %819, %809, %805 : vector<8x1xi1>, vector<8x1xf32>
    %c1_i32_180 = arith.constant 1 : i32
    %821 = vector.broadcast %c1_i32_180 : i32 to vector<8x1xi32>
    %822 = arith.select %819, %821, %818 : vector<8x1xi1>, vector<8x1xi32>
    %823 = arith.cmpf olt, %813, %820 : vector<8x1xf32>
    %824 = arith.select %823, %813, %820 : vector<8x1xi1>, vector<8x1xf32>
    %c2_i32_181 = arith.constant 2 : i32
    %825 = vector.broadcast %c2_i32_181 : i32 to vector<8x1xi32>
    %826 = arith.select %823, %825, %822 : vector<8x1xi1>, vector<8x1xi32>
    %827 = arith.cmpf olt, %817, %824 : vector<8x1xf32>
    %828 = arith.select %827, %817, %824 : vector<8x1xi1>, vector<8x1xf32>
    %c3_i32_182 = arith.constant 3 : i32
    %829 = vector.broadcast %c3_i32_182 : i32 to vector<8x1xi32>
    %830 = arith.select %827, %829, %826 : vector<8x1xi1>, vector<8x1xi32>
    %c0_i32_183 = arith.constant 0 : i32
    %831 = vector.broadcast %c0_i32_183 : i32 to vector<8x1xi32>
    %832 = arith.cmpi eq, %830, %831 : vector<8x1xi32>
    %c1_i32_184 = arith.constant 1 : i32
    %833 = vector.broadcast %c1_i32_184 : i32 to vector<8x1xi32>
    %834 = arith.cmpi eq, %830, %833 : vector<8x1xi32>
    %c2_i32_185 = arith.constant 2 : i32
    %835 = vector.broadcast %c2_i32_185 : i32 to vector<8x1xi32>
    %836 = arith.cmpi eq, %830, %835 : vector<8x1xi32>
    %c3_i32_186 = arith.constant 3 : i32
    %837 = vector.broadcast %c3_i32_186 : i32 to vector<8x1xi32>
    %838 = arith.cmpi eq, %830, %837 : vector<8x1xi32>
    %839 = arith.select %834, %114, %107 : vector<8x1xi1>, vector<8x1xf32>
    %840 = arith.select %836, %121, %839 : vector<8x1xi1>, vector<8x1xf32>
    %841 = arith.select %838, %128, %840 : vector<8x1xi1>, vector<8x1xf32>
    %cst_187 = arith.constant 9.99999974E-5 : f32
    %842 = vector.broadcast %cst_187 : f32 to vector<8x1xf32>
    %843 = arith.maximumf %828, %842 : vector<8x1xf32>
    %844 = arith.mulf %843, %841 : vector<8x1xf32>
    %cst_188 = arith.constant 0.000000e+00 : f32
    %845 = vector.broadcast %cst_188 : f32 to vector<8x1xf32>
    %846 = arith.select %801, %844, %845 : vector<8x1xi1>, vector<8x1xf32>
    %cst_189 = arith.constant 0.000000e+00 : f32
    %847 = vector.broadcast %cst_189 : f32 to vector<8x1xf32>
    %848 = arith.select %832, %846, %847 : vector<8x1xi1>, vector<8x1xf32>
    %849 = arith.addf %716, %848 : vector<8x1xf32>
    %cst_190 = arith.constant 0.000000e+00 : f32
    %850 = vector.broadcast %cst_190 : f32 to vector<8x1xf32>
    %851 = arith.select %834, %846, %850 : vector<8x1xi1>, vector<8x1xf32>
    %852 = arith.addf %719, %851 : vector<8x1xf32>
    %cst_191 = arith.constant 0.000000e+00 : f32
    %853 = vector.broadcast %cst_191 : f32 to vector<8x1xf32>
    %854 = arith.select %836, %846, %853 : vector<8x1xi1>, vector<8x1xf32>
    %855 = arith.addf %722, %854 : vector<8x1xf32>
    %cst_192 = arith.constant 0.000000e+00 : f32
    %856 = vector.broadcast %cst_192 : f32 to vector<8x1xf32>
    %857 = arith.select %838, %846, %856 : vector<8x1xi1>, vector<8x1xf32>
    %858 = arith.addf %725, %857 : vector<8x1xf32>
    %859 = arith.addf %726, %846 : vector<8x1xf32>
    %860 = arith.mulf %859, %81 : vector<8x1xf32>
    %861 = arith.subf %32, %860 : vector<8x1xf32>
    %862 = arith.mulf %849, %85 : vector<8x1xf32>
    %863 = arith.addf %861, %862 : vector<8x1xf32>
    %864 = arith.mulf %852, %89 : vector<8x1xf32>
    %865 = arith.addf %863, %864 : vector<8x1xf32>
    %866 = arith.mulf %855, %93 : vector<8x1xf32>
    %867 = arith.addf %865, %866 : vector<8x1xf32>
    %868 = arith.mulf %858, %97 : vector<8x1xf32>
    %869 = arith.addf %867, %868 : vector<8x1xf32>
    %870 = arith.subf %869, %32 : vector<8x1xf32>
    %cst_193 = arith.constant 1.020000e+00 : f32
    %871 = vector.broadcast %cst_193 : f32 to vector<8x1xf32>
    %872 = arith.mulf %871, %870 : vector<8x1xf32>
    %873 = arith.addf %32, %872 : vector<8x1xf32>
    %874 = arith.mulf %859, %82 : vector<8x1xf32>
    %875 = arith.subf %33, %874 : vector<8x1xf32>
    %876 = arith.mulf %849, %86 : vector<8x1xf32>
    %877 = arith.addf %875, %876 : vector<8x1xf32>
    %878 = arith.mulf %852, %90 : vector<8x1xf32>
    %879 = arith.addf %877, %878 : vector<8x1xf32>
    %880 = arith.mulf %855, %94 : vector<8x1xf32>
    %881 = arith.addf %879, %880 : vector<8x1xf32>
    %882 = arith.mulf %858, %98 : vector<8x1xf32>
    %883 = arith.addf %881, %882 : vector<8x1xf32>
    %884 = arith.subf %883, %33 : vector<8x1xf32>
    %cst_194 = arith.constant 1.020000e+00 : f32
    %885 = vector.broadcast %cst_194 : f32 to vector<8x1xf32>
    %886 = arith.mulf %885, %884 : vector<8x1xf32>
    %887 = arith.addf %33, %886 : vector<8x1xf32>
    %888 = arith.mulf %859, %83 : vector<8x1xf32>
    %889 = arith.subf %34, %888 : vector<8x1xf32>
    %890 = arith.mulf %849, %87 : vector<8x1xf32>
    %891 = arith.addf %889, %890 : vector<8x1xf32>
    %892 = arith.mulf %852, %91 : vector<8x1xf32>
    %893 = arith.addf %891, %892 : vector<8x1xf32>
    %894 = arith.mulf %855, %95 : vector<8x1xf32>
    %895 = arith.addf %893, %894 : vector<8x1xf32>
    %896 = arith.mulf %858, %99 : vector<8x1xf32>
    %897 = arith.addf %895, %896 : vector<8x1xf32>
    %898 = arith.subf %897, %34 : vector<8x1xf32>
    %cst_195 = arith.constant 1.020000e+00 : f32
    %899 = vector.broadcast %cst_195 : f32 to vector<8x1xf32>
    %900 = arith.mulf %899, %898 : vector<8x1xf32>
    %901 = arith.addf %34, %900 : vector<8x1xf32>
    %902 = arith.mulf %859, %84 : vector<8x1xf32>
    %903 = arith.subf %35, %902 : vector<8x1xf32>
    %904 = arith.mulf %849, %88 : vector<8x1xf32>
    %905 = arith.addf %903, %904 : vector<8x1xf32>
    %906 = arith.mulf %852, %92 : vector<8x1xf32>
    %907 = arith.addf %905, %906 : vector<8x1xf32>
    %908 = arith.mulf %855, %96 : vector<8x1xf32>
    %909 = arith.addf %907, %908 : vector<8x1xf32>
    %910 = arith.mulf %858, %100 : vector<8x1xf32>
    %911 = arith.addf %909, %910 : vector<8x1xf32>
    %912 = arith.subf %911, %35 : vector<8x1xf32>
    %cst_196 = arith.constant 1.020000e+00 : f32
    %913 = vector.broadcast %cst_196 : f32 to vector<8x1xf32>
    %914 = arith.mulf %913, %912 : vector<8x1xf32>
    %915 = arith.addf %35, %914 : vector<8x1xf32>
    %cst_197 = arith.constant -1.000000e+30 : f32
    %916 = vector.broadcast %cst_197 : f32 to vector<8x1xf32>
    %917 = arith.select %25, %916, %873 : vector<8x1xi1>, vector<8x1xf32>
    %cst_198 = arith.constant -1.000000e+30 : f32
    %918 = vector.broadcast %cst_198 : f32 to vector<8x1xf32>
    %919 = arith.select %27, %918, %887 : vector<8x1xi1>, vector<8x1xf32>
    %920 = arith.maximumf %917, %919 : vector<8x1xf32>
    %cst_199 = arith.constant -1.000000e+30 : f32
    %921 = vector.broadcast %cst_199 : f32 to vector<8x1xf32>
    %922 = arith.select %29, %921, %901 : vector<8x1xi1>, vector<8x1xf32>
    %923 = arith.maximumf %920, %922 : vector<8x1xf32>
    %cst_200 = arith.constant -1.000000e+30 : f32
    %924 = vector.broadcast %cst_200 : f32 to vector<8x1xf32>
    %925 = arith.select %31, %924, %915 : vector<8x1xi1>, vector<8x1xf32>
    %926 = arith.maximumf %923, %925 : vector<8x1xf32>
    %cst_201 = arith.constant 0.000000e+00 : f32
    %927 = vector.broadcast %cst_201 : f32 to vector<8x1xf32>
    %928 = arith.cmpf ogt, %926, %927 : vector<8x1xf32>
    %cst_202 = arith.constant 1.000000e+00 : f32
    %cst_203 = arith.constant 0.000000e+00 : f32
    %929 = vector.broadcast %cst_202 : f32 to vector<8x1xf32>
    %930 = vector.broadcast %cst_203 : f32 to vector<8x1xf32>
    %931 = arith.select %928, %929, %930 : vector<8x1xi1>, vector<8x1xf32>
    %932 = arith.addf %799, %931 : vector<8x1xf32>
    %cst_204 = arith.constant 1.000000e+00 : f32
    %933 = vector.broadcast %cst_204 : f32 to vector<8x1xf32>
    %934 = arith.cmpf olt, %932, %933 : vector<8x1xf32>
    %935 = math.absf %869 : vector<8x1xf32>
    %936 = arith.mulf %935, %107 : vector<8x1xf32>
    %cst_205 = arith.constant 1.000000e+30 : f32
    %937 = vector.broadcast %cst_205 : f32 to vector<8x1xf32>
    %938 = arith.select %25, %937, %936 : vector<8x1xi1>, vector<8x1xf32>
    %939 = math.absf %883 : vector<8x1xf32>
    %940 = arith.mulf %939, %114 : vector<8x1xf32>
    %cst_206 = arith.constant 1.000000e+30 : f32
    %941 = vector.broadcast %cst_206 : f32 to vector<8x1xf32>
    %942 = arith.select %27, %941, %940 : vector<8x1xi1>, vector<8x1xf32>
    %943 = math.absf %897 : vector<8x1xf32>
    %944 = arith.mulf %943, %121 : vector<8x1xf32>
    %cst_207 = arith.constant 1.000000e+30 : f32
    %945 = vector.broadcast %cst_207 : f32 to vector<8x1xf32>
    %946 = arith.select %29, %945, %944 : vector<8x1xi1>, vector<8x1xf32>
    %947 = math.absf %911 : vector<8x1xf32>
    %948 = arith.mulf %947, %128 : vector<8x1xf32>
    %cst_208 = arith.constant 1.000000e+30 : f32
    %949 = vector.broadcast %cst_208 : f32 to vector<8x1xf32>
    %950 = arith.select %31, %949, %948 : vector<8x1xi1>, vector<8x1xf32>
    %c0_i32_209 = arith.constant 0 : i32
    %951 = vector.broadcast %c0_i32_209 : i32 to vector<8x1xi32>
    %952 = arith.cmpf olt, %942, %938 : vector<8x1xf32>
    %953 = arith.select %952, %942, %938 : vector<8x1xi1>, vector<8x1xf32>
    %c1_i32_210 = arith.constant 1 : i32
    %954 = vector.broadcast %c1_i32_210 : i32 to vector<8x1xi32>
    %955 = arith.select %952, %954, %951 : vector<8x1xi1>, vector<8x1xi32>
    %956 = arith.cmpf olt, %946, %953 : vector<8x1xf32>
    %957 = arith.select %956, %946, %953 : vector<8x1xi1>, vector<8x1xf32>
    %c2_i32_211 = arith.constant 2 : i32
    %958 = vector.broadcast %c2_i32_211 : i32 to vector<8x1xi32>
    %959 = arith.select %956, %958, %955 : vector<8x1xi1>, vector<8x1xi32>
    %960 = arith.cmpf olt, %950, %957 : vector<8x1xf32>
    %961 = arith.select %960, %950, %957 : vector<8x1xi1>, vector<8x1xf32>
    %c3_i32_212 = arith.constant 3 : i32
    %962 = vector.broadcast %c3_i32_212 : i32 to vector<8x1xi32>
    %963 = arith.select %960, %962, %959 : vector<8x1xi1>, vector<8x1xi32>
    %c0_i32_213 = arith.constant 0 : i32
    %964 = vector.broadcast %c0_i32_213 : i32 to vector<8x1xi32>
    %965 = arith.cmpi eq, %963, %964 : vector<8x1xi32>
    %c1_i32_214 = arith.constant 1 : i32
    %966 = vector.broadcast %c1_i32_214 : i32 to vector<8x1xi32>
    %967 = arith.cmpi eq, %963, %966 : vector<8x1xi32>
    %c2_i32_215 = arith.constant 2 : i32
    %968 = vector.broadcast %c2_i32_215 : i32 to vector<8x1xi32>
    %969 = arith.cmpi eq, %963, %968 : vector<8x1xi32>
    %c3_i32_216 = arith.constant 3 : i32
    %970 = vector.broadcast %c3_i32_216 : i32 to vector<8x1xi32>
    %971 = arith.cmpi eq, %963, %970 : vector<8x1xi32>
    %972 = arith.select %967, %114, %107 : vector<8x1xi1>, vector<8x1xf32>
    %973 = arith.select %969, %121, %972 : vector<8x1xi1>, vector<8x1xf32>
    %974 = arith.select %971, %128, %973 : vector<8x1xi1>, vector<8x1xf32>
    %cst_217 = arith.constant 9.99999974E-5 : f32
    %975 = vector.broadcast %cst_217 : f32 to vector<8x1xf32>
    %976 = arith.maximumf %961, %975 : vector<8x1xf32>
    %977 = arith.mulf %976, %974 : vector<8x1xf32>
    %cst_218 = arith.constant 0.000000e+00 : f32
    %978 = vector.broadcast %cst_218 : f32 to vector<8x1xf32>
    %979 = arith.select %934, %977, %978 : vector<8x1xi1>, vector<8x1xf32>
    %cst_219 = arith.constant 0.000000e+00 : f32
    %980 = vector.broadcast %cst_219 : f32 to vector<8x1xf32>
    %981 = arith.select %965, %979, %980 : vector<8x1xi1>, vector<8x1xf32>
    %982 = arith.addf %849, %981 : vector<8x1xf32>
    %cst_220 = arith.constant 0.000000e+00 : f32
    %983 = vector.broadcast %cst_220 : f32 to vector<8x1xf32>
    %984 = arith.select %967, %979, %983 : vector<8x1xi1>, vector<8x1xf32>
    %985 = arith.addf %852, %984 : vector<8x1xf32>
    %cst_221 = arith.constant 0.000000e+00 : f32
    %986 = vector.broadcast %cst_221 : f32 to vector<8x1xf32>
    %987 = arith.select %969, %979, %986 : vector<8x1xi1>, vector<8x1xf32>
    %988 = arith.addf %855, %987 : vector<8x1xf32>
    %cst_222 = arith.constant 0.000000e+00 : f32
    %989 = vector.broadcast %cst_222 : f32 to vector<8x1xf32>
    %990 = arith.select %971, %979, %989 : vector<8x1xi1>, vector<8x1xf32>
    %991 = arith.addf %858, %990 : vector<8x1xf32>
    %992 = arith.addf %859, %979 : vector<8x1xf32>
    %993 = arith.mulf %992, %81 : vector<8x1xf32>
    %994 = arith.subf %32, %993 : vector<8x1xf32>
    %995 = arith.mulf %982, %85 : vector<8x1xf32>
    %996 = arith.addf %994, %995 : vector<8x1xf32>
    %997 = arith.mulf %985, %89 : vector<8x1xf32>
    %998 = arith.addf %996, %997 : vector<8x1xf32>
    %999 = arith.mulf %988, %93 : vector<8x1xf32>
    %1000 = arith.addf %998, %999 : vector<8x1xf32>
    %1001 = arith.mulf %991, %97 : vector<8x1xf32>
    %1002 = arith.addf %1000, %1001 : vector<8x1xf32>
    %1003 = arith.subf %1002, %32 : vector<8x1xf32>
    %cst_223 = arith.constant 1.020000e+00 : f32
    %1004 = vector.broadcast %cst_223 : f32 to vector<8x1xf32>
    %1005 = arith.mulf %1004, %1003 : vector<8x1xf32>
    %1006 = arith.addf %32, %1005 : vector<8x1xf32>
    %1007 = arith.mulf %992, %82 : vector<8x1xf32>
    %1008 = arith.subf %33, %1007 : vector<8x1xf32>
    %1009 = arith.mulf %982, %86 : vector<8x1xf32>
    %1010 = arith.addf %1008, %1009 : vector<8x1xf32>
    %1011 = arith.mulf %985, %90 : vector<8x1xf32>
    %1012 = arith.addf %1010, %1011 : vector<8x1xf32>
    %1013 = arith.mulf %988, %94 : vector<8x1xf32>
    %1014 = arith.addf %1012, %1013 : vector<8x1xf32>
    %1015 = arith.mulf %991, %98 : vector<8x1xf32>
    %1016 = arith.addf %1014, %1015 : vector<8x1xf32>
    %1017 = arith.subf %1016, %33 : vector<8x1xf32>
    %cst_224 = arith.constant 1.020000e+00 : f32
    %1018 = vector.broadcast %cst_224 : f32 to vector<8x1xf32>
    %1019 = arith.mulf %1018, %1017 : vector<8x1xf32>
    %1020 = arith.addf %33, %1019 : vector<8x1xf32>
    %1021 = arith.mulf %992, %83 : vector<8x1xf32>
    %1022 = arith.subf %34, %1021 : vector<8x1xf32>
    %1023 = arith.mulf %982, %87 : vector<8x1xf32>
    %1024 = arith.addf %1022, %1023 : vector<8x1xf32>
    %1025 = arith.mulf %985, %91 : vector<8x1xf32>
    %1026 = arith.addf %1024, %1025 : vector<8x1xf32>
    %1027 = arith.mulf %988, %95 : vector<8x1xf32>
    %1028 = arith.addf %1026, %1027 : vector<8x1xf32>
    %1029 = arith.mulf %991, %99 : vector<8x1xf32>
    %1030 = arith.addf %1028, %1029 : vector<8x1xf32>
    %1031 = arith.subf %1030, %34 : vector<8x1xf32>
    %cst_225 = arith.constant 1.020000e+00 : f32
    %1032 = vector.broadcast %cst_225 : f32 to vector<8x1xf32>
    %1033 = arith.mulf %1032, %1031 : vector<8x1xf32>
    %1034 = arith.addf %34, %1033 : vector<8x1xf32>
    %1035 = arith.mulf %992, %84 : vector<8x1xf32>
    %1036 = arith.subf %35, %1035 : vector<8x1xf32>
    %1037 = arith.mulf %982, %88 : vector<8x1xf32>
    %1038 = arith.addf %1036, %1037 : vector<8x1xf32>
    %1039 = arith.mulf %985, %92 : vector<8x1xf32>
    %1040 = arith.addf %1038, %1039 : vector<8x1xf32>
    %1041 = arith.mulf %988, %96 : vector<8x1xf32>
    %1042 = arith.addf %1040, %1041 : vector<8x1xf32>
    %1043 = arith.mulf %991, %100 : vector<8x1xf32>
    %1044 = arith.addf %1042, %1043 : vector<8x1xf32>
    %1045 = arith.subf %1044, %35 : vector<8x1xf32>
    %cst_226 = arith.constant 1.020000e+00 : f32
    %1046 = vector.broadcast %cst_226 : f32 to vector<8x1xf32>
    %1047 = arith.mulf %1046, %1045 : vector<8x1xf32>
    %1048 = arith.addf %35, %1047 : vector<8x1xf32>
    %cst_227 = arith.constant -1.000000e+30 : f32
    %1049 = vector.broadcast %cst_227 : f32 to vector<8x1xf32>
    %1050 = arith.select %25, %1049, %1006 : vector<8x1xi1>, vector<8x1xf32>
    %cst_228 = arith.constant -1.000000e+30 : f32
    %1051 = vector.broadcast %cst_228 : f32 to vector<8x1xf32>
    %1052 = arith.select %27, %1051, %1020 : vector<8x1xi1>, vector<8x1xf32>
    %1053 = arith.maximumf %1050, %1052 : vector<8x1xf32>
    %cst_229 = arith.constant -1.000000e+30 : f32
    %1054 = vector.broadcast %cst_229 : f32 to vector<8x1xf32>
    %1055 = arith.select %29, %1054, %1034 : vector<8x1xi1>, vector<8x1xf32>
    %1056 = arith.maximumf %1053, %1055 : vector<8x1xf32>
    %cst_230 = arith.constant -1.000000e+30 : f32
    %1057 = vector.broadcast %cst_230 : f32 to vector<8x1xf32>
    %1058 = arith.select %31, %1057, %1048 : vector<8x1xi1>, vector<8x1xf32>
    %1059 = arith.maximumf %1056, %1058 : vector<8x1xf32>
    %cst_231 = arith.constant 0.000000e+00 : f32
    %1060 = vector.broadcast %cst_231 : f32 to vector<8x1xf32>
    %1061 = arith.cmpf ogt, %1059, %1060 : vector<8x1xf32>
    %cst_232 = arith.constant 1.000000e+00 : f32
    %cst_233 = arith.constant 0.000000e+00 : f32
    %1062 = vector.broadcast %cst_232 : f32 to vector<8x1xf32>
    %1063 = vector.broadcast %cst_233 : f32 to vector<8x1xf32>
    %1064 = arith.select %1061, %1062, %1063 : vector<8x1xi1>, vector<8x1xf32>
    %1065 = arith.addf %932, %1064 : vector<8x1xf32>
    %cst_234 = arith.constant 1.000000e+00 : f32
    %1066 = vector.broadcast %cst_234 : f32 to vector<8x1xf32>
    %1067 = arith.cmpf olt, %1065, %1066 : vector<8x1xf32>
    %1068 = math.absf %1002 : vector<8x1xf32>
    %1069 = arith.mulf %1068, %107 : vector<8x1xf32>
    %cst_235 = arith.constant 1.000000e+30 : f32
    %1070 = vector.broadcast %cst_235 : f32 to vector<8x1xf32>
    %1071 = arith.select %25, %1070, %1069 : vector<8x1xi1>, vector<8x1xf32>
    %1072 = math.absf %1016 : vector<8x1xf32>
    %1073 = arith.mulf %1072, %114 : vector<8x1xf32>
    %cst_236 = arith.constant 1.000000e+30 : f32
    %1074 = vector.broadcast %cst_236 : f32 to vector<8x1xf32>
    %1075 = arith.select %27, %1074, %1073 : vector<8x1xi1>, vector<8x1xf32>
    %1076 = math.absf %1030 : vector<8x1xf32>
    %1077 = arith.mulf %1076, %121 : vector<8x1xf32>
    %cst_237 = arith.constant 1.000000e+30 : f32
    %1078 = vector.broadcast %cst_237 : f32 to vector<8x1xf32>
    %1079 = arith.select %29, %1078, %1077 : vector<8x1xi1>, vector<8x1xf32>
    %1080 = math.absf %1044 : vector<8x1xf32>
    %1081 = arith.mulf %1080, %128 : vector<8x1xf32>
    %cst_238 = arith.constant 1.000000e+30 : f32
    %1082 = vector.broadcast %cst_238 : f32 to vector<8x1xf32>
    %1083 = arith.select %31, %1082, %1081 : vector<8x1xi1>, vector<8x1xf32>
    %c0_i32_239 = arith.constant 0 : i32
    %1084 = vector.broadcast %c0_i32_239 : i32 to vector<8x1xi32>
    %1085 = arith.cmpf olt, %1075, %1071 : vector<8x1xf32>
    %1086 = arith.select %1085, %1075, %1071 : vector<8x1xi1>, vector<8x1xf32>
    %c1_i32_240 = arith.constant 1 : i32
    %1087 = vector.broadcast %c1_i32_240 : i32 to vector<8x1xi32>
    %1088 = arith.select %1085, %1087, %1084 : vector<8x1xi1>, vector<8x1xi32>
    %1089 = arith.cmpf olt, %1079, %1086 : vector<8x1xf32>
    %1090 = arith.select %1089, %1079, %1086 : vector<8x1xi1>, vector<8x1xf32>
    %c2_i32_241 = arith.constant 2 : i32
    %1091 = vector.broadcast %c2_i32_241 : i32 to vector<8x1xi32>
    %1092 = arith.select %1089, %1091, %1088 : vector<8x1xi1>, vector<8x1xi32>
    %1093 = arith.cmpf olt, %1083, %1090 : vector<8x1xf32>
    %1094 = arith.select %1093, %1083, %1090 : vector<8x1xi1>, vector<8x1xf32>
    %c3_i32_242 = arith.constant 3 : i32
    %1095 = vector.broadcast %c3_i32_242 : i32 to vector<8x1xi32>
    %1096 = arith.select %1093, %1095, %1092 : vector<8x1xi1>, vector<8x1xi32>
    %c0_i32_243 = arith.constant 0 : i32
    %1097 = vector.broadcast %c0_i32_243 : i32 to vector<8x1xi32>
    %1098 = arith.cmpi eq, %1096, %1097 : vector<8x1xi32>
    %c1_i32_244 = arith.constant 1 : i32
    %1099 = vector.broadcast %c1_i32_244 : i32 to vector<8x1xi32>
    %1100 = arith.cmpi eq, %1096, %1099 : vector<8x1xi32>
    %c2_i32_245 = arith.constant 2 : i32
    %1101 = vector.broadcast %c2_i32_245 : i32 to vector<8x1xi32>
    %1102 = arith.cmpi eq, %1096, %1101 : vector<8x1xi32>
    %c3_i32_246 = arith.constant 3 : i32
    %1103 = vector.broadcast %c3_i32_246 : i32 to vector<8x1xi32>
    %1104 = arith.cmpi eq, %1096, %1103 : vector<8x1xi32>
    %1105 = arith.select %1100, %114, %107 : vector<8x1xi1>, vector<8x1xf32>
    %1106 = arith.select %1102, %121, %1105 : vector<8x1xi1>, vector<8x1xf32>
    %1107 = arith.select %1104, %128, %1106 : vector<8x1xi1>, vector<8x1xf32>
    %cst_247 = arith.constant 9.99999974E-5 : f32
    %1108 = vector.broadcast %cst_247 : f32 to vector<8x1xf32>
    %1109 = arith.maximumf %1094, %1108 : vector<8x1xf32>
    %1110 = arith.mulf %1109, %1107 : vector<8x1xf32>
    %cst_248 = arith.constant 0.000000e+00 : f32
    %1111 = vector.broadcast %cst_248 : f32 to vector<8x1xf32>
    %1112 = arith.select %1067, %1110, %1111 : vector<8x1xi1>, vector<8x1xf32>
    %cst_249 = arith.constant 0.000000e+00 : f32
    %1113 = vector.broadcast %cst_249 : f32 to vector<8x1xf32>
    %1114 = arith.select %1098, %1112, %1113 : vector<8x1xi1>, vector<8x1xf32>
    %1115 = arith.addf %982, %1114 : vector<8x1xf32>
    %cst_250 = arith.constant 0.000000e+00 : f32
    %1116 = vector.broadcast %cst_250 : f32 to vector<8x1xf32>
    %1117 = arith.select %1100, %1112, %1116 : vector<8x1xi1>, vector<8x1xf32>
    %1118 = arith.addf %985, %1117 : vector<8x1xf32>
    %cst_251 = arith.constant 0.000000e+00 : f32
    %1119 = vector.broadcast %cst_251 : f32 to vector<8x1xf32>
    %1120 = arith.select %1102, %1112, %1119 : vector<8x1xi1>, vector<8x1xf32>
    %1121 = arith.addf %988, %1120 : vector<8x1xf32>
    %cst_252 = arith.constant 0.000000e+00 : f32
    %1122 = vector.broadcast %cst_252 : f32 to vector<8x1xf32>
    %1123 = arith.select %1104, %1112, %1122 : vector<8x1xi1>, vector<8x1xf32>
    %1124 = arith.addf %991, %1123 : vector<8x1xf32>
    %1125 = arith.addf %992, %1112 : vector<8x1xf32>
    %1126 = arith.mulf %1125, %81 : vector<8x1xf32>
    %1127 = arith.subf %32, %1126 : vector<8x1xf32>
    %1128 = arith.mulf %1115, %85 : vector<8x1xf32>
    %1129 = arith.addf %1127, %1128 : vector<8x1xf32>
    %1130 = arith.mulf %1118, %89 : vector<8x1xf32>
    %1131 = arith.addf %1129, %1130 : vector<8x1xf32>
    %1132 = arith.mulf %1121, %93 : vector<8x1xf32>
    %1133 = arith.addf %1131, %1132 : vector<8x1xf32>
    %1134 = arith.mulf %1124, %97 : vector<8x1xf32>
    %1135 = arith.addf %1133, %1134 : vector<8x1xf32>
    %1136 = arith.subf %1135, %32 : vector<8x1xf32>
    %cst_253 = arith.constant 1.020000e+00 : f32
    %1137 = vector.broadcast %cst_253 : f32 to vector<8x1xf32>
    %1138 = arith.mulf %1137, %1136 : vector<8x1xf32>
    %1139 = arith.addf %32, %1138 : vector<8x1xf32>
    %1140 = arith.mulf %1125, %82 : vector<8x1xf32>
    %1141 = arith.subf %33, %1140 : vector<8x1xf32>
    %1142 = arith.mulf %1115, %86 : vector<8x1xf32>
    %1143 = arith.addf %1141, %1142 : vector<8x1xf32>
    %1144 = arith.mulf %1118, %90 : vector<8x1xf32>
    %1145 = arith.addf %1143, %1144 : vector<8x1xf32>
    %1146 = arith.mulf %1121, %94 : vector<8x1xf32>
    %1147 = arith.addf %1145, %1146 : vector<8x1xf32>
    %1148 = arith.mulf %1124, %98 : vector<8x1xf32>
    %1149 = arith.addf %1147, %1148 : vector<8x1xf32>
    %1150 = arith.subf %1149, %33 : vector<8x1xf32>
    %cst_254 = arith.constant 1.020000e+00 : f32
    %1151 = vector.broadcast %cst_254 : f32 to vector<8x1xf32>
    %1152 = arith.mulf %1151, %1150 : vector<8x1xf32>
    %1153 = arith.addf %33, %1152 : vector<8x1xf32>
    %1154 = arith.mulf %1125, %83 : vector<8x1xf32>
    %1155 = arith.subf %34, %1154 : vector<8x1xf32>
    %1156 = arith.mulf %1115, %87 : vector<8x1xf32>
    %1157 = arith.addf %1155, %1156 : vector<8x1xf32>
    %1158 = arith.mulf %1118, %91 : vector<8x1xf32>
    %1159 = arith.addf %1157, %1158 : vector<8x1xf32>
    %1160 = arith.mulf %1121, %95 : vector<8x1xf32>
    %1161 = arith.addf %1159, %1160 : vector<8x1xf32>
    %1162 = arith.mulf %1124, %99 : vector<8x1xf32>
    %1163 = arith.addf %1161, %1162 : vector<8x1xf32>
    %1164 = arith.subf %1163, %34 : vector<8x1xf32>
    %cst_255 = arith.constant 1.020000e+00 : f32
    %1165 = vector.broadcast %cst_255 : f32 to vector<8x1xf32>
    %1166 = arith.mulf %1165, %1164 : vector<8x1xf32>
    %1167 = arith.addf %34, %1166 : vector<8x1xf32>
    %1168 = arith.mulf %1125, %84 : vector<8x1xf32>
    %1169 = arith.subf %35, %1168 : vector<8x1xf32>
    %1170 = arith.mulf %1115, %88 : vector<8x1xf32>
    %1171 = arith.addf %1169, %1170 : vector<8x1xf32>
    %1172 = arith.mulf %1118, %92 : vector<8x1xf32>
    %1173 = arith.addf %1171, %1172 : vector<8x1xf32>
    %1174 = arith.mulf %1121, %96 : vector<8x1xf32>
    %1175 = arith.addf %1173, %1174 : vector<8x1xf32>
    %1176 = arith.mulf %1124, %100 : vector<8x1xf32>
    %1177 = arith.addf %1175, %1176 : vector<8x1xf32>
    %1178 = arith.subf %1177, %35 : vector<8x1xf32>
    %cst_256 = arith.constant 1.020000e+00 : f32
    %1179 = vector.broadcast %cst_256 : f32 to vector<8x1xf32>
    %1180 = arith.mulf %1179, %1178 : vector<8x1xf32>
    %1181 = arith.addf %35, %1180 : vector<8x1xf32>
    %cst_257 = arith.constant -1.000000e+30 : f32
    %1182 = vector.broadcast %cst_257 : f32 to vector<8x1xf32>
    %1183 = arith.select %25, %1182, %1139 : vector<8x1xi1>, vector<8x1xf32>
    %cst_258 = arith.constant -1.000000e+30 : f32
    %1184 = vector.broadcast %cst_258 : f32 to vector<8x1xf32>
    %1185 = arith.select %27, %1184, %1153 : vector<8x1xi1>, vector<8x1xf32>
    %1186 = arith.maximumf %1183, %1185 : vector<8x1xf32>
    %cst_259 = arith.constant -1.000000e+30 : f32
    %1187 = vector.broadcast %cst_259 : f32 to vector<8x1xf32>
    %1188 = arith.select %29, %1187, %1167 : vector<8x1xi1>, vector<8x1xf32>
    %1189 = arith.maximumf %1186, %1188 : vector<8x1xf32>
    %cst_260 = arith.constant -1.000000e+30 : f32
    %1190 = vector.broadcast %cst_260 : f32 to vector<8x1xf32>
    %1191 = arith.select %31, %1190, %1181 : vector<8x1xi1>, vector<8x1xf32>
    %1192 = arith.maximumf %1189, %1191 : vector<8x1xf32>
    %cst_261 = arith.constant 0.000000e+00 : f32
    %1193 = vector.broadcast %cst_261 : f32 to vector<8x1xf32>
    %1194 = arith.cmpf ogt, %1192, %1193 : vector<8x1xf32>
    %cst_262 = arith.constant 1.000000e+00 : f32
    %cst_263 = arith.constant 0.000000e+00 : f32
    %1195 = vector.broadcast %cst_262 : f32 to vector<8x1xf32>
    %1196 = vector.broadcast %cst_263 : f32 to vector<8x1xf32>
    %1197 = arith.select %1194, %1195, %1196 : vector<8x1xi1>, vector<8x1xf32>
    %1198 = arith.addf %1065, %1197 : vector<8x1xf32>
    %cst_264 = arith.constant 1.000000e+00 : f32
    %1199 = vector.broadcast %cst_264 : f32 to vector<8x1xf32>
    %1200 = arith.cmpf olt, %1198, %1199 : vector<8x1xf32>
    %1201 = math.absf %1135 : vector<8x1xf32>
    %1202 = arith.mulf %1201, %107 : vector<8x1xf32>
    %cst_265 = arith.constant 1.000000e+30 : f32
    %1203 = vector.broadcast %cst_265 : f32 to vector<8x1xf32>
    %1204 = arith.select %25, %1203, %1202 : vector<8x1xi1>, vector<8x1xf32>
    %1205 = math.absf %1149 : vector<8x1xf32>
    %1206 = arith.mulf %1205, %114 : vector<8x1xf32>
    %cst_266 = arith.constant 1.000000e+30 : f32
    %1207 = vector.broadcast %cst_266 : f32 to vector<8x1xf32>
    %1208 = arith.select %27, %1207, %1206 : vector<8x1xi1>, vector<8x1xf32>
    %1209 = math.absf %1163 : vector<8x1xf32>
    %1210 = arith.mulf %1209, %121 : vector<8x1xf32>
    %cst_267 = arith.constant 1.000000e+30 : f32
    %1211 = vector.broadcast %cst_267 : f32 to vector<8x1xf32>
    %1212 = arith.select %29, %1211, %1210 : vector<8x1xi1>, vector<8x1xf32>
    %1213 = math.absf %1177 : vector<8x1xf32>
    %1214 = arith.mulf %1213, %128 : vector<8x1xf32>
    %cst_268 = arith.constant 1.000000e+30 : f32
    %1215 = vector.broadcast %cst_268 : f32 to vector<8x1xf32>
    %1216 = arith.select %31, %1215, %1214 : vector<8x1xi1>, vector<8x1xf32>
    %c0_i32_269 = arith.constant 0 : i32
    %1217 = vector.broadcast %c0_i32_269 : i32 to vector<8x1xi32>
    %1218 = arith.cmpf olt, %1208, %1204 : vector<8x1xf32>
    %1219 = arith.select %1218, %1208, %1204 : vector<8x1xi1>, vector<8x1xf32>
    %c1_i32_270 = arith.constant 1 : i32
    %1220 = vector.broadcast %c1_i32_270 : i32 to vector<8x1xi32>
    %1221 = arith.select %1218, %1220, %1217 : vector<8x1xi1>, vector<8x1xi32>
    %1222 = arith.cmpf olt, %1212, %1219 : vector<8x1xf32>
    %1223 = arith.select %1222, %1212, %1219 : vector<8x1xi1>, vector<8x1xf32>
    %c2_i32_271 = arith.constant 2 : i32
    %1224 = vector.broadcast %c2_i32_271 : i32 to vector<8x1xi32>
    %1225 = arith.select %1222, %1224, %1221 : vector<8x1xi1>, vector<8x1xi32>
    %1226 = arith.cmpf olt, %1216, %1223 : vector<8x1xf32>
    %1227 = arith.select %1226, %1216, %1223 : vector<8x1xi1>, vector<8x1xf32>
    %c3_i32_272 = arith.constant 3 : i32
    %1228 = vector.broadcast %c3_i32_272 : i32 to vector<8x1xi32>
    %1229 = arith.select %1226, %1228, %1225 : vector<8x1xi1>, vector<8x1xi32>
    %c0_i32_273 = arith.constant 0 : i32
    %1230 = vector.broadcast %c0_i32_273 : i32 to vector<8x1xi32>
    %1231 = arith.cmpi eq, %1229, %1230 : vector<8x1xi32>
    %c1_i32_274 = arith.constant 1 : i32
    %1232 = vector.broadcast %c1_i32_274 : i32 to vector<8x1xi32>
    %1233 = arith.cmpi eq, %1229, %1232 : vector<8x1xi32>
    %c2_i32_275 = arith.constant 2 : i32
    %1234 = vector.broadcast %c2_i32_275 : i32 to vector<8x1xi32>
    %1235 = arith.cmpi eq, %1229, %1234 : vector<8x1xi32>
    %c3_i32_276 = arith.constant 3 : i32
    %1236 = vector.broadcast %c3_i32_276 : i32 to vector<8x1xi32>
    %1237 = arith.cmpi eq, %1229, %1236 : vector<8x1xi32>
    %1238 = arith.select %1233, %114, %107 : vector<8x1xi1>, vector<8x1xf32>
    %1239 = arith.select %1235, %121, %1238 : vector<8x1xi1>, vector<8x1xf32>
    %1240 = arith.select %1237, %128, %1239 : vector<8x1xi1>, vector<8x1xf32>
    %cst_277 = arith.constant 9.99999974E-5 : f32
    %1241 = vector.broadcast %cst_277 : f32 to vector<8x1xf32>
    %1242 = arith.maximumf %1227, %1241 : vector<8x1xf32>
    %1243 = arith.mulf %1242, %1240 : vector<8x1xf32>
    %cst_278 = arith.constant 0.000000e+00 : f32
    %1244 = vector.broadcast %cst_278 : f32 to vector<8x1xf32>
    %1245 = arith.select %1200, %1243, %1244 : vector<8x1xi1>, vector<8x1xf32>
    %cst_279 = arith.constant 0.000000e+00 : f32
    %1246 = vector.broadcast %cst_279 : f32 to vector<8x1xf32>
    %1247 = arith.select %1231, %1245, %1246 : vector<8x1xi1>, vector<8x1xf32>
    %1248 = arith.addf %1115, %1247 : vector<8x1xf32>
    %cst_280 = arith.constant 0.000000e+00 : f32
    %1249 = vector.broadcast %cst_280 : f32 to vector<8x1xf32>
    %1250 = arith.select %1233, %1245, %1249 : vector<8x1xi1>, vector<8x1xf32>
    %1251 = arith.addf %1118, %1250 : vector<8x1xf32>
    %cst_281 = arith.constant 0.000000e+00 : f32
    %1252 = vector.broadcast %cst_281 : f32 to vector<8x1xf32>
    %1253 = arith.select %1235, %1245, %1252 : vector<8x1xi1>, vector<8x1xf32>
    %1254 = arith.addf %1121, %1253 : vector<8x1xf32>
    %cst_282 = arith.constant 0.000000e+00 : f32
    %1255 = vector.broadcast %cst_282 : f32 to vector<8x1xf32>
    %1256 = arith.select %1237, %1245, %1255 : vector<8x1xi1>, vector<8x1xf32>
    %1257 = arith.addf %1124, %1256 : vector<8x1xf32>
    %1258 = arith.addf %1125, %1245 : vector<8x1xf32>
    %1259 = arith.mulf %1258, %81 : vector<8x1xf32>
    %1260 = arith.subf %32, %1259 : vector<8x1xf32>
    %1261 = arith.mulf %1248, %85 : vector<8x1xf32>
    %1262 = arith.addf %1260, %1261 : vector<8x1xf32>
    %1263 = arith.mulf %1251, %89 : vector<8x1xf32>
    %1264 = arith.addf %1262, %1263 : vector<8x1xf32>
    %1265 = arith.mulf %1254, %93 : vector<8x1xf32>
    %1266 = arith.addf %1264, %1265 : vector<8x1xf32>
    %1267 = arith.mulf %1257, %97 : vector<8x1xf32>
    %1268 = arith.addf %1266, %1267 : vector<8x1xf32>
    %1269 = arith.subf %1268, %32 : vector<8x1xf32>
    %cst_283 = arith.constant 1.020000e+00 : f32
    %1270 = vector.broadcast %cst_283 : f32 to vector<8x1xf32>
    %1271 = arith.mulf %1270, %1269 : vector<8x1xf32>
    %1272 = arith.addf %32, %1271 : vector<8x1xf32>
    %1273 = arith.mulf %1258, %82 : vector<8x1xf32>
    %1274 = arith.subf %33, %1273 : vector<8x1xf32>
    %1275 = arith.mulf %1248, %86 : vector<8x1xf32>
    %1276 = arith.addf %1274, %1275 : vector<8x1xf32>
    %1277 = arith.mulf %1251, %90 : vector<8x1xf32>
    %1278 = arith.addf %1276, %1277 : vector<8x1xf32>
    %1279 = arith.mulf %1254, %94 : vector<8x1xf32>
    %1280 = arith.addf %1278, %1279 : vector<8x1xf32>
    %1281 = arith.mulf %1257, %98 : vector<8x1xf32>
    %1282 = arith.addf %1280, %1281 : vector<8x1xf32>
    %1283 = arith.subf %1282, %33 : vector<8x1xf32>
    %cst_284 = arith.constant 1.020000e+00 : f32
    %1284 = vector.broadcast %cst_284 : f32 to vector<8x1xf32>
    %1285 = arith.mulf %1284, %1283 : vector<8x1xf32>
    %1286 = arith.addf %33, %1285 : vector<8x1xf32>
    %1287 = arith.mulf %1258, %83 : vector<8x1xf32>
    %1288 = arith.subf %34, %1287 : vector<8x1xf32>
    %1289 = arith.mulf %1248, %87 : vector<8x1xf32>
    %1290 = arith.addf %1288, %1289 : vector<8x1xf32>
    %1291 = arith.mulf %1251, %91 : vector<8x1xf32>
    %1292 = arith.addf %1290, %1291 : vector<8x1xf32>
    %1293 = arith.mulf %1254, %95 : vector<8x1xf32>
    %1294 = arith.addf %1292, %1293 : vector<8x1xf32>
    %1295 = arith.mulf %1257, %99 : vector<8x1xf32>
    %1296 = arith.addf %1294, %1295 : vector<8x1xf32>
    %1297 = arith.subf %1296, %34 : vector<8x1xf32>
    %cst_285 = arith.constant 1.020000e+00 : f32
    %1298 = vector.broadcast %cst_285 : f32 to vector<8x1xf32>
    %1299 = arith.mulf %1298, %1297 : vector<8x1xf32>
    %1300 = arith.addf %34, %1299 : vector<8x1xf32>
    %1301 = arith.mulf %1258, %84 : vector<8x1xf32>
    %1302 = arith.subf %35, %1301 : vector<8x1xf32>
    %1303 = arith.mulf %1248, %88 : vector<8x1xf32>
    %1304 = arith.addf %1302, %1303 : vector<8x1xf32>
    %1305 = arith.mulf %1251, %92 : vector<8x1xf32>
    %1306 = arith.addf %1304, %1305 : vector<8x1xf32>
    %1307 = arith.mulf %1254, %96 : vector<8x1xf32>
    %1308 = arith.addf %1306, %1307 : vector<8x1xf32>
    %1309 = arith.mulf %1257, %100 : vector<8x1xf32>
    %1310 = arith.addf %1308, %1309 : vector<8x1xf32>
    %1311 = arith.subf %1310, %35 : vector<8x1xf32>
    %cst_286 = arith.constant 1.020000e+00 : f32
    %1312 = vector.broadcast %cst_286 : f32 to vector<8x1xf32>
    %1313 = arith.mulf %1312, %1311 : vector<8x1xf32>
    %1314 = arith.addf %35, %1313 : vector<8x1xf32>
    %cst_287 = arith.constant -1.000000e+30 : f32
    %1315 = vector.broadcast %cst_287 : f32 to vector<8x1xf32>
    %1316 = arith.select %25, %1315, %1272 : vector<8x1xi1>, vector<8x1xf32>
    %cst_288 = arith.constant -1.000000e+30 : f32
    %1317 = vector.broadcast %cst_288 : f32 to vector<8x1xf32>
    %1318 = arith.select %27, %1317, %1286 : vector<8x1xi1>, vector<8x1xf32>
    %1319 = arith.maximumf %1316, %1318 : vector<8x1xf32>
    %cst_289 = arith.constant -1.000000e+30 : f32
    %1320 = vector.broadcast %cst_289 : f32 to vector<8x1xf32>
    %1321 = arith.select %29, %1320, %1300 : vector<8x1xi1>, vector<8x1xf32>
    %1322 = arith.maximumf %1319, %1321 : vector<8x1xf32>
    %cst_290 = arith.constant -1.000000e+30 : f32
    %1323 = vector.broadcast %cst_290 : f32 to vector<8x1xf32>
    %1324 = arith.select %31, %1323, %1314 : vector<8x1xi1>, vector<8x1xf32>
    %1325 = arith.maximumf %1322, %1324 : vector<8x1xf32>
    %cst_291 = arith.constant 0.000000e+00 : f32
    %1326 = vector.broadcast %cst_291 : f32 to vector<8x1xf32>
    %1327 = arith.cmpf ogt, %1325, %1326 : vector<8x1xf32>
    %cst_292 = arith.constant 1.000000e+00 : f32
    %cst_293 = arith.constant 0.000000e+00 : f32
    %1328 = vector.broadcast %cst_292 : f32 to vector<8x1xf32>
    %1329 = vector.broadcast %cst_293 : f32 to vector<8x1xf32>
    %1330 = arith.select %1327, %1328, %1329 : vector<8x1xi1>, vector<8x1xf32>
    %1331 = arith.addf %1198, %1330 : vector<8x1xf32>
    %cst_294 = arith.constant 1.000000e+00 : f32
    %1332 = vector.broadcast %cst_294 : f32 to vector<8x1xf32>
    %1333 = arith.cmpf olt, %1331, %1332 : vector<8x1xf32>
    %1334 = math.absf %1268 : vector<8x1xf32>
    %1335 = arith.mulf %1334, %107 : vector<8x1xf32>
    %cst_295 = arith.constant 1.000000e+30 : f32
    %1336 = vector.broadcast %cst_295 : f32 to vector<8x1xf32>
    %1337 = arith.select %25, %1336, %1335 : vector<8x1xi1>, vector<8x1xf32>
    %1338 = math.absf %1282 : vector<8x1xf32>
    %1339 = arith.mulf %1338, %114 : vector<8x1xf32>
    %cst_296 = arith.constant 1.000000e+30 : f32
    %1340 = vector.broadcast %cst_296 : f32 to vector<8x1xf32>
    %1341 = arith.select %27, %1340, %1339 : vector<8x1xi1>, vector<8x1xf32>
    %1342 = math.absf %1296 : vector<8x1xf32>
    %1343 = arith.mulf %1342, %121 : vector<8x1xf32>
    %cst_297 = arith.constant 1.000000e+30 : f32
    %1344 = vector.broadcast %cst_297 : f32 to vector<8x1xf32>
    %1345 = arith.select %29, %1344, %1343 : vector<8x1xi1>, vector<8x1xf32>
    %1346 = math.absf %1310 : vector<8x1xf32>
    %1347 = arith.mulf %1346, %128 : vector<8x1xf32>
    %cst_298 = arith.constant 1.000000e+30 : f32
    %1348 = vector.broadcast %cst_298 : f32 to vector<8x1xf32>
    %1349 = arith.select %31, %1348, %1347 : vector<8x1xi1>, vector<8x1xf32>
    %c0_i32_299 = arith.constant 0 : i32
    %1350 = vector.broadcast %c0_i32_299 : i32 to vector<8x1xi32>
    %1351 = arith.cmpf olt, %1341, %1337 : vector<8x1xf32>
    %1352 = arith.select %1351, %1341, %1337 : vector<8x1xi1>, vector<8x1xf32>
    %c1_i32_300 = arith.constant 1 : i32
    %1353 = vector.broadcast %c1_i32_300 : i32 to vector<8x1xi32>
    %1354 = arith.select %1351, %1353, %1350 : vector<8x1xi1>, vector<8x1xi32>
    %1355 = arith.cmpf olt, %1345, %1352 : vector<8x1xf32>
    %1356 = arith.select %1355, %1345, %1352 : vector<8x1xi1>, vector<8x1xf32>
    %c2_i32_301 = arith.constant 2 : i32
    %1357 = vector.broadcast %c2_i32_301 : i32 to vector<8x1xi32>
    %1358 = arith.select %1355, %1357, %1354 : vector<8x1xi1>, vector<8x1xi32>
    %1359 = arith.cmpf olt, %1349, %1356 : vector<8x1xf32>
    %1360 = arith.select %1359, %1349, %1356 : vector<8x1xi1>, vector<8x1xf32>
    %c3_i32_302 = arith.constant 3 : i32
    %1361 = vector.broadcast %c3_i32_302 : i32 to vector<8x1xi32>
    %1362 = arith.select %1359, %1361, %1358 : vector<8x1xi1>, vector<8x1xi32>
    %c0_i32_303 = arith.constant 0 : i32
    %1363 = vector.broadcast %c0_i32_303 : i32 to vector<8x1xi32>
    %1364 = arith.cmpi eq, %1362, %1363 : vector<8x1xi32>
    %c1_i32_304 = arith.constant 1 : i32
    %1365 = vector.broadcast %c1_i32_304 : i32 to vector<8x1xi32>
    %1366 = arith.cmpi eq, %1362, %1365 : vector<8x1xi32>
    %c2_i32_305 = arith.constant 2 : i32
    %1367 = vector.broadcast %c2_i32_305 : i32 to vector<8x1xi32>
    %1368 = arith.cmpi eq, %1362, %1367 : vector<8x1xi32>
    %c3_i32_306 = arith.constant 3 : i32
    %1369 = vector.broadcast %c3_i32_306 : i32 to vector<8x1xi32>
    %1370 = arith.cmpi eq, %1362, %1369 : vector<8x1xi32>
    %1371 = arith.select %1366, %114, %107 : vector<8x1xi1>, vector<8x1xf32>
    %1372 = arith.select %1368, %121, %1371 : vector<8x1xi1>, vector<8x1xf32>
    %1373 = arith.select %1370, %128, %1372 : vector<8x1xi1>, vector<8x1xf32>
    %cst_307 = arith.constant 9.99999974E-5 : f32
    %1374 = vector.broadcast %cst_307 : f32 to vector<8x1xf32>
    %1375 = arith.maximumf %1360, %1374 : vector<8x1xf32>
    %1376 = arith.mulf %1375, %1373 : vector<8x1xf32>
    %cst_308 = arith.constant 0.000000e+00 : f32
    %1377 = vector.broadcast %cst_308 : f32 to vector<8x1xf32>
    %1378 = arith.select %1333, %1376, %1377 : vector<8x1xi1>, vector<8x1xf32>
    %cst_309 = arith.constant 0.000000e+00 : f32
    %1379 = vector.broadcast %cst_309 : f32 to vector<8x1xf32>
    %1380 = arith.select %1364, %1378, %1379 : vector<8x1xi1>, vector<8x1xf32>
    %1381 = arith.addf %1248, %1380 : vector<8x1xf32>
    %cst_310 = arith.constant 0.000000e+00 : f32
    %1382 = vector.broadcast %cst_310 : f32 to vector<8x1xf32>
    %1383 = arith.select %1366, %1378, %1382 : vector<8x1xi1>, vector<8x1xf32>
    %1384 = arith.addf %1251, %1383 : vector<8x1xf32>
    %cst_311 = arith.constant 0.000000e+00 : f32
    %1385 = vector.broadcast %cst_311 : f32 to vector<8x1xf32>
    %1386 = arith.select %1368, %1378, %1385 : vector<8x1xi1>, vector<8x1xf32>
    %1387 = arith.addf %1254, %1386 : vector<8x1xf32>
    %cst_312 = arith.constant 0.000000e+00 : f32
    %1388 = vector.broadcast %cst_312 : f32 to vector<8x1xf32>
    %1389 = arith.select %1370, %1378, %1388 : vector<8x1xi1>, vector<8x1xf32>
    %1390 = arith.addf %1257, %1389 : vector<8x1xf32>
    %1391 = arith.addf %1258, %1378 : vector<8x1xf32>
    %1392 = arith.mulf %1391, %81 : vector<8x1xf32>
    %1393 = arith.subf %32, %1392 : vector<8x1xf32>
    %1394 = arith.mulf %1381, %85 : vector<8x1xf32>
    %1395 = arith.addf %1393, %1394 : vector<8x1xf32>
    %1396 = arith.mulf %1384, %89 : vector<8x1xf32>
    %1397 = arith.addf %1395, %1396 : vector<8x1xf32>
    %1398 = arith.mulf %1387, %93 : vector<8x1xf32>
    %1399 = arith.addf %1397, %1398 : vector<8x1xf32>
    %1400 = arith.mulf %1390, %97 : vector<8x1xf32>
    %1401 = arith.addf %1399, %1400 : vector<8x1xf32>
    %1402 = arith.subf %1401, %32 : vector<8x1xf32>
    %cst_313 = arith.constant 1.020000e+00 : f32
    %1403 = vector.broadcast %cst_313 : f32 to vector<8x1xf32>
    %1404 = arith.mulf %1403, %1402 : vector<8x1xf32>
    %1405 = arith.addf %32, %1404 : vector<8x1xf32>
    %1406 = arith.mulf %1391, %82 : vector<8x1xf32>
    %1407 = arith.subf %33, %1406 : vector<8x1xf32>
    %1408 = arith.mulf %1381, %86 : vector<8x1xf32>
    %1409 = arith.addf %1407, %1408 : vector<8x1xf32>
    %1410 = arith.mulf %1384, %90 : vector<8x1xf32>
    %1411 = arith.addf %1409, %1410 : vector<8x1xf32>
    %1412 = arith.mulf %1387, %94 : vector<8x1xf32>
    %1413 = arith.addf %1411, %1412 : vector<8x1xf32>
    %1414 = arith.mulf %1390, %98 : vector<8x1xf32>
    %1415 = arith.addf %1413, %1414 : vector<8x1xf32>
    %1416 = arith.subf %1415, %33 : vector<8x1xf32>
    %cst_314 = arith.constant 1.020000e+00 : f32
    %1417 = vector.broadcast %cst_314 : f32 to vector<8x1xf32>
    %1418 = arith.mulf %1417, %1416 : vector<8x1xf32>
    %1419 = arith.addf %33, %1418 : vector<8x1xf32>
    %1420 = arith.mulf %1391, %83 : vector<8x1xf32>
    %1421 = arith.subf %34, %1420 : vector<8x1xf32>
    %1422 = arith.mulf %1381, %87 : vector<8x1xf32>
    %1423 = arith.addf %1421, %1422 : vector<8x1xf32>
    %1424 = arith.mulf %1384, %91 : vector<8x1xf32>
    %1425 = arith.addf %1423, %1424 : vector<8x1xf32>
    %1426 = arith.mulf %1387, %95 : vector<8x1xf32>
    %1427 = arith.addf %1425, %1426 : vector<8x1xf32>
    %1428 = arith.mulf %1390, %99 : vector<8x1xf32>
    %1429 = arith.addf %1427, %1428 : vector<8x1xf32>
    %1430 = arith.subf %1429, %34 : vector<8x1xf32>
    %cst_315 = arith.constant 1.020000e+00 : f32
    %1431 = vector.broadcast %cst_315 : f32 to vector<8x1xf32>
    %1432 = arith.mulf %1431, %1430 : vector<8x1xf32>
    %1433 = arith.addf %34, %1432 : vector<8x1xf32>
    %1434 = arith.mulf %1391, %84 : vector<8x1xf32>
    %1435 = arith.subf %35, %1434 : vector<8x1xf32>
    %1436 = arith.mulf %1381, %88 : vector<8x1xf32>
    %1437 = arith.addf %1435, %1436 : vector<8x1xf32>
    %1438 = arith.mulf %1384, %92 : vector<8x1xf32>
    %1439 = arith.addf %1437, %1438 : vector<8x1xf32>
    %1440 = arith.mulf %1387, %96 : vector<8x1xf32>
    %1441 = arith.addf %1439, %1440 : vector<8x1xf32>
    %1442 = arith.mulf %1390, %100 : vector<8x1xf32>
    %1443 = arith.addf %1441, %1442 : vector<8x1xf32>
    %1444 = arith.subf %1443, %35 : vector<8x1xf32>
    %cst_316 = arith.constant 1.020000e+00 : f32
    %1445 = vector.broadcast %cst_316 : f32 to vector<8x1xf32>
    %1446 = arith.mulf %1445, %1444 : vector<8x1xf32>
    %1447 = arith.addf %35, %1446 : vector<8x1xf32>
    %c0_i32_317 = arith.constant 0 : i32
    %1448 = vector.broadcast %c0_i32_317 : i32 to vector<8x1xi32>
    %1449 = arith.cmpf ogt, %1419, %1405 : vector<8x1xf32>
    %1450 = arith.select %1449, %1419, %1405 : vector<8x1xi1>, vector<8x1xf32>
    %c1_i32_318 = arith.constant 1 : i32
    %1451 = vector.broadcast %c1_i32_318 : i32 to vector<8x1xi32>
    %1452 = arith.select %1449, %1451, %1448 : vector<8x1xi1>, vector<8x1xi32>
    %1453 = arith.cmpf ogt, %1433, %1450 : vector<8x1xf32>
    %1454 = arith.select %1453, %1433, %1450 : vector<8x1xi1>, vector<8x1xf32>
    %c2_i32_319 = arith.constant 2 : i32
    %1455 = vector.broadcast %c2_i32_319 : i32 to vector<8x1xi32>
    %1456 = arith.select %1453, %1455, %1452 : vector<8x1xi1>, vector<8x1xi32>
    %1457 = arith.cmpf ogt, %1447, %1454 : vector<8x1xf32>
    %c3_i32_320 = arith.constant 3 : i32
    %1458 = vector.broadcast %c3_i32_320 : i32 to vector<8x1xi32>
    %1459 = arith.select %1457, %1458, %1456 : vector<8x1xi1>, vector<8x1xi32>
    %c1_i32_321 = arith.constant 1 : i32
    %1460 = vector.broadcast %c1_i32_321 : i32 to vector<8x1xi32>
    %1461 = arith.cmpi eq, %1459, %1460 : vector<8x1xi32>
    %c2_i32_322 = arith.constant 2 : i32
    %1462 = vector.broadcast %c2_i32_322 : i32 to vector<8x1xi32>
    %1463 = arith.cmpi eq, %1459, %1462 : vector<8x1xi32>
    %c3_i32_323 = arith.constant 3 : i32
    %1464 = vector.broadcast %c3_i32_323 : i32 to vector<8x1xi32>
    %1465 = arith.cmpi eq, %1459, %1464 : vector<8x1xi32>
    %1466 = vector.extract_strided_slice %1 {offsets = [0, 0], sizes = [1, 128], strides = [1, 1]} : vector<4x128xf32> to vector<1x128xf32>
    %1467 = vector.shape_cast %1466 : vector<1x128xf32> to vector<1x128xf32>
    %1468 = vector.broadcast %1467 : vector<1x128xf32> to vector<8x128xf32>
    %1469 = vector.extract_strided_slice %1 {offsets = [1, 0], sizes = [1, 128], strides = [1, 1]} : vector<4x128xf32> to vector<1x128xf32>
    %1470 = vector.shape_cast %1469 : vector<1x128xf32> to vector<1x128xf32>
    %1471 = vector.broadcast %1470 : vector<1x128xf32> to vector<8x128xf32>
    %1472 = vector.extract_strided_slice %1 {offsets = [2, 0], sizes = [1, 128], strides = [1, 1]} : vector<4x128xf32> to vector<1x128xf32>
    %1473 = vector.shape_cast %1472 : vector<1x128xf32> to vector<1x128xf32>
    %1474 = vector.broadcast %1473 : vector<1x128xf32> to vector<8x128xf32>
    %1475 = vector.extract_strided_slice %1 {offsets = [3, 0], sizes = [1, 128], strides = [1, 1]} : vector<4x128xf32> to vector<1x128xf32>
    %1476 = vector.shape_cast %1475 : vector<1x128xf32> to vector<1x128xf32>
    %1477 = vector.broadcast %1476 : vector<1x128xf32> to vector<8x128xf32>
    %1478 = vector.shape_cast %1461 : vector<8x1xi1> to vector<8x1xi1>
    %1479 = vector.broadcast %1478 : vector<8x1xi1> to vector<8x128xi1>
    %1480 = arith.select %1479, %1471, %1468 : vector<8x128xi1>, vector<8x128xf32>
    %1481 = vector.shape_cast %27 : vector<8x1xi1> to vector<8x1xi1>
    %1482 = vector.broadcast %1481 : vector<8x1xi1> to vector<8x128xi1>
    %1483 = arith.select %1482, %1471, %1468 : vector<8x128xi1>, vector<8x128xf32>
    %1484 = vector.shape_cast %1463 : vector<8x1xi1> to vector<8x1xi1>
    %1485 = vector.broadcast %1484 : vector<8x1xi1> to vector<8x128xi1>
    %1486 = arith.select %1485, %1474, %1480 : vector<8x128xi1>, vector<8x128xf32>
    %1487 = vector.shape_cast %29 : vector<8x1xi1> to vector<8x1xi1>
    %1488 = vector.broadcast %1487 : vector<8x1xi1> to vector<8x128xi1>
    %1489 = arith.select %1488, %1474, %1483 : vector<8x128xi1>, vector<8x128xf32>
    %1490 = vector.shape_cast %1465 : vector<8x1xi1> to vector<8x1xi1>
    %1491 = vector.broadcast %1490 : vector<8x1xi1> to vector<8x128xi1>
    %1492 = arith.select %1491, %1477, %1486 : vector<8x128xi1>, vector<8x128xf32>
    %1493 = vector.shape_cast %31 : vector<8x1xi1> to vector<8x1xi1>
    %1494 = vector.broadcast %1493 : vector<8x1xi1> to vector<8x128xi1>
    %1495 = arith.select %1494, %1477, %1489 : vector<8x128xi1>, vector<8x128xf32>
    %1496 = arith.subf %1492, %1495 : vector<8x128xf32>
    %1497 = arith.mulf %1496, %1496 : vector<8x128xf32>
    %cst_324 = arith.constant dense<0.000000e+00> : vector<8xf32>
    %1498 = vector.multi_reduction <add>, %1497, %cst_324 [1] : vector<8x128xf32> to vector<8xf32>
    %1499 = vector.shape_cast %1498 : vector<8xf32> to vector<8x1xf32>
    %1500 = math.rsqrt %1499 : vector<8x1xf32>
    %1501 = vector.broadcast %1500 : vector<8x1xf32> to vector<8x128xf32>
    %1502 = arith.mulf %1496, %1501 : vector<8x128xf32>
    %c0_325 = arith.constant 0 : index
    %c0_326 = arith.constant 0 : index
    %1503 = vector.load %arg3[%c0_325, %c0_326] : memref<8x128xf32, #tpu.memory_space<vmem>>, vector<8x128xf32>
    tpu.vector_store %arg3[%c0_325, %c0_326], %1502 {strides = array<i32>} : memref<8x128xf32, #tpu.memory_space<vmem>>, vector<8x128xf32>,
    %cst_327 = arith.constant 0.000000e+00 : f32
    %1504 = vector.broadcast %cst_327 : f32 to vector<8x1xf32>
    %1505 = arith.subf %1504, %1391 : vector<8x1xf32>
    %1506 = vector.broadcast %1505 : vector<8x1xf32> to vector<8x128xf32>
    %1507 = arith.mulf %1506, %1495 : vector<8x128xf32>
    %1508 = vector.broadcast %1381 : vector<8x1xf32> to vector<8x128xf32>
    %1509 = arith.mulf %1508, %1468 : vector<8x128xf32>
    %1510 = arith.addf %1507, %1509 : vector<8x128xf32>
    %1511 = vector.broadcast %1384 : vector<8x1xf32> to vector<8x128xf32>
    %1512 = arith.mulf %1511, %1471 : vector<8x128xf32>
    %1513 = arith.addf %1510, %1512 : vector<8x128xf32>
    %1514 = vector.broadcast %1387 : vector<8x1xf32> to vector<8x128xf32>
    %1515 = arith.mulf %1514, %1474 : vector<8x128xf32>
    %1516 = arith.addf %1513, %1515 : vector<8x128xf32>
    %1517 = vector.broadcast %1390 : vector<8x1xf32> to vector<8x128xf32>
    %1518 = arith.mulf %1517, %1477 : vector<8x128xf32>
    %1519 = arith.addf %1516, %1518 : vector<8x128xf32>
    %cst_328 = arith.constant 1.020000e+00 : f32
    %1520 = vector.broadcast %cst_328 : f32 to vector<8x128xf32>
    %1521 = arith.mulf %1520, %1519 : vector<8x128xf32>
    %1522 = arith.addf %0, %1521 : vector<8x128xf32>
    %c0_329 = arith.constant 0 : index
    %c0_330 = arith.constant 0 : index
    %1523 = vector.load %arg4[%c0_329, %c0_330] : memref<8x128xf32, #tpu.memory_space<vmem>>, vector<8x128xf32>
    tpu.vector_store %arg4[%c0_329, %c0_330], %1522 {strides = array<i32>} : memref<8x128xf32, #tpu.memory_space<vmem>>, vector<8x128xf32>,
    %1524 = vector.shape_cast %23 : vector<8x1xi32> to vector<8x1xi32>
    %1525 = vector.broadcast %1524 : vector<8x1xi32> to vector<8x128xi32>
    %c0_331 = arith.constant 0 : index
    %c0_332 = arith.constant 0 : index
    %1526 = vector.load %arg5[%c0_331, %c0_332] : memref<8x128xi32, #tpu.memory_space<vmem>>, vector<8x128xi32>
    tpu.vector_store %arg5[%c0_331, %c0_332], %1525 {strides = array<i32>} : memref<8x128xi32, #tpu.memory_space<vmem>>, vector<8x128xi32>,
    return
  }
}

</mosaic_0001>

<bundles_post_ra>
// kernel: deepfool.1
= control target key start
LH: loop header
LB: loop body
LE: loop exit
PB: predicated region body
PF: predicated region fallthrough
CT: control target
= control target key end

     0   :  { %11 = vsyncpa [#allocation3], 0  ;;  %s4134_s0 = inlined_call_operand.hbm [shape: f32[8,128], index: 0, kind: input, shape index: {}]   ;;  %s4135_s1 = inlined_call_operand.hbm [shape: f32[4,128], index: 1, kind: input, shape index: {}]   ;;  %s4136_s2 = inlined_call_operand.vmem [shape: f32[1,4], index: 2, kind: input, shape index: {}]   ;;  %s4137_s3 = inlined_call_operand.hbm [shape: f32[8,128], index: 3, kind: output, shape index: {0}]   ;;  %s4138_s4 = inlined_call_operand.hbm [shape: f32[8,128], index: 4, kind: output, shape index: {1}]   ;;  %s4139_s5 = inlined_call_operand.vmem [shape: s32[8,128], index: 5, kind: output, shape index: {2}]  }
   0x1   :  { %12 = vsyncpa [#allocation6], 0 }
   0x2   :  { %13 = vsyncpa [#allocation4], 0 }
   0x3   :  { %14 = vsyncpa [#allocation9], 0  ;;  %s2559_s18 = smov [#allocation2]   ;;  %s2560_s20 = smov [#allocation5]  }
   0x4   :  { %s21_s19 = sshll.u32 %s2559_s18, 4  ;;  %s31_s21 = sshll.u32 %s2560_s20, 4  ;;  %s22_s19 = int_to_ptr.vmem [resolvable:$true] %s21_s19  ;;  %s32_s21 = int_to_ptr.vmem [resolvable:$true] %s31_s21 }
   0x5   :  { %s2479_s22 = scalar_lea.vmem %s22_s19, 128  ;;  %p2484_p1 = scmp.lt.s32.totalorder %s22_s19, %s22_s19 }
   0x6   :  { %p2480_p0 = scmp.ne.s32.totalorder %s22_s19, %s2479_s22  ;;  %p2485_p2 = scmp.lt.s32.totalorder %s2479_s22, %s2479_s22 }
   0x8   :  { %p2486_p3 = por %p2485_p2, %p2484_p1 }
   0xa   :  { %p2487_p4 = pnand %p2486_p3, %p2480_p0 }
   0xc   :  { %2490 = shalt.err (!%p2487_p4)
}
   0xd   :  { %24 = dma.hbm_to_vmem [thread:$0]  %s4134_s0, 128, %s22_s19, [#allocation3]  }
   0xe   :  { %s2499_s25 = scalar_lea.vmem %s32_s21, 64  ;;  %p2504_p6 = scmp.lt.s32.totalorder %s32_s21, %s32_s21 }
   0xf   :  { %p2500_p5 = scmp.ne.s32.totalorder %s32_s21, %s2499_s25  ;;  %p2505_p7 = scmp.lt.s32.totalorder %s2499_s25, %s2499_s25 }
  0x11   :  { %p2506_p8 = por %p2505_p7, %p2504_p6 }
  0x13   :  { %p2507_p9 = pnand %p2506_p8, %p2500_p5 }
  0x15   :  { %2510 = shalt.err (!%p2507_p9)
}
  0x16   :  { %34 = dma.hbm_to_vmem [thread:$0]  %s4135_s1, 64, %s32_s21, [#allocation6]  }
  0x17   :  { %2551 = dma.done.wait [#allocation3], 128  }
  0x18   :  { %2552 = vsyncadd [#allocation3], 4294967168 }
  0x19   :  { %2553 = dma.done.wait [#allocation6], 64  }
  0x1a   :  { %2554 = vsyncadd [#allocation6], 4294967232  ;;  %v4144_v0 = vmov 0.0   ;;  %vm2562_vm0 = vmmov 0   ;;  %v44_v1 = vld [vmem:[#allocation5] sm:$0xf]  ;;  %v235_v9 = vlaneseq }
  0x1b   :  { %2433 = vmatprep.subr.mxu0 %v4144_v0  ;;  %2435 = vmatprep.mubr.msk.f32.mxu0 %vm2562_vm0, %v4144_v0  ;;  %v43_v2 = vld [vmem:[#allocation2] sm:$0xff]  ;;  %s2563_s28 = smov 1   ;;  %v4146_v13 = vmov 0   ;;  %s2566_s29 = smov 3  }
  0x1c   :  { %2438 = vmatprep.subr.mxu1 %v4144_v0  ;;  %2440 = vmatprep.mubr.msk.f32.mxu1 %vm2562_vm0, %v4144_v0  ;;  %v2428_v3 = vld [vmem:[%s4136_s2] ss:$0 sm:$0xff]  ;;  %v2620_v10 = vshrl.u32 %v235_v9, 7  ;;  %s2565_s2 = smov 2   ;;  %s2567_s30 = smov 126  }
  0x1d   :  { %2434 = vmatpush3.xpose.msra.mxu0 %v44_v1  ;;  %2439 = vmatpush3.xpose.msra.mxu1 %v44_v1  ;;  %s2568_s6 = smov 125   ;;  %s2569_s7 = smov 127  }
  0x1e   :  { %4158 = vst [vmem:[#allocation14_spill] sm:$0xff] %v2620_v10  ;;  %v4143_v11 = vsub.s32 0, %v2620_v10  ;;  %v4142_v17 = vsub.s32 1, %v2620_v10  ;;  %v4141_v21 = vsub.s32 2, %v2620_v10  ;;  %v4140_v29 = vsub.s32 3, %v2620_v10  ;;  %s2571_s10 = smov [#allocation8]  }
  0x1f   :  { %s2410_s11 = sshll.u32 %s2571_s10, 4  ;;  %s2411_s11 = int_to_ptr.vmem [resolvable:$true] %s2410_s11 }
  0x20   :  { %2436 = vmatmul.mubr.f32.vlgmr.msra.gmra.mxu0 %v43_v2  ;;  %2441 = vmatmul.mubr.f32.vlgmr.msra.gmra.mxu1 %v44_v1  ;;  %s2511_s12 = scalar_lea.vmem %s2411_s11, 128  ;;  %p2516_p11 = scmp.lt.s32.totalorder %s2411_s11, %s2411_s11 }
  0x21   :  { %p2512_p10 = scmp.ne.s32.totalorder %s2411_s11, %s2511_s12  ;;  %p2517_p12 = scmp.lt.s32.totalorder %s2511_s12, %s2511_s12 }
  0x23   :  { %p2518_p13 = por %p2517_p12, %p2516_p11 }
  0x25   :  { %p2519_p0 = pnand %p2518_p13, %p2512_p10 }
  0xe0   :  { %v118_v4 = vpop.f32.mrf.mxu0  ;;  %v188_v5 = vpop.f32.mrf.mxu1 }
  0xe1   :  { %v2616_v6 = vadd.f32 %v2428_v3, %v118_v4  ;;  %v2630_v16 = vrot.slane %v188_v5, %v4143_v11  ;;  %v2635_v18 = vrot.slane %v188_v5, %v4142_v17  ;;  %v2652_v24 = vrot.slane %v188_v5, %v4141_v21 }
  0xe2   :  { %v2437_v7 = vpop.f32.mrf.mxu0  ;;  %v2442_v8 = vpop.f32.mrf.mxu1  ;;  %v250_v33 = vrot.slane %v188_v5, %v4140_v29 }
  0xe3   :  { %193 = vrot.lane.b32.xlu0 %v2616_v6, %s2563_s28 }
 0x155   :  { %v194_v12 = vpop.permute.xlu0 %193 }
 0x156   :  { %vm196_vm1 = vcmp.gt.f32.partialorder %v2616_v6, %v194_v12 }
 0x157   :  { %v198_v14 = vsel %vm196_vm1, 1, %v4146_v13  ;;  %v197_v15 = vsel %vm196_vm1, %v2616_v6, %v194_v12 }
 0x158   :  { %205 = vrot.lane.b32.xlu1 %v198_v14, %s2563_s28  ;;  %200 = vrot.lane.b32.xlu0 %v197_v15, %s2563_s28 }
 0x15c   :  { %252 = vrot.lane.b32.xlu1 %v2630_v16, %s2565_s2  ;;  %255 = vrot.lane.b32.xlu0 %v2630_v16, %s2566_s29 }
 0x160   :  { %265 = vrot.lane.b32.xlu1 %v2635_v18, %s2565_s2  ;;  %259 = vrot.lane.b32.xlu0 %v2630_v16, %s2563_s28 }
 0x1ca   :  { %v206_v19 = vpop.permute.xlu1 %205  ;;  %v201_v20 = vpop.permute.xlu0 %200 }
 0x1cb   :  { %vm203_vm2 = vcmp.gt.f32.partialorder %v2616_v6, %v201_v20 }
 0x1cc   :  { %v207_v22 = vsel %vm203_vm2, 2, %v206_v19  ;;  %v204_v23 = vsel %vm203_vm2, %v2616_v6, %v201_v20 }
 0x1cd   :  { %214 = vrot.lane.b32.xlu0 %v207_v22, %s2563_s28  ;;  %209 = vrot.lane.b32.xlu1 %v204_v23, %s2563_s28 }
 0x1ce   :  { %v253_v25 = vpop.permute.xlu1 %252  ;;  %v256_v26 = vpop.permute.xlu0 %255 }
 0x1d1   :  { %276 = vrot.lane.b32.xlu0 %v2652_v24, %s2563_s28  ;;  %269 = vrot.lane.b32.xlu1 %v2635_v18, %s2563_s28 }
 0x1d2   :  { %v266_v27 = vpop.permute.xlu1 %265  ;;  %v260_v28 = vpop.permute.xlu0 %259 }
 0x23f   :  { %v210_v30 = vpop.permute.xlu1 %209  ;;  %v215_v31 = vpop.permute.xlu0 %214 }
 0x240   :  { %vm212_vm3 = vcmp.gt.f32.partialorder %v2616_v6, %v210_v30 }
 0x241   :  { %v2662_v32 = vsel %vm212_vm3, 3, %v215_v31  ;;  %v2750_v62 = vsel %vm212_vm3, %v2616_v6, %v210_v30 }
 0x242   :  { %vm218_vm4 = vcmp.eq.s32.totalorder %v2662_v32, 1  ;;  %vm219_vm5 = vcmp.eq.s32.totalorder %v2662_v32, 2  ;;  %vm220_vm6 = vcmp.eq.s32.totalorder %v2662_v32, 3  ;;  %vm217_vm7 = vcmp.eq.s32.totalorder %v2662_v32, 0 }
 0x243   :  { %v270_v34 = vpop.permute.xlu1 %269  ;;  %v268_v35 = vsel %vm218_vm4, %v266_v27, %v253_v25  ;;  %v258_v36 = vsel %vm218_vm4, %v253_v25, %v256_v26  ;;  %v281_v37 = vsel %vm218_vm4, %v2635_v18, %v2630_v16  ;;  %v277_v38 = vpop.permute.xlu0 %276 }
 0x244   :  { %v272_v39 = vsel %vm219_vm5, %v270_v34, %v268_v35  ;;  %v274_v40 = vsel %vm218_vm4, %v270_v34, %v260_v28  ;;  %v262_v41 = vsel %vm219_vm5, %v260_v28, %v258_v36  ;;  %v282_v42 = vsel %vm219_vm5, %v2652_v24, %v281_v37 }
 0x245   :  { %v2689_v43 = vsel %vm220_vm6, %v2635_v18, %v272_v39  ;;  %v2694_v44 = vsel %vm220_vm6, %v2630_v16, %v262_v41  ;;  %v2698_v45 = vsel %vm220_vm6, %v250_v33, %v282_v42  ;;  %v279_v46 = vsel %vm219_vm5, %v277_v38, %v274_v40 }
 0x246   :  { %v284_v47 = vsel %vm218_vm4, %v2689_v43, %v2694_v44  ;;  %v2707_v48 = vsub.f32 %v250_v33, %v2698_v45  ;;  %v2712_v49 = vsel %vm220_vm6, %v2652_v24, %v279_v46  ;;  %v345_v50 = vmul.f32 2.0, %v2689_v43 }
 0x247   :  { %v333_v51 = vmul.f32 2.0, %v2694_v44  ;;  %v285_v52 = vsel %vm219_vm5, %v2712_v49, %v284_v47  ;;  %v2736_v58 = vmul.f32 2.0, %v2698_v45  ;;  %v357_v61 = vmul.f32 2.0, %v2712_v49 }
 0x248   :  { %v286_v53 = vsel %vm220_vm6, %v250_v33, %v285_v52  ;;  %347 = vrot.lane.b32.xlu0 %v345_v50, %s2567_s30 }
 0x249   :  { %335 = vrot.lane.b32.xlu1 %v333_v51, %s2568_s6  ;;  %v2724_v54 = vsub.f32 %v2694_v44, %v286_v53  ;;  %v2727_v55 = vsub.f32 %v2689_v43, %v286_v53  ;;  %v2730_v56 = vsub.f32 %v2712_v49, %v286_v53  ;;  %v2733_v57 = vsub.f32 %v2698_v45, %v286_v53 }
 0x24a   :  { %v2738_v59 = vadd.f32 %v286_v53, %v250_v33 }
 0x24c   :  { %v367_v60 = vsub.f32 %v2738_v59, %v2736_v58  ;;  %341 = vrot.lane.b32.xlu0 %v286_v53, %s2567_s30 }
 0x24d   :  { %329 = vrot.lane.b32.xlu1 %v286_v53, %s2568_s6 }
 0x250   :  { %359 = vrot.lane.b32.xlu0 %v357_v61, %s2569_s7 }
 0x251   :  { %353 = vrot.lane.b32.xlu1 %v286_v53, %s2569_s7 }
 0x254   :  { %226 = vrot.lane.b32.xlu0 %v2750_v62, %s2567_s30 }
 0x255   :  { %222 = vrot.lane.b32.xlu1 %v2750_v62, %s2568_s6 }
 0x258   :  { %292 = vrot.lane.b32.xlu0 %v2694_v44, %s2568_s6 }
 0x259   :  { %230 = vrot.lane.b32.xlu1 %v2750_v62, %s2569_s7 }
 0x25c   :  { %300 = vrot.lane.b32.xlu0 %v2694_v44, %s2569_s7 }
 0x25d   :  { %296 = vrot.lane.b32.xlu1 %v2694_v44, %s2567_s30 }
 0x260   :  { %311 = vrot.lane.b32.xlu0 %v2689_v43, %s2569_s7 }
 0x261   :  { %306 = vrot.lane.b32.xlu1 %v2689_v43, %s2567_s30 }
 0x265   :  { %317 = vrot.lane.b32.xlu1 %v2712_v49, %s2569_s7 }
 0x2ba   :  { %v348_v1 = vpop.permute.xlu0 %347 }
 0x2bb   :  { %v336_v63 = vpop.permute.xlu1 %335 }
 0x2be   :  { %v342_v3 = vpop.permute.xlu0 %341 }
 0x2bf   :  { %v330_v2 = vpop.permute.xlu1 %329  ;;  %v344_v5 = vadd.f32 %v342_v3, %v2635_v18 }
 0x2c0   :  { %v332_v4 = vadd.f32 %v330_v2, %v2630_v16 }
 0x2c1   :  { %v350_v8 = vsub.f32 %v344_v5, %v348_v1 }
 0x2c2   :  { %v338_v7 = vsub.f32 %v332_v4, %v336_v63  ;;  %v360_v19 = vpop.permute.xlu0 %359 }
 0x2c3   :  { %v354_v9 = vpop.permute.xlu1 %353  ;;  %v351_v14 = vmax.f32 %v350_v8, 1e-20 }
 0x2c4   :  { %v339_v12 = vmax.f32 %v338_v7, 1e-20  ;;  %v356_v15 = vadd.f32 %v354_v9, %v2652_v24  ;;  %v368_v7 = vmax.f32 %v367_v60, 1e-20  ;;  %v2828_v9 = vsub.f32 %v2616_v6, %v2750_v62 }
 0x2c6   :  { %2459 = vrsqrt.f32 %v339_v12  ;;  %v362_v20 = vsub.f32 %v356_v15, %v360_v19  ;;  %v227_v25 = vpop.permute.xlu0 %226  ;;  %v392_v58 = vand.u32 2147483647, %v2828_v9 }
 0x2c7   :  { %2461 = vrsqrt.f32 %v351_v14  ;;  %v223_v23 = vpop.permute.xlu1 %222  ;;  %v2777_v27 = vsub.f32 %v2616_v6, %v227_v25 }
 0x2c8   :  { %v363_v22 = vmax.f32 %v362_v20, 1e-20  ;;  %v2774_v26 = vsub.f32 %v2616_v6, %v223_v23 }
 0x2c9   :  { %v378_v35 = vand.u32 2147483647, %v2777_v27 }
 0x2ca   :  { %2463 = vrsqrt.f32 %v363_v22  ;;  %v371_v34 = vand.u32 2147483647, %v2774_v26  ;;  %v293_v42 = vpop.permute.xlu0 %292 }
 0x2cb   :  { %v231_v28 = vpop.permute.xlu1 %230  ;;  %v295_v46 = vsub.f32 %v2630_v16, %v293_v42  ;;  %2465 = vrsqrt.f32 %v368_v7 }
 0x2cc   :  { %v2784_v33 = vsub.f32 %v2616_v6, %v231_v28 }
 0x2ce   :  { %v385_v40 = vand.u32 2147483647, %v2784_v33  ;;  %v301_v51 = vpop.permute.xlu0 %300 }
 0x2cf   :  { %v297_v39 = vpop.permute.xlu1 %296  ;;  %v303_v63 = vsub.f32 %v2630_v16, %v301_v51 }
 0x2d0   :  { %v299_v50 = vsub.f32 %v2630_v16, %v297_v39 }
 0x2d2   :  { %v312_v2 = vpop.permute.xlu0 %311 }
 0x2d3   :  { %v2779_v30 = vpop.eup %2459  ;;  %v307_v47 = vpop.permute.xlu1 %306  ;;  %v314_v4 = vsub.f32 %v2635_v18, %v312_v2 }
 0x2d4   :  { %v2781_v31 = vpop.eup %2461  ;;  %413 = vrot.lane.b32.xlu0 %v2779_v30, %s2566_s29  ;;  %v372_v36 = vmul.f32 %v2779_v30, %v371_v34  ;;  %v309_v52 = vsub.f32 %v2630_v16, %v307_v47  ;;  %v310_v53 = vsub.f32 %v2635_v18, %v307_v47 }
 0x2d5   :  { %409 = vrot.lane.b32.xlu1 %v2781_v31, %s2565_s2  ;;  %v379_v38 = vmul.f32 %v2781_v31, %v378_v35 }
 0x2d7   :  { %v2793_v37 = vpop.eup %2463  ;;  %v318_v61 = vpop.permute.xlu1 %317 }
 0x2d8   :  { %374 = vrot.lane.b32.xlu0 %v372_v36, %s2566_s29  ;;  %v386_v41 = vmul.f32 %v2793_v37, %v385_v40  ;;  %v320_v1 = vsub.f32 %v2630_v16, %v318_v61  ;;  %v321_v3 = vsub.f32 %v2635_v18, %v318_v61  ;;  %v322_v5 = vsub.f32 %v2652_v24, %v318_v61  ;;  %v2832_v14 = vpop.eup %2465 }
 0x2d9   :  { %381 = vrot.lane.b32.xlu1 %v379_v38, %s2565_s2  ;;  %v393_v6 = vmul.f32 %v2832_v14, %v392_v58 }
 0x2db   :  { %v394_v25 = vsel %vm220_vm6, 1e+30, %v393_v6 }
 0x2dc   :  { %388 = vrot.lane.b32.xlu0 %v386_v41, %s2563_s28 }
 0x2dd   :  { %418 = vrot.lane.b32.xlu1 %v2793_v37, %s2563_s28 }
 0x2e0   :  { %442 = vrot.lane.b32.xlu0 %v295_v46, %s2566_s29 }
 0x2e1   :  { %487 = vrot.lane.b32.xlu1 %v299_v50, %s2565_s2 }
 0x2e4   :  { %452 = vrot.lane.b32.xlu0 %v309_v52, %s2565_s2 }
 0x2e5   :  { %497 = vrot.lane.b32.xlu1 %v310_v53, %s2565_s2 }
 0x2e8   :  { %532 = vrot.lane.b32.xlu0 %v303_v63, %s2563_s28 }
 0x2e9   :  { %462 = vrot.lane.b32.xlu1 %v320_v1, %s2563_s28 }
 0x2ec   :  { %507 = vrot.lane.b32.xlu0 %v321_v3, %s2563_s28 }
 0x2ed   :  { %542 = vrot.lane.b32.xlu1 %v314_v4, %s2563_s28 }
 0x2f0   :  { %552 = vrot.lane.b32.xlu0 %v322_v5, %s2563_s28 }
 0x346   :  { %v2824_v8 = vpop.permute.xlu0 %413 }
 0x347   :  { %v2830_v12 = vpop.permute.xlu1 %409 }
 0x34a   :  { %v375_v15 = vpop.permute.xlu0 %374 }
 0x34b   :  { %v382_v19 = vpop.permute.xlu1 %381  ;;  %v377_v20 = vsel %vm217_vm7, 1e+30, %v375_v15 }
 0x34c   :  { %v384_v59 = vsel %vm218_vm4, 1e+30, %v382_v19 }
 0x34d   :  { %vm395_vm8 = vcmp.lt.f32.partialorder %v384_v59, %v377_v20 }
 0x34e   :  { %v389_v60 = vpop.permute.xlu0 %388  ;;  %v396_v62 = vsel %vm395_vm8, %v384_v59, %v377_v20  ;;  %v397_v23 = vsel %vm395_vm8, 1, %v4146_v13 }
 0x34f   :  { %v391_v22 = vsel %vm219_vm5, 1e+30, %v389_v60  ;;  %v2846_v38 = vpop.permute.xlu1 %418 }
 0x350   :  { %vm398_vm9 = vcmp.lt.f32.partialorder %v391_v22, %v396_v62 }
 0x351   :  { %v399_v28 = vsel %vm398_vm9, %v391_v22, %v396_v62  ;;  %v400_v34 = vsel %vm398_vm9, 2, %v397_v23  ;;  %v2918_v23 = vsub.f32 %v2630_v16, %v2698_v45 }
 0x352   :  { %vm401_vm10 = vcmp.lt.f32.partialorder %v394_v25, %v399_v28  ;;  %v2853_v42 = vpop.permute.xlu0 %442 }
 0x353   :  { %v402_v35 = vsel %vm401_vm10, %v394_v25, %v399_v28  ;;  %v403_v36 = vsel %vm401_vm10, 3, %v400_v34  ;;  %v2859_v50 = vpop.permute.xlu1 %487 }
 0x354   :  { %vm405_vm11 = vcmp.eq.s32.totalorder %v403_v36, 1  ;;  %vm406_vm12 = vcmp.eq.s32.totalorder %v403_v36, 2  ;;  %vm407_vm13 = vcmp.eq.s32.totalorder %v403_v36, 3  ;;  %v423_v41 = vmax.f32 %v402_v35, 0.0001 }
 0x355   :  { %v416_v39 = vsel %vm405_vm11, %v2830_v12, %v2824_v8  ;;  %vm404_vm14 = vcmp.eq.s32.totalorder %v403_v36, 0  ;;  %v2930_v35 = vsub.f32 %v2635_v18, %v2698_v45 }
 0x356   :  { %v421_v40 = vsel %vm406_vm12, %v2846_v38, %v416_v39  ;;  %v2868_v61 = vpop.permute.xlu0 %452 }
 0x357   :  { %v422_v46 = vsel %vm407_vm13, %v2832_v14, %v421_v40  ;;  %v2880_v3 = vpop.permute.xlu1 %497  ;;  %4161 = vst [vmem:[#allocation17_spill] sm:$0xff] %v2930_v35  ;;  %v2940_v40 = vsub.f32 %v2652_v24, %v2698_v45 }
 0x358   :  { %v2857_v47 = vmul.f32 %v423_v41, %v422_v46 }
 0x359   :  { %4162 = vst [vmem:[#allocation18_spill] sm:$0xff] %v2940_v40 }
 0x35a   :  { %v480_v51 = vmul.f32 %v2857_v47, %v2727_v55  ;;  %v435_v52 = vmul.f32 %v2857_v47, %v2724_v54  ;;  %v2866_v53 = vsel %vm404_vm14, %v2857_v47, 0.0  ;;  %v525_v63 = vmul.f32 %v2857_v47, %v2730_v56  ;;  %v2884_v4 = vpop.permute.xlu0 %532 }
 0x35b   :  { %v490_v1 = vmul.f32 %v2859_v50, %v2866_v53  ;;  %v2878_v2 = vsel %vm405_vm11, %v2857_v47, 0.0  ;;  %4159 = vst [vmem:[#allocation15_spill] sm:$0xff] %v2884_v4  ;;  %v445_v5 = vmul.f32 %v2853_v42, %v2866_v53  ;;  %v2892_v15 = vpop.permute.xlu1 %462  ;;  %v535_v20 = vmul.f32 %v2884_v4, %v2866_v53 }
 0x35c   :  { %482 = vrot.lane.b32.xlu0 %v480_v51, %s2567_s30  ;;  %437 = vrot.lane.b32.xlu1 %v435_v52, %s2568_s6  ;;  %v455_v7 = vmul.f32 %v2868_v61, %v2878_v2  ;;  %v500_v19 = vmul.f32 %v2880_v3, %v2878_v2  ;;  %v2900_v58 = vsel %vm406_vm12, %v2857_v47, 0.0  ;;  %v2912_v62 = vsel %vm407_vm13, %v2857_v47, 0.0 }
 0x35d   :  { %v465_v6 = vmul.f32 %v2892_v15, %v2900_v58  ;;  %v471_v28 = vmul.f32 %v2912_v62, %v2918_v23  ;;  %v516_v36 = vmul.f32 %v2912_v62, %v2930_v35  ;;  %v561_v41 = vmul.f32 %v2912_v62, %v2940_v40 }
 0x35e   :  { %v2902_v59 = vpop.permute.xlu0 %507 }
 0x35f   :  { %v510_v60 = vmul.f32 %v2902_v59, %v2900_v58  ;;  %v2914_v22 = vpop.permute.xlu1 %542 }
 0x360   :  { %527 = vrot.lane.b32.xlu1 %v525_v63, %s2569_s7  ;;  %492 = vrot.lane.b32.xlu0 %v490_v1, %s2567_s30  ;;  %v545_v25 = vmul.f32 %v2914_v22, %v2878_v2 }
 0x362   :  { %v2926_v34 = vpop.permute.xlu0 %552 }
 0x363   :  { %4160 = vst [vmem:[#allocation16_spill] sm:$0xff] %v2926_v34  ;;  %v555_v39 = vmul.f32 %v2926_v34, %v2900_v58 }
 0x364   :  { %447 = vrot.lane.b32.xlu1 %v445_v5, %s2568_s6  ;;  %457 = vrot.lane.b32.xlu0 %v455_v7, %s2568_s6 }
 0x368   :  { %502 = vrot.lane.b32.xlu1 %v500_v19, %s2567_s30  ;;  %537 = vrot.lane.b32.xlu0 %v535_v20, %s2569_s7 }
 0x36c   :  { %467 = vrot.lane.b32.xlu1 %v465_v6, %s2568_s6  ;;  %512 = vrot.lane.b32.xlu0 %v510_v60, %s2567_s30 }
 0x370   :  { %547 = vrot.lane.b32.xlu1 %v545_v25, %s2569_s7  ;;  %473 = vrot.lane.b32.xlu0 %v471_v28, %s2568_s6 }
 0x374   :  { %518 = vrot.lane.b32.xlu1 %v516_v36, %s2567_s30  ;;  %557 = vrot.lane.b32.xlu0 %v555_v39, %s2569_s7 }
 0x378   :  { %563 = vrot.lane.b32.xlu1 %v561_v41, %s2569_s7 }
 0x3ce   :  { %v438_v46 = vpop.permute.xlu1 %437  ;;  %v483_v51 = vpop.permute.xlu0 %482 }
 0x3cf   :  { %v440_v7 = vsub.f32 %v2774_v26, %v438_v46  ;;  %v485_v25 = vsub.f32 %v2777_v27, %v483_v51 }
 0x3d2   :  { %v528_v52 = vpop.permute.xlu1 %527  ;;  %v493_v63 = vpop.permute.xlu0 %492 }
 0x3d3   :  { %v495_v36 = vadd.f32 %v493_v63, %v485_v25  ;;  %v530_v21 = vsub.f32 %v2784_v33, %v528_v52 }
 0x3d6   :  { %v448_v1 = vpop.permute.xlu1 %447  ;;  %v458_v5 = vpop.permute.xlu0 %457 }
 0x3d7   :  { %v450_v20 = vadd.f32 %v448_v1, %v440_v7 }
 0x3d9   :  { %v460_v28 = vadd.f32 %v458_v5, %v450_v20 }
 0x3da   :  { %v503_v19 = vpop.permute.xlu1 %502  ;;  %v538_v45 = vpop.permute.xlu0 %537 }
 0x3db   :  { %v505_v17 = vadd.f32 %v503_v19, %v495_v36  ;;  %v540_v0 = vadd.f32 %v538_v45, %v530_v21  ;;  %v2976_v36 = vsub.f32 %v2635_v18, %v2689_v43 }
 0x3de   :  { %v468_v6 = vpop.permute.xlu1 %467  ;;  %v513_v60 = vpop.permute.xlu0 %512 }
 0x3df   :  { %v470_v39 = vadd.f32 %v468_v6, %v460_v28  ;;  %v515_v13 = vadd.f32 %v513_v60, %v505_v17  ;;  %v2969_v60 = vsub.f32 %v2630_v16, %v2694_v44 }
 0x3e1   :  { %v572_v25 = vmul.f32 %v2866_v53, %v2969_v60 }
 0x3e2   :  { %v548_v29 = vpop.permute.xlu1 %547  ;;  %v474_v41 = vpop.permute.xlu0 %473 }
 0x3e3   :  { %v476_v11 = vadd.f32 %v474_v41, %v470_v39  ;;  %v550_v35 = vadd.f32 %v548_v29, %v540_v0  ;;  %v574_v41 = vmul.f32 %v2878_v2, %v2976_v36 }
 0x3e5   :  { %v606_v10 = vand.u32 2147483647, %v476_v11  ;;  %v477_v1 = vsub.f32 %v476_v11, %v2774_v26 }
 0x3e6   :  { %v519_v46 = vpop.permute.xlu1 %518  ;;  %v558_v40 = vpop.permute.xlu0 %557 }
 0x3e7   :  { %v521_v7 = vadd.f32 %v519_v46, %v515_v13  ;;  %v607_v51 = vmul.f32 %v2779_v30, %v606_v10  ;;  %v560_v63 = vadd.f32 %v558_v40, %v550_v35  ;;  %v478_v6 = vmul.f32 1.02, %v477_v1 }
 0x3e8   :  { %v570_v40 = vmul.f32 %v2857_v47, %v2733_v57  ;;  %v2982_v46 = vsub.f32 %v2652_v24, %v2712_v49 }
 0x3e9   :  { %v613_v5 = vand.u32 2147483647, %v521_v7  ;;  %609 = vrot.lane.b32.xlu0 %v607_v51, %s2566_s29  ;;  %v522_v52 = vsub.f32 %v521_v7, %v2777_v27  ;;  %v479_v10 = vadd.f32 %v478_v6, %v2774_v26  ;;  %v578_v7 = vmul.f32 %v2912_v62, %v2707_v48 }
 0x3ea   :  { %v564_v20 = vpop.permute.xlu1 %563  ;;  %v571_v28 = vsub.f32 %v2828_v9, %v570_v40  ;;  %v576_v16 = vmul.f32 %v2900_v58, %v2982_v46 }
 0x3eb   :  { %v566_v19 = vadd.f32 %v564_v20, %v560_v63  ;;  %v614_v17 = vmul.f32 %v2781_v31, %v613_v5  ;;  %v523_v0 = vmul.f32 1.02, %v522_v52 }
 0x3ec   :  { %v573_v39 = vadd.f32 %v572_v25, %v571_v28 }
 0x3ed   :  { %v567_v21 = vsub.f32 %v566_v19, %v2784_v33  ;;  %v620_v45 = vand.u32 2147483647, %v566_v19  ;;  %616 = vrot.lane.b32.xlu1 %v614_v17, %s2565_s2  ;;  %v524_v29 = vadd.f32 %v523_v0, %v2777_v27 }
 0x3ee   :  { %v575_v1 = vadd.f32 %v574_v41, %v573_v39 }
 0x3ef   :  { %v568_v11 = vmul.f32 1.02, %v567_v21  ;;  %v621_v13 = vmul.f32 %v2793_v37, %v620_v45  ;;  %v4163_v21 = vmov 0  }
 0x3f0   :  { %v577_v44 = vadd.f32 %v576_v16, %v575_v1 }
 0x3f1   :  { %584 = vrot.lane.b32.xlu1 %v479_v10, %s2566_s29  ;;  %623 = vrot.lane.b32.xlu0 %v621_v13, %s2563_s28  ;;  %v569_v35 = vadd.f32 %v568_v11, %v2784_v33 }
 0x3f2   :  { %v579_v51 = vadd.f32 %v578_v7, %v577_v44 }
 0x3f4   :  { %v627_v18 = vand.u32 2147483647, %v579_v51  ;;  %v580_v24 = vsub.f32 %v579_v51, %v2828_v9 }
 0x3f5   :  { %589 = vrot.lane.b32.xlu0 %v524_v29, %s2565_s2  ;;  %595 = vrot.lane.b32.xlu1 %v569_v35, %s2563_s28 }
 0x3f6   :  { %v628_v49 = vmul.f32 %v2832_v14, %v627_v18  ;;  %v581_v0 = vmul.f32 1.02, %v580_v24  ;;  %v4164_v24 = vmov 0.0  }
 0x3f8   :  { %v629_v11 = vsel %vm220_vm6, 1e+30, %v628_v49  ;;  %v582_v39 = vadd.f32 %v581_v0, %v2828_v9 }
 0x45b   :  { %v610_v5 = vpop.permute.xlu0 %609 }
 0x45c   :  { %v612_v63 = vsel %vm217_vm7, 1e+30, %v610_v5  ;;  %v600_v5 = vsel %vm220_vm6, -1e+30, %v582_v39 }
 0x45f   :  { %v617_v43 = vpop.permute.xlu1 %616 }
 0x460   :  { %v619_v20 = vsel %vm218_vm4, 1e+30, %v617_v43 }
 0x461   :  { %vm630_vm15 = vcmp.lt.f32.partialorder %v619_v20, %v612_v63 }
 0x462   :  { %v631_v19 = vsel %vm630_vm15, %v619_v20, %v612_v63  ;;  %v632_v45 = vsel %vm630_vm15, 1, %v4163_v21 }
 0x463   :  { %v585_v6 = vpop.permute.xlu1 %584  ;;  %v624_v52 = vpop.permute.xlu0 %623 }
 0x464   :  { %v626_v17 = vsel %vm219_vm5, 1e+30, %v624_v52  ;;  %v587_v28 = vsel %vm217_vm7, -1e+30, %v585_v6 }
 0x465   :  { %vm633_vm0 = vcmp.lt.f32.partialorder %v626_v17, %v631_v19 }
 0x466   :  { %v634_v10 = vsel %vm633_vm0, %v626_v17, %v631_v19  ;;  %v635_v13 = vsel %vm633_vm0, 2, %v632_v45 }
 0x467   :  { %vm636_vm1 = vcmp.lt.f32.partialorder %v629_v11, %v634_v10  ;;  %v590_v29 = vpop.permute.xlu0 %589  ;;  %v596_v40 = vpop.permute.xlu1 %595 }
 0x468   :  { %v638_v35 = vsel %vm636_vm1, 3, %v635_v13  ;;  %v592_v25 = vsel %vm218_vm4, -1e+30, %v590_v29  ;;  %v598_v44 = vsel %vm219_vm5, -1e+30, %v596_v40  ;;  %v637_v7 = vsel %vm636_vm1, %v629_v11, %v634_v10 }
 0x469   :  { %vm640_vm2 = vcmp.eq.s32.totalorder %v638_v35, 1  ;;  %vm641_vm3 = vcmp.eq.s32.totalorder %v638_v35, 2  ;;  %v593_v1 = vmax.f32 %v587_v28, %v592_v25  ;;  %vm642_vm8 = vcmp.eq.s32.totalorder %v638_v35, 3 }
 0x46a   :  { %v643_v41 = vsel %vm640_vm2, %v2830_v12, %v2824_v8  ;;  %v646_v63 = vmax.f32 %v637_v7, 0.0001  ;;  %vm639_vm11 = vcmp.eq.s32.totalorder %v638_v35, 0  ;;  %v4165_v7 = vld [vmem:[#allocation17_spill] sm:$0xff] }
 0x46b   :  { %v644_v16 = vsel %vm641_vm3, %v2846_v38, %v643_v41  ;;  %v599_v51 = vmax.f32 %v593_v1, %v598_v44 }
 0x46c   :  { %v645_v18 = vsel %vm642_vm8, %v2832_v14, %v644_v16 }
 0x46d   :  { %v601_v43 = vmax.f32 %v599_v51, %v600_v5  ;;  %v647_v20 = vmul.f32 %v646_v63, %v645_v18  ;;  %v4166_v51 = vld [vmem:[#allocation18_spill] sm:$0xff] }
 0x46f   :  { %vm602_vm9 = vcmp.gt.f32.partialorder %v601_v43, 0.0 }
 0x470   :  { %v3016_v49 = vsel %vm602_vm9, 1.0, %v4164_v24 }
 0x471   :  { %vm605_vm10 = vcmp.lt.f32.partialorder %v3016_v49, 1.0 }
 0x472   :  { %v648_v6 = vsel %vm605_vm10, %v647_v20, 0.0 }
 0x473   :  { %v649_v52 = vsel %vm639_vm11, %v648_v6, 0.0  ;;  %v3020_v19 = vadd.f32 %v648_v6, %v2857_v47  ;;  %v651_v11 = vsel %vm640_vm2, %v648_v6, 0.0  ;;  %v653_v40 = vsel %vm641_vm3, %v648_v6, 0.0 }
 0x474   :  { %v3027_v0 = vadd.f32 %v649_v52, %v2866_v53  ;;  %v3037_v13 = vadd.f32 %v651_v11, %v2878_v2  ;;  %v3053_v28 = vadd.f32 %v653_v40, %v2900_v58  ;;  %v655_v39 = vsel %vm642_vm8, %v648_v6, 0.0 }
 0x475   :  { %v691_v17 = vmul.f32 %v3020_v19, %v2727_v55  ;;  %v658_v45 = vmul.f32 %v3020_v19, %v2724_v54  ;;  %v724_v10 = vmul.f32 %v3020_v19, %v2730_v56  ;;  %v3063_v16 = vadd.f32 %v655_v39, %v2912_v62 }
 0x476   :  { %v697_v47 = vmul.f32 %v3027_v0, %v2859_v50  ;;  %v670_v53 = vmul.f32 %v3037_v13, %v2868_v61  ;;  %v664_v29 = vmul.f32 %v3027_v0, %v2853_v42  ;;  %v730_v2 = vmul.f32 %v3027_v0, %v2884_v4 }
 0x477   :  { %693 = vrot.lane.b32.xlu1 %v691_v17, %s2567_s30  ;;  %660 = vrot.lane.b32.xlu0 %v658_v45, %s2568_s6  ;;  %v703_v25 = vmul.f32 %v3037_v13, %v2880_v3  ;;  %v709_v41 = vmul.f32 %v3053_v28, %v2902_v59  ;;  %v676_v1 = vmul.f32 %v3053_v28, %v2892_v15 }
 0x478   :  { %v682_v58 = vmul.f32 %v3063_v16, %v2918_v23  ;;  %v736_v35 = vmul.f32 %v3037_v13, %v2914_v22  ;;  %v742_v44 = vmul.f32 %v3053_v28, %v2926_v34  ;;  %v715_v62 = vmul.f32 %v3063_v16, %v4165_v7 }
 0x479   :  { %v748_v5 = vmul.f32 %v3063_v16, %v4166_v51 }
 0x47b   :  { %726 = vrot.lane.b32.xlu0 %v724_v10, %s2569_s7  ;;  %699 = vrot.lane.b32.xlu1 %v697_v47, %s2567_s30 }
 0x47f   :  { %672 = vrot.lane.b32.xlu1 %v670_v53, %s2568_s6  ;;  %666 = vrot.lane.b32.xlu0 %v664_v29, %s2568_s6 }
 0x483   :  { %732 = vrot.lane.b32.xlu1 %v730_v2, %s2569_s7  ;;  %705 = vrot.lane.b32.xlu0 %v703_v25, %s2567_s30 }
 0x487   :  { %711 = vrot.lane.b32.xlu1 %v709_v41, %s2567_s30  ;;  %678 = vrot.lane.b32.xlu0 %v676_v1, %s2568_s6 }
 0x48b   :  { %684 = vrot.lane.b32.xlu1 %v682_v58, %s2568_s6  ;;  %738 = vrot.lane.b32.xlu0 %v736_v35, %s2569_s7 }
 0x48f   :  { %744 = vrot.lane.b32.xlu1 %v742_v44, %s2569_s7  ;;  %717 = vrot.lane.b32.xlu0 %v715_v62, %s2567_s30 }
 0x493   :  { %750 = vrot.lane.b32.xlu0 %v748_v5, %s2569_s7 }
 0x4e9   :  { %v694_v18 = vpop.permute.xlu1 %693  ;;  %v661_v43 = vpop.permute.xlu0 %660 }
 0x4ea   :  { %v663_v17 = vsub.f32 %v2774_v26, %v661_v43  ;;  %v696_v29 = vsub.f32 %v2777_v27, %v694_v18 }
 0x4ed   :  { %v727_v63 = vpop.permute.xlu0 %726  ;;  %v700_v20 = vpop.permute.xlu1 %699 }
 0x4ee   :  { %v702_v2 = vadd.f32 %v700_v20, %v696_v29  ;;  %v729_v1 = vsub.f32 %v2784_v33, %v727_v63 }
 0x4f1   :  { %v673_v6 = vpop.permute.xlu1 %672  ;;  %v667_v52 = vpop.permute.xlu0 %666 }
 0x4f2   :  { %v669_v10 = vadd.f32 %v667_v52, %v663_v17 }
 0x4f4   :  { %v675_v40 = vadd.f32 %v673_v6, %v669_v10 }
 0x4f5   :  { %v733_v45 = vpop.permute.xlu1 %732  ;;  %v706_v11 = vpop.permute.xlu0 %705 }
 0x4f6   :  { %v708_v58 = vadd.f32 %v706_v11, %v702_v2  ;;  %v735_v44 = vadd.f32 %v733_v45, %v729_v1 }
 0x4f9   :  { %v712_v47 = vpop.permute.xlu1 %711  ;;  %v679_v53 = vpop.permute.xlu0 %678 }
 0x4fa   :  { %v681_v25 = vadd.f32 %v679_v53, %v675_v40  ;;  %v714_v62 = vadd.f32 %v712_v47, %v708_v58  ;;  %v761_v58 = vmul.f32 %v3037_v13, %v2976_v36 }
 0x4fd   :  { %v685_v39 = vpop.permute.xlu1 %684  ;;  %v739_v41 = vpop.permute.xlu0 %738 }
 0x4fe   :  { %v687_v35 = vadd.f32 %v685_v39, %v681_v25  ;;  %v741_v7 = vadd.f32 %v739_v41, %v735_v44  ;;  %v757_v25 = vmul.f32 %v3020_v19, %v2733_v57  ;;  %v759_v41 = vmul.f32 %v3027_v0, %v2969_v60 }
 0x4ff   :  { %v763_v44 = vmul.f32 %v3053_v28, %v2982_v46 }
 0x500   :  { %v688_v5 = vsub.f32 %v687_v35, %v2774_v26  ;;  %v793_v43 = vand.u32 2147483647, %v687_v35  ;;  %v758_v39 = vsub.f32 %v2828_v9, %v757_v25 }
 0x501   :  { %v745_v51 = vpop.permute.xlu1 %744  ;;  %v718_v52 = vpop.permute.xlu0 %717 }
 0x502   :  { %v689_v17 = vmul.f32 1.02, %v688_v5  ;;  %v720_v34 = vadd.f32 %v718_v52, %v714_v62  ;;  %v794_v18 = vmul.f32 %v2779_v30, %v793_v43  ;;  %v747_v20 = vadd.f32 %v745_v51, %v741_v7 }
 0x503   :  { %v760_v1 = vadd.f32 %v759_v41, %v758_v39  ;;  %v765_v5 = vmul.f32 %v3063_v16, %v2707_v48 }
 0x504   :  { %v721_v6 = vsub.f32 %v720_v34, %v2777_v27  ;;  %v800_v10 = vand.u32 2147483647, %v720_v34  ;;  %796 = vrot.lane.b32.xlu1 %v794_v18, %s2566_s29  ;;  %v690_v47 = vadd.f32 %v689_v17, %v2774_v26 }
 0x505   :  { %v751_v63 = vpop.permute.xlu0 %750  ;;  %v762_v35 = vadd.f32 %v761_v58, %v760_v1 }
 0x506   :  { %v722_v11 = vmul.f32 1.02, %v721_v6  ;;  %v753_v45 = vadd.f32 %v751_v63, %v747_v20  ;;  %v801_v53 = vmul.f32 %v2781_v31, %v800_v10 }
 0x507   :  { %v764_v62 = vadd.f32 %v763_v44, %v762_v35 }
 0x508   :  { %v754_v29 = vsub.f32 %v753_v45, %v2784_v33  ;;  %v807_v40 = vand.u32 2147483647, %v753_v45  ;;  %771 = vrot.lane.b32.xlu1 %v690_v47, %s2566_s29  ;;  %803 = vrot.lane.b32.xlu0 %v801_v53, %s2565_s2  ;;  %v723_v51 = vadd.f32 %v722_v11, %v2777_v27 }
 0x509   :  { %v766_v43 = vadd.f32 %v765_v5, %v764_v62 }
 0x50a   :  { %v755_v7 = vmul.f32 1.02, %v754_v29  ;;  %v808_v34 = vmul.f32 %v2793_v37, %v807_v40 }
 0x50b   :  { %v814_v17 = vand.u32 2147483647, %v766_v43  ;;  %v767_v6 = vsub.f32 %v766_v43, %v2828_v9 }
 0x50c   :  { %776 = vrot.lane.b32.xlu0 %v723_v51, %s2565_s2  ;;  %810 = vrot.lane.b32.xlu1 %v808_v34, %s2563_s28  ;;  %v756_v2 = vadd.f32 %v755_v7, %v2784_v33 }
 0x50d   :  { %v815_v11 = vmul.f32 %v2832_v14, %v814_v17  ;;  %v768_v53 = vmul.f32 1.02, %v767_v6 }
 0x50f   :  { %v816_v34 = vsel %vm220_vm6, 1e+30, %v815_v11  ;;  %v769_v41 = vadd.f32 %v768_v53, %v2828_v9 }
 0x510   :  { %782 = vrot.lane.b32.xlu0 %v756_v2, %s2563_s28 }
 0x576   :  { %v797_v52 = vpop.permute.xlu1 %796 }
 0x577   :  { %v799_v10 = vsel %vm217_vm7, 1e+30, %v797_v52  ;;  %v787_v52 = vsel %vm220_vm6, -1e+30, %v769_v41 }
 0x57a   :  { %v772_v18 = vpop.permute.xlu1 %771  ;;  %v804_v20 = vpop.permute.xlu0 %803 }
 0x57b   :  { %v806_v63 = vsel %vm218_vm4, 1e+30, %v804_v20  ;;  %v774_v39 = vsel %vm217_vm7, -1e+30, %v772_v18 }
 0x57c   :  { %vm817_vm12 = vcmp.lt.f32.partialorder %v806_v63, %v799_v10 }
 0x57d   :  { %v818_v40 = vsel %vm817_vm12, %v806_v63, %v799_v10  ;;  %v819_v7 = vsel %vm817_vm12, 1, %v4163_v21 }
 0x57e   :  { %v811_v45 = vpop.permute.xlu1 %810  ;;  %v777_v47 = vpop.permute.xlu0 %776 }
 0x57f   :  { %v813_v29 = vsel %vm219_vm5, 1e+30, %v811_v45  ;;  %v779_v51 = vsel %vm218_vm4, -1e+30, %v777_v47 }
 0x580   :  { %vm820_vm13 = vcmp.lt.f32.partialorder %v813_v29, %v818_v40  ;;  %v780_v35 = vmax.f32 %v774_v39, %v779_v51 }
 0x581   :  { %v821_v2 = vsel %vm820_vm13, %v813_v29, %v818_v40  ;;  %v822_v25 = vsel %vm820_vm13, 2, %v819_v7 }
 0x582   :  { %vm823_vm14 = vcmp.lt.f32.partialorder %v816_v34, %v821_v2  ;;  %v783_v1 = vpop.permute.xlu0 %782 }
 0x583   :  { %v825_v58 = vsel %vm823_vm14, 3, %v822_v25  ;;  %v785_v44 = vsel %vm219_vm5, -1e+30, %v783_v1  ;;  %v824_v17 = vsel %vm823_vm14, %v816_v34, %v821_v2 }
 0x584   :  { %vm827_vm15 = vcmp.eq.s32.totalorder %v825_v58, 1  ;;  %vm828_vm0 = vcmp.eq.s32.totalorder %v825_v58, 2  ;;  %v786_v5 = vmax.f32 %v780_v35, %v785_v44  ;;  %vm829_vm1 = vcmp.eq.s32.totalorder %v825_v58, 3 }
 0x585   :  { %v830_v62 = vsel %vm827_vm15, %v2830_v12, %v2824_v8  ;;  %v833_v6 = vmax.f32 %v824_v17, 0.0001  ;;  %vm826_vm8 = vcmp.eq.s32.totalorder %v825_v58, 0  ;;  %v4169_v17 = vld [vmem:[#allocation18_spill] sm:$0xff] }
 0x586   :  { %v831_v43 = vsel %vm828_vm0, %v2846_v38, %v830_v62  ;;  %v788_v18 = vmax.f32 %v786_v5, %v787_v52  ;;  %v4167_v5 = vld [vmem:[#allocation16_spill] sm:$0xff]  ;;  %v4168_v52 = vld [vmem:[#allocation17_spill] sm:$0xff] }
 0x587   :  { %v832_v20 = vsel %vm829_vm1, %v2832_v14, %v831_v43 }
 0x588   :  { %vm789_vm2 = vcmp.gt.f32.partialorder %v788_v18, 0.0  ;;  %v834_v11 = vmul.f32 %v833_v6, %v832_v20 }
 0x589   :  { %v790_v10 = vsel %vm789_vm2, 1.0, %v4164_v24 }
 0x58a   :  { %v3140_v63 = vadd.f32 %v790_v10, %v3016_v49 }
 0x58c   :  { %vm792_vm3 = vcmp.lt.f32.partialorder %v3140_v63, 1.0 }
 0x58d   :  { %v835_v45 = vsel %vm792_vm3, %v834_v11, 0.0 }
 0x58e   :  { %v836_v47 = vsel %vm826_vm8, %v835_v45, 0.0  ;;  %v3144_v53 = vadd.f32 %v835_v45, %v3020_v19  ;;  %v838_v49 = vsel %vm827_vm15, %v835_v45, 0.0  ;;  %v840_v25 = vsel %vm828_vm0, %v835_v45, 0.0 }
 0x58f   :  { %v3151_v7 = vadd.f32 %v836_v47, %v3027_v0  ;;  %v3161_v34 = vadd.f32 %v838_v49, %v3037_v13  ;;  %v3177_v41 = vadd.f32 %v840_v25, %v3053_v28  ;;  %v842_v1 = vsel %vm829_vm1, %v835_v45, 0.0 }
 0x590   :  { %v878_v29 = vmul.f32 %v3144_v53, %v2727_v55  ;;  %v845_v40 = vmul.f32 %v3144_v53, %v2724_v54  ;;  %v911_v51 = vmul.f32 %v3144_v53, %v2730_v56  ;;  %v3187_v62 = vadd.f32 %v842_v1, %v3063_v16 }
 0x591   :  { %v884_v19 = vmul.f32 %v3151_v7, %v2859_v50  ;;  %v857_v0 = vmul.f32 %v3161_v34, %v2868_v61  ;;  %v851_v2 = vmul.f32 %v3151_v7, %v2853_v42  ;;  %v917_v13 = vmul.f32 %v3151_v7, %v2884_v4 }
 0x592   :  { %880 = vrot.lane.b32.xlu0 %v878_v29, %s2567_s30  ;;  %847 = vrot.lane.b32.xlu1 %v845_v40, %s2568_s6  ;;  %v890_v39 = vmul.f32 %v3161_v34, %v2880_v3  ;;  %v896_v35 = vmul.f32 %v3177_v41, %v2902_v59  ;;  %v863_v44 = vmul.f32 %v3177_v41, %v2892_v15 }
 0x593   :  { %v869_v28 = vmul.f32 %v3187_v62, %v2918_v23  ;;  %v923_v58 = vmul.f32 %v3161_v34, %v2914_v22  ;;  %v929_v43 = vmul.f32 %v3177_v41, %v4167_v5  ;;  %v902_v16 = vmul.f32 %v3187_v62, %v4168_v52 }
 0x594   :  { %v935_v18 = vmul.f32 %v3187_v62, %v4169_v17 }
 0x596   :  { %913 = vrot.lane.b32.xlu1 %v911_v51, %s2569_s7  ;;  %886 = vrot.lane.b32.xlu0 %v884_v19, %s2567_s30 }
 0x59a   :  { %859 = vrot.lane.b32.xlu0 %v857_v0, %s2568_s6  ;;  %853 = vrot.lane.b32.xlu1 %v851_v2, %s2568_s6 }
 0x59e   :  { %919 = vrot.lane.b32.xlu0 %v917_v13, %s2569_s7  ;;  %892 = vrot.lane.b32.xlu1 %v890_v39, %s2567_s30 }
 0x5a2   :  { %898 = vrot.lane.b32.xlu0 %v896_v35, %s2567_s30  ;;  %865 = vrot.lane.b32.xlu1 %v863_v44, %s2568_s6 }
 0x5a6   :  { %871 = vrot.lane.b32.xlu0 %v869_v28, %s2568_s6  ;;  %925 = vrot.lane.b32.xlu1 %v923_v58, %s2569_s7 }
 0x5aa   :  { %931 = vrot.lane.b32.xlu0 %v929_v43, %s2569_s7  ;;  %904 = vrot.lane.b32.xlu1 %v902_v16, %s2567_s30 }
 0x5ae   :  { %937 = vrot.lane.b32.xlu1 %v935_v18, %s2569_s7 }
 0x604   :  { %v881_v20 = vpop.permute.xlu0 %880  ;;  %v848_v6 = vpop.permute.xlu1 %847 }
 0x605   :  { %v850_v29 = vsub.f32 %v2774_v26, %v848_v6  ;;  %v883_v2 = vsub.f32 %v2777_v27, %v881_v20 }
 0x608   :  { %v914_v10 = vpop.permute.xlu1 %913  ;;  %v887_v11 = vpop.permute.xlu0 %886 }
 0x609   :  { %v889_v13 = vadd.f32 %v887_v11, %v883_v2  ;;  %v916_v44 = vsub.f32 %v2784_v33, %v914_v10 }
 0x60c   :  { %v860_v45 = vpop.permute.xlu0 %859  ;;  %v854_v47 = vpop.permute.xlu1 %853 }
 0x60d   :  { %v856_v51 = vadd.f32 %v854_v47, %v850_v29 }
 0x60f   :  { %v862_v25 = vadd.f32 %v860_v45, %v856_v51 }
 0x610   :  { %v920_v40 = vpop.permute.xlu0 %919  ;;  %v893_v49 = vpop.permute.xlu1 %892 }
 0x611   :  { %v895_v28 = vadd.f32 %v893_v49, %v889_v13  ;;  %v922_v43 = vadd.f32 %v920_v40, %v916_v44 }
 0x614   :  { %v899_v19 = vpop.permute.xlu0 %898  ;;  %v866_v0 = vpop.permute.xlu1 %865 }
 0x615   :  { %v868_v39 = vadd.f32 %v866_v0, %v862_v25  ;;  %v901_v16 = vadd.f32 %v899_v19, %v895_v28  ;;  %v946_v28 = vmul.f32 %v3151_v7, %v2969_v60 }
 0x618   :  { %v872_v1 = vpop.permute.xlu0 %871  ;;  %v926_v35 = vpop.permute.xlu1 %925 }
 0x619   :  { %v874_v58 = vadd.f32 %v872_v1, %v868_v39  ;;  %v928_v20 = vadd.f32 %v926_v35, %v922_v43  ;;  %v944_v35 = vmul.f32 %v3144_v53, %v2733_v57  ;;  %v948_v43 = vmul.f32 %v3161_v34, %v2976_v36 }
 0x61b   :  { %v875_v18 = vsub.f32 %v874_v58, %v2774_v26  ;;  %v980_v6 = vand.u32 2147483647, %v874_v58  ;;  %v945_v44 = vsub.f32 %v2828_v9, %v944_v35 }
 0x61c   :  { %v932_v17 = vpop.permute.xlu0 %931  ;;  %v905_v47 = vpop.permute.xlu1 %904 }
 0x61d   :  { %v876_v29 = vmul.f32 1.02, %v875_v18  ;;  %v981_v52 = vmul.f32 %v2779_v30, %v980_v6  ;;  %v907_v45 = vadd.f32 %v905_v47, %v901_v16  ;;  %v934_v11 = vadd.f32 %v932_v17, %v928_v20 }
 0x61e   :  { %v947_v58 = vadd.f32 %v946_v28, %v945_v44  ;;  %v950_v18 = vmul.f32 %v3177_v41, %v2982_v46  ;;  %v952_v47 = vmul.f32 %v3187_v62, %v2707_v48 }
 0x61f   :  { %v908_v51 = vsub.f32 %v907_v45, %v2777_v27  ;;  %v987_v0 = vand.u32 2147483647, %v907_v45  ;;  %983 = vrot.lane.b32.xlu0 %v981_v52, %s2566_s29  ;;  %v877_v40 = vadd.f32 %v876_v29, %v2774_v26 }
 0x620   :  { %v938_v10 = vpop.permute.xlu1 %937  ;;  %v949_v16 = vadd.f32 %v948_v43, %v947_v58 }
 0x621   :  { %v909_v49 = vmul.f32 1.02, %v908_v51  ;;  %v988_v19 = vmul.f32 %v2781_v31, %v987_v0  ;;  %v940_v2 = vadd.f32 %v938_v10, %v934_v11 }
 0x622   :  { %v951_v6 = vadd.f32 %v950_v18, %v949_v16 }
 0x623   :  { %v941_v25 = vsub.f32 %v940_v2, %v2784_v33  ;;  %v994_v13 = vand.u32 2147483647, %v940_v2  ;;  %958 = vrot.lane.b32.xlu0 %v877_v40, %s2566_s29  ;;  %990 = vrot.lane.b32.xlu1 %v988_v19, %s2565_s2  ;;  %v910_v17 = vadd.f32 %v909_v49, %v2777_v27 }
 0x624   :  { %v953_v29 = vadd.f32 %v952_v47, %v951_v6 }
 0x625   :  { %v942_v39 = vmul.f32 1.02, %v941_v25  ;;  %v995_v1 = vmul.f32 %v2793_v37, %v994_v13 }
 0x626   :  { %v1001_v45 = vand.u32 2147483647, %v953_v29  ;;  %v954_v0 = vsub.f32 %v953_v29, %v2828_v9 }
 0x627   :  { %963 = vrot.lane.b32.xlu1 %v910_v17, %s2565_s2  ;;  %997 = vrot.lane.b32.xlu0 %v995_v1, %s2563_s28  ;;  %v943_v52 = vadd.f32 %v942_v39, %v2784_v33 }
 0x628   :  { %v1002_v49 = vmul.f32 %v2832_v14, %v1001_v45  ;;  %v955_v25 = vmul.f32 1.02, %v954_v0 }
 0x62a   :  { %v956_v58 = vadd.f32 %v955_v25, %v2828_v9 }
 0x62b   :  { %969 = vrot.lane.b32.xlu1 %v943_v52, %s2563_s28  ;;  %v1003_v52 = vsel %vm220_vm6, 1e+30, %v1002_v49 }
 0x62c   :  { %v974_v45 = vsel %vm220_vm6, -1e+30, %v956_v58 }
 0x691   :  { %v984_v20 = vpop.permute.xlu0 %983 }
 0x692   :  { %v986_v10 = vsel %vm217_vm7, 1e+30, %v984_v20 }
 0x695   :  { %v959_v11 = vpop.permute.xlu0 %958  ;;  %v991_v51 = vpop.permute.xlu1 %990 }
 0x696   :  { %v993_v40 = vsel %vm218_vm4, 1e+30, %v991_v51  ;;  %v961_v28 = vsel %vm217_vm7, -1e+30, %v959_v11 }
 0x697   :  { %vm1004_vm9 = vcmp.lt.f32.partialorder %v993_v40, %v986_v10 }
 0x698   :  { %v1005_v17 = vsel %vm1004_vm9, %v993_v40, %v986_v10  ;;  %v1006_v39 = vsel %vm1004_vm9, 1, %v4163_v21 }
 0x699   :  { %v998_v19 = vpop.permute.xlu0 %997  ;;  %v964_v2 = vpop.permute.xlu1 %963 }
 0x69a   :  { %v1000_v13 = vsel %vm219_vm5, 1e+30, %v998_v19  ;;  %v966_v1 = vsel %vm218_vm4, -1e+30, %v964_v2 }
 0x69b   :  { %vm1007_vm10 = vcmp.lt.f32.partialorder %v1000_v13, %v1005_v17  ;;  %v967_v18 = vmax.f32 %v961_v28, %v966_v1 }
 0x69c   :  { %v1008_v35 = vsel %vm1007_vm10, %v1000_v13, %v1005_v17  ;;  %v1009_v44 = vsel %vm1007_vm10, 2, %v1006_v39 }
 0x69d   :  { %vm1010_vm11 = vcmp.lt.f32.partialorder %v1003_v52, %v1008_v35  ;;  %v970_v43 = vpop.permute.xlu1 %969 }
 0x69e   :  { %v1012_v16 = vsel %vm1010_vm11, 3, %v1009_v44  ;;  %v972_v6 = vsel %vm219_vm5, -1e+30, %v970_v43  ;;  %v1011_v11 = vsel %vm1010_vm11, %v1003_v52, %v1008_v35 }
 0x69f   :  { %vm1014_vm12 = vcmp.eq.s32.totalorder %v1012_v16, 1  ;;  %vm1015_vm13 = vcmp.eq.s32.totalorder %v1012_v16, 2  ;;  %v973_v29 = vmax.f32 %v967_v18, %v972_v6  ;;  %vm1016_vm14 = vcmp.eq.s32.totalorder %v1012_v16, 3 }
 0x6a0   :  { %v1017_v47 = vsel %vm1014_vm12, %v2830_v12, %v2824_v8  ;;  %v1020_v10 = vmax.f32 %v1011_v11, 0.0001  ;;  %vm1013_vm1 = vcmp.eq.s32.totalorder %v1012_v16, 0  ;;  %v4171_v11 = vld [vmem:[#allocation18_spill] sm:$0xff] }
 0x6a1   :  { %v1018_v20 = vsel %vm1015_vm13, %v2846_v38, %v1017_v47  ;;  %v975_v51 = vmax.f32 %v973_v29, %v974_v45 }
 0x6a2   :  { %v1019_v0 = vsel %vm1016_vm14, %v2832_v14, %v1018_v20  ;;  %v4170_v20 = vld [vmem:[#allocation17_spill] sm:$0xff] }
 0x6a3   :  { %vm976_vm15 = vcmp.gt.f32.partialorder %v975_v51, 0.0  ;;  %v1021_v19 = vmul.f32 %v1020_v10, %v1019_v0 }
 0x6a4   :  { %v977_v40 = vsel %vm976_vm15, 1.0, %v4164_v24 }
 0x6a5   :  { %v3264_v49 = vadd.f32 %v977_v40, %v3140_v63 }
 0x6a7   :  { %vm979_vm0 = vcmp.lt.f32.partialorder %v3264_v49, 1.0 }
 0x6a8   :  { %v1022_v2 = vsel %vm979_vm0, %v1021_v19, 0.0 }
 0x6a9   :  { %v1023_v25 = vsel %vm1013_vm1, %v1022_v2, 0.0  ;;  %v3268_v13 = vadd.f32 %v1022_v2, %v3144_v53  ;;  %v1025_v63 = vsel %vm1014_vm12, %v1022_v2, 0.0  ;;  %v1027_v28 = vsel %vm1015_vm13, %v1022_v2, 0.0 }
 0x6aa   :  { %v3271_v17 = vadd.f32 %v1023_v25, %v3151_v7  ;;  %v3281_v52 = vadd.f32 %v1025_v63, %v3161_v34  ;;  %v3297_v34 = vadd.f32 %v1027_v28, %v3177_v41  ;;  %v1029_v18 = vsel %vm1016_vm14, %v1022_v2, 0.0 }
 0x6ab   :  { %v1065_v39 = vmul.f32 %v3268_v13, %v2727_v55  ;;  %v1032_v1 = vmul.f32 %v3268_v13, %v2724_v54  ;;  %v1098_v53 = vmul.f32 %v3268_v13, %v2730_v56  ;;  %v3307_v6 = vadd.f32 %v1029_v18, %v3187_v62 }
 0x6ac   :  { %v1071_v7 = vmul.f32 %v3271_v17, %v2859_v50  ;;  %v1044_v35 = vmul.f32 %v3281_v52, %v2868_v61  ;;  %v1038_v44 = vmul.f32 %v3271_v17, %v2853_v42  ;;  %v1104_v58 = vmul.f32 %v3271_v17, %v2884_v4 }
 0x6ad   :  { %1067 = vrot.lane.b32.xlu1 %v1065_v39, %s2567_s30  ;;  %1034 = vrot.lane.b32.xlu0 %v1032_v1, %s2568_s6  ;;  %v1077_v43 = vmul.f32 %v3281_v52, %v2880_v3  ;;  %v1083_v47 = vmul.f32 %v3297_v34, %v2902_v59  ;;  %v1050_v41 = vmul.f32 %v3297_v34, %v2892_v15 }
 0x6ae   :  { %v1056_v16 = vmul.f32 %v3307_v6, %v2918_v23  ;;  %v1110_v29 = vmul.f32 %v3281_v52, %v2914_v22  ;;  %v1116_v62 = vmul.f32 %v3297_v34, %v4167_v5  ;;  %v1089_v45 = vmul.f32 %v3307_v6, %v4170_v20 }
 0x6af   :  { %v1122_v51 = vmul.f32 %v3307_v6, %v4171_v11 }
 0x6b1   :  { %1100 = vrot.lane.b32.xlu0 %v1098_v53, %s2569_s7  ;;  %1073 = vrot.lane.b32.xlu1 %v1071_v7, %s2567_s30 }
 0x6b5   :  { %1046 = vrot.lane.b32.xlu1 %v1044_v35, %s2568_s6  ;;  %1040 = vrot.lane.b32.xlu0 %v1038_v44, %s2568_s6 }
 0x6b9   :  { %1106 = vrot.lane.b32.xlu1 %v1104_v58, %s2569_s7  ;;  %1079 = vrot.lane.b32.xlu0 %v1077_v43, %s2567_s30 }
 0x6bd   :  { %1085 = vrot.lane.b32.xlu1 %v1083_v47, %s2567_s30  ;;  %1052 = vrot.lane.b32.xlu0 %v1050_v41, %s2568_s6 }
 0x6c1   :  { %1058 = vrot.lane.b32.xlu1 %v1056_v16, %s2568_s6  ;;  %1112 = vrot.lane.b32.xlu0 %v1110_v29, %s2569_s7 }
 0x6c5   :  { %1118 = vrot.lane.b32.xlu1 %v1116_v62, %s2569_s7  ;;  %1091 = vrot.lane.b32.xlu0 %v1089_v45, %s2567_s30 }
 0x6c9   :  { %1124 = vrot.lane.b32.xlu0 %v1122_v51, %s2569_s7 }
 0x71f   :  { %v1068_v0 = vpop.permute.xlu1 %1067  ;;  %v1035_v10 = vpop.permute.xlu0 %1034 }
 0x720   :  { %v1037_v39 = vsub.f32 %v2774_v26, %v1035_v10  ;;  %v1070_v44 = vsub.f32 %v2777_v27, %v1068_v0 }
 0x723   :  { %v1101_v40 = vpop.permute.xlu0 %1100  ;;  %v1074_v19 = vpop.permute.xlu1 %1073 }
 0x724   :  { %v1076_v58 = vadd.f32 %v1074_v19, %v1070_v44  ;;  %v1103_v41 = vsub.f32 %v2784_v33, %v1101_v40 }
 0x727   :  { %v1047_v2 = vpop.permute.xlu1 %1046  ;;  %v1041_v25 = vpop.permute.xlu0 %1040 }
 0x728   :  { %v1043_v53 = vadd.f32 %v1041_v25, %v1037_v39 }
 0x72a   :  { %v1049_v28 = vadd.f32 %v1047_v2, %v1043_v53 }
 0x72b   :  { %v1107_v1 = vpop.permute.xlu1 %1106  ;;  %v1080_v63 = vpop.permute.xlu0 %1079 }
 0x72c   :  { %v1082_v16 = vadd.f32 %v1080_v63, %v1076_v58  ;;  %v1109_v62 = vadd.f32 %v1107_v1, %v1103_v41 }
 0x72f   :  { %v1086_v7 = vpop.permute.xlu1 %1085  ;;  %v1053_v35 = vpop.permute.xlu0 %1052 }
 0x730   :  { %v1055_v43 = vadd.f32 %v1053_v35, %v1049_v28  ;;  %v1088_v45 = vadd.f32 %v1086_v7, %v1082_v16  ;;  %v1133_v16 = vmul.f32 %v3271_v17, %v2969_v60 }
 0x733   :  { %v1059_v18 = vpop.permute.xlu1 %1058  ;;  %v1113_v47 = vpop.permute.xlu0 %1112 }
 0x734   :  { %v1061_v29 = vadd.f32 %v1059_v18, %v1055_v43  ;;  %v1115_v0 = vadd.f32 %v1113_v47, %v1109_v62  ;;  %v1131_v47 = vmul.f32 %v3268_v13, %v2733_v57  ;;  %v1135_v62 = vmul.f32 %v3281_v52, %v2976_v36 }
 0x736   :  { %v1062_v51 = vsub.f32 %v1061_v29, %v2774_v26  ;;  %v1167_v10 = vand.u32 2147483647, %v1061_v29  ;;  %v1132_v41 = vsub.f32 %v2828_v9, %v1131_v47 }
 0x737   :  { %v1119_v11 = vpop.permute.xlu1 %1118  ;;  %v1092_v25 = vpop.permute.xlu0 %1091 }
 0x738   :  { %v1063_v39 = vmul.f32 1.02, %v1062_v51  ;;  %v1168_v20 = vmul.f32 %v2779_v30, %v1167_v10  ;;  %v1094_v2 = vadd.f32 %v1092_v25, %v1088_v45  ;;  %v1121_v19 = vadd.f32 %v1119_v11, %v1115_v0 }
 0x739   :  { %v1134_v29 = vadd.f32 %v1133_v16, %v1132_v41  ;;  %v1137_v51 = vmul.f32 %v3297_v34, %v2982_v46  ;;  %v1139_v25 = vmul.f32 %v3307_v6, %v2707_v48 }
 0x73a   :  { %v1095_v53 = vsub.f32 %v1094_v2, %v2777_v27  ;;  %v1174_v35 = vand.u32 2147483647, %v1094_v2  ;;  %1170 = vrot.lane.b32.xlu1 %v1168_v20, %s2566_s29  ;;  %v1064_v1 = vadd.f32 %v1063_v39, %v2774_v26 }
 0x73b   :  { %v1125_v40 = vpop.permute.xlu0 %1124  ;;  %v1136_v45 = vadd.f32 %v1135_v62, %v1134_v29 }
 0x73c   :  { %v1096_v63 = vmul.f32 1.02, %v1095_v53  ;;  %v1175_v7 = vmul.f32 %v2781_v31, %v1174_v35  ;;  %v1127_v44 = vadd.f32 %v1125_v40, %v1121_v19 }
 0x73d   :  { %v1138_v10 = vadd.f32 %v1137_v51, %v1136_v45 }
 0x73e   :  { %v1128_v28 = vsub.f32 %v1127_v44, %v2784_v33  ;;  %v1181_v58 = vand.u32 2147483647, %v1127_v44  ;;  %1145 = vrot.lane.b32.xlu1 %v1064_v1, %s2566_s29  ;;  %1177 = vrot.lane.b32.xlu0 %v1175_v7, %s2565_s2  ;;  %v1097_v11 = vadd.f32 %v1096_v63, %v2777_v27 }
 0x73f   :  { %v1140_v39 = vadd.f32 %v1139_v25, %v1138_v10 }
 0x740   :  { %v1129_v43 = vmul.f32 1.02, %v1128_v28  ;;  %v1182_v18 = vmul.f32 %v2793_v37, %v1181_v58 }
 0x741   :  { %v1188_v2 = vand.u32 2147483647, %v1140_v39  ;;  %v1141_v35 = vsub.f32 %v1140_v39, %v2828_v9 }
 0x742   :  { %1150 = vrot.lane.b32.xlu0 %v1097_v11, %s2565_s2  ;;  %1184 = vrot.lane.b32.xlu1 %v1182_v18, %s2563_s28  ;;  %v1130_v20 = vadd.f32 %v1129_v43, %v2784_v33 }
 0x743   :  { %v1189_v63 = vmul.f32 %v2832_v14, %v1188_v2  ;;  %v1142_v28 = vmul.f32 1.02, %v1141_v35 }
 0x745   :  { %v1143_v29 = vadd.f32 %v1142_v28, %v2828_v9 }
 0x746   :  { %1156 = vrot.lane.b32.xlu0 %v1130_v20, %s2563_s28  ;;  %v1190_v20 = vsel %vm220_vm6, 1e+30, %v1189_v63 }
 0x747   :  { %v1161_v2 = vsel %vm220_vm6, -1e+30, %v1143_v29 }
 0x7ac   :  { %v1171_v0 = vpop.permute.xlu1 %1170 }
 0x7ad   :  { %v1173_v40 = vsel %vm217_vm7, 1e+30, %v1171_v0 }
 0x7b0   :  { %v1146_v19 = vpop.permute.xlu1 %1145  ;;  %v1178_v53 = vpop.permute.xlu0 %1177 }
 0x7b1   :  { %v1180_v1 = vsel %vm218_vm4, 1e+30, %v1178_v53  ;;  %v1148_v16 = vsel %vm217_vm7, -1e+30, %v1146_v19 }
 0x7b2   :  { %vm1191_vm2 = vcmp.lt.f32.partialorder %v1180_v1, %v1173_v40 }
 0x7b3   :  { %v1192_v11 = vsel %vm1191_vm2, %v1180_v1, %v1173_v40  ;;  %v1193_v43 = vsel %vm1191_vm2, 1, %v4163_v21 }
 0x7b4   :  { %v1185_v7 = vpop.permute.xlu1 %1184  ;;  %v1151_v44 = vpop.permute.xlu0 %1150 }
 0x7b5   :  { %v1187_v58 = vsel %vm219_vm5, 1e+30, %v1185_v7  ;;  %v1153_v18 = vsel %vm218_vm4, -1e+30, %v1151_v44 }
 0x7b6   :  { %vm1194_vm3 = vcmp.lt.f32.partialorder %v1187_v58, %v1192_v11  ;;  %v1154_v51 = vmax.f32 %v1148_v16, %v1153_v18 }
 0x7b7   :  { %v1195_v47 = vsel %vm1194_vm3, %v1187_v58, %v1192_v11  ;;  %v1196_v41 = vsel %vm1194_vm3, 2, %v1193_v43 }
 0x7b8   :  { %vm1197_vm8 = vcmp.lt.f32.partialorder %v1190_v20, %v1195_v47  ;;  %v1157_v62 = vpop.permute.xlu0 %1156 }
 0x7b9   :  { %v1199_v45 = vsel %vm1197_vm8, 3, %v1196_v41  ;;  %v1159_v10 = vsel %vm219_vm5, -1e+30, %v1157_v62  ;;  %v1198_v19 = vsel %vm1197_vm8, %v1190_v20, %v1195_v47 }
 0x7ba   :  { %vm1201_vm9 = vcmp.eq.s32.totalorder %v1199_v45, 1  ;;  %vm1202_vm10 = vcmp.eq.s32.totalorder %v1199_v45, 2  ;;  %v1160_v39 = vmax.f32 %v1154_v51, %v1159_v10  ;;  %vm1203_vm11 = vcmp.eq.s32.totalorder %v1199_v45, 3 }
 0x7bb   :  { %v1204_v25 = vsel %vm1201_vm9, %v2830_v12, %v2824_v8  ;;  %v1207_v40 = vmax.f32 %v1198_v19, 0.0001  ;;  %vm1200_vm14 = vcmp.eq.s32.totalorder %v1199_v45, 0  ;;  %v4173_v19 = vld [vmem:[#allocation18_spill] sm:$0xff] }
 0x7bc   :  { %v1205_v0 = vsel %vm1202_vm10, %v2846_v38, %v1204_v25  ;;  %v1162_v53 = vmax.f32 %v1160_v39, %v1161_v2 }
 0x7bd   :  { %v1206_v35 = vsel %vm1203_vm11, %v2832_v14, %v1205_v0  ;;  %v4172_v0 = vld [vmem:[#allocation17_spill] sm:$0xff] }
 0x7be   :  { %vm1163_vm12 = vcmp.gt.f32.partialorder %v1162_v53, 0.0  ;;  %v1208_v7 = vmul.f32 %v1207_v40, %v1206_v35 }
 0x7bf   :  { %v1164_v1 = vsel %vm1163_vm12, 1.0, %v4164_v24 }
 0x7c0   :  { %v3388_v63 = vadd.f32 %v1164_v1, %v3264_v49 }
 0x7c2   :  { %vm1166_vm13 = vcmp.lt.f32.partialorder %v3388_v63, 1.0 }
 0x7c3   :  { %v1209_v44 = vsel %vm1166_vm13, %v1208_v7, 0.0 }
 0x7c4   :  { %v1210_v28 = vsel %vm1200_vm14, %v1209_v44, 0.0  ;;  %v3392_v58 = vadd.f32 %v1209_v44, %v3268_v13  ;;  %v1212_v49 = vsel %vm1201_vm9, %v1209_v44, 0.0  ;;  %v1214_v16 = vsel %vm1202_vm10, %v1209_v44, 0.0 }
 0x7c5   :  { %v3395_v11 = vadd.f32 %v1210_v28, %v3271_v17  ;;  %v3405_v20 = vadd.f32 %v1212_v49, %v3281_v52  ;;  %v3421_v52 = vadd.f32 %v1214_v16, %v3297_v34  ;;  %v1216_v51 = vsel %vm1203_vm11, %v1209_v44, 0.0 }
 0x7c6   :  { %v1252_v43 = vmul.f32 %v3392_v58, %v2727_v55  ;;  %v1219_v18 = vmul.f32 %v3392_v58, %v2724_v54  ;;  %v1285_v13 = vmul.f32 %v3392_v58, %v2730_v56  ;;  %v3431_v10 = vadd.f32 %v1216_v51, %v3307_v6 }
 0x7c7   :  { %v1258_v17 = vmul.f32 %v3395_v11, %v2859_v50  ;;  %v1231_v47 = vmul.f32 %v3405_v20, %v2868_v61  ;;  %v1225_v41 = vmul.f32 %v3395_v11, %v2853_v42  ;;  %v1291_v29 = vmul.f32 %v3395_v11, %v2884_v4 }
 0x7c8   :  { %1254 = vrot.lane.b32.xlu0 %v1252_v43, %s2567_s30  ;;  %1221 = vrot.lane.b32.xlu1 %v1219_v18, %s2568_s6  ;;  %v1264_v62 = vmul.f32 %v3405_v20, %v2880_v3  ;;  %v1270_v25 = vmul.f32 %v3421_v52, %v2902_v59  ;;  %v1237_v34 = vmul.f32 %v3421_v52, %v2892_v15 }
 0x7c9   :  { %v1243_v45 = vmul.f32 %v3431_v10, %v2918_v23  ;;  %v1297_v39 = vmul.f32 %v3405_v20, %v2914_v22  ;;  %v1303_v6 = vmul.f32 %v3421_v52, %v4167_v5  ;;  %v1276_v2 = vmul.f32 %v3431_v10, %v4172_v0 }
 0x7ca   :  { %v1309_v53 = vmul.f32 %v3431_v10, %v4173_v19 }
 0x7cc   :  { %1287 = vrot.lane.b32.xlu1 %v1285_v13, %s2569_s7  ;;  %1260 = vrot.lane.b32.xlu0 %v1258_v17, %s2567_s30 }
 0x7d0   :  { %1233 = vrot.lane.b32.xlu0 %v1231_v47, %s2568_s6  ;;  %1227 = vrot.lane.b32.xlu1 %v1225_v41, %s2568_s6 }
 0x7d4   :  { %1293 = vrot.lane.b32.xlu0 %v1291_v29, %s2569_s7  ;;  %1266 = vrot.lane.b32.xlu1 %v1264_v62, %s2567_s30 }
 0x7d8   :  { %1272 = vrot.lane.b32.xlu0 %v1270_v25, %s2567_s30  ;;  %1239 = vrot.lane.b32.xlu1 %v1237_v34, %s2568_s6 }
 0x7dc   :  { %1245 = vrot.lane.b32.xlu0 %v1243_v45, %s2568_s6  ;;  %1299 = vrot.lane.b32.xlu1 %v1297_v39, %s2569_s7 }
 0x7e0   :  { %1305 = vrot.lane.b32.xlu0 %v1303_v6, %s2569_s7  ;;  %1278 = vrot.lane.b32.xlu1 %v1276_v2, %s2567_s30 }
 0x7e4   :  { %1311 = vrot.lane.b32.xlu1 %v1309_v53, %s2569_s7 }
 0x83a   :  { %v1255_v35 = vpop.permute.xlu0 %1254  ;;  %v1222_v40 = vpop.permute.xlu1 %1221 }
 0x83b   :  { %v1224_v43 = vsub.f32 %v2774_v26, %v1222_v40  ;;  %v1257_v41 = vsub.f32 %v2777_v27, %v1255_v35 }
 0x83e   :  { %v1288_v1 = vpop.permute.xlu1 %1287  ;;  %v1261_v7 = vpop.permute.xlu0 %1260 }
 0x83f   :  { %v1263_v29 = vadd.f32 %v1261_v7, %v1257_v41  ;;  %v1290_v34 = vsub.f32 %v2784_v33, %v1288_v1 }
 0x842   :  { %v1234_v44 = vpop.permute.xlu0 %1233  ;;  %v1228_v28 = vpop.permute.xlu1 %1227 }
 0x843   :  { %v1230_v13 = vadd.f32 %v1228_v28, %v1224_v43 }
 0x845   :  { %v1236_v16 = vadd.f32 %v1234_v44, %v1230_v13 }
 0x846   :  { %v1294_v18 = vpop.permute.xlu0 %1293  ;;  %v1267_v49 = vpop.permute.xlu1 %1266 }
 0x847   :  { %v1269_v45 = vadd.f32 %v1267_v49, %v1263_v29  ;;  %v1296_v6 = vadd.f32 %v1294_v18, %v1290_v34 }
 0x84a   :  { %v1273_v17 = vpop.permute.xlu0 %1272  ;;  %v1240_v47 = vpop.permute.xlu1 %1239 }
 0x84b   :  { %v1242_v62 = vadd.f32 %v1240_v47, %v1236_v16  ;;  %v1275_v2 = vadd.f32 %v1273_v17, %v1269_v45  ;;  %v1320_v45 = vmul.f32 %v3395_v11, %v2969_v60 }
 0x84e   :  { %v1246_v51 = vpop.permute.xlu0 %1245  ;;  %v1300_v25 = vpop.permute.xlu1 %1299 }
 0x84f   :  { %v1248_v39 = vadd.f32 %v1246_v51, %v1242_v62  ;;  %v1302_v35 = vadd.f32 %v1300_v25, %v1296_v6  ;;  %v1318_v25 = vmul.f32 %v3392_v58, %v2733_v57  ;;  %v1322_v6 = vmul.f32 %v3405_v20, %v2976_v36 }
 0x851   :  { %v1249_v53 = vsub.f32 %v1248_v39, %v2774_v26  ;;  %v1354_v40 = vand.u32 2147483647, %v1248_v39  ;;  %v1319_v34 = vsub.f32 %v2828_v9, %v1318_v25 }
 0x852   :  { %v1306_v19 = vpop.permute.xlu0 %1305  ;;  %v1279_v28 = vpop.permute.xlu1 %1278 }
 0x853   :  { %v1250_v43 = vmul.f32 1.02, %v1249_v53  ;;  %v1355_v0 = vmul.f32 %v2779_v30, %v1354_v40  ;;  %v1281_v44 = vadd.f32 %v1279_v28, %v1275_v2  ;;  %v1308_v7 = vadd.f32 %v1306_v19, %v1302_v35 }
 0x854   :  { %v1321_v39 = vadd.f32 %v1320_v45, %v1319_v34  ;;  %v1324_v53 = vmul.f32 %v3421_v52, %v2982_v46  ;;  %v1326_v28 = vmul.f32 %v3431_v10, %v2707_v48 }
 0x855   :  { %v1282_v13 = vsub.f32 %v1281_v44, %v2777_v27  ;;  %v1361_v47 = vand.u32 2147483647, %v1281_v44  ;;  %1357 = vrot.lane.b32.xlu0 %v1355_v0, %s2566_s29  ;;  %v1251_v18 = vadd.f32 %v1250_v43, %v2774_v26 }
 0x856   :  { %v1312_v1 = vpop.permute.xlu1 %1311  ;;  %v1323_v2 = vadd.f32 %v1322_v6, %v1321_v39 }
 0x857   :  { %v1283_v49 = vmul.f32 1.02, %v1282_v13  ;;  %v1362_v17 = vmul.f32 %v2781_v31, %v1361_v47  ;;  %v1314_v41 = vadd.f32 %v1312_v1, %v1308_v7 }
 0x858   :  { %v1325_v40 = vadd.f32 %v1324_v53, %v1323_v2 }
 0x859   :  { %v1315_v16 = vsub.f32 %v1314_v41, %v2784_v33  ;;  %v1368_v29 = vand.u32 2147483647, %v1314_v41  ;;  %1332 = vrot.lane.b32.xlu0 %v1251_v18, %s2566_s29  ;;  %1364 = vrot.lane.b32.xlu1 %v1362_v17, %s2565_s2  ;;  %v1284_v19 = vadd.f32 %v1283_v49, %v2777_v27 }
 0x85a   :  { %v1327_v43 = vadd.f32 %v1326_v28, %v1325_v40 }
 0x85b   :  { %v1316_v62 = vmul.f32 1.02, %v1315_v16  ;;  %v1369_v51 = vmul.f32 %v2793_v37, %v1368_v29 }
 0x85c   :  { %v1375_v44 = vand.u32 2147483647, %v1327_v43  ;;  %v1328_v47 = vsub.f32 %v1327_v43, %v2828_v9 }
 0x85d   :  { %1337 = vrot.lane.b32.xlu1 %v1284_v19, %s2565_s2  ;;  %1371 = vrot.lane.b32.xlu0 %v1369_v51, %s2563_s28  ;;  %v1317_v0 = vadd.f32 %v1316_v62, %v2784_v33 }
 0x85e   :  { %v1376_v49 = vmul.f32 %v2832_v14, %v1375_v44  ;;  %v1329_v16 = vmul.f32 1.02, %v1328_v47 }
 0x860   :  { %v1330_v39 = vadd.f32 %v1329_v16, %v2828_v9 }
 0x861   :  { %1343 = vrot.lane.b32.xlu1 %v1317_v0, %s2563_s28  ;;  %v1377_v0 = vsel %vm220_vm6, 1e+30, %v1376_v49 }
 0x862   :  { %v1348_v44 = vsel %vm220_vm6, -1e+30, %v1330_v39 }
 0x8c7   :  { %v1358_v35 = vpop.permute.xlu0 %1357 }
 0x8c8   :  { %v1360_v1 = vsel %vm217_vm7, 1e+30, %v1358_v35 }
 0x8cb   :  { %v1333_v7 = vpop.permute.xlu0 %1332  ;;  %v1365_v13 = vpop.permute.xlu1 %1364 }
 0x8cc   :  { %v1367_v18 = vsel %vm218_vm4, 1e+30, %v1365_v13  ;;  %v1335_v45 = vsel %vm217_vm7, -1e+30, %v1333_v7 }
 0x8cd   :  { %vm1378_vm15 = vcmp.lt.f32.partialorder %v1367_v18, %v1360_v1 }
 0x8ce   :  { %v1379_v19 = vsel %vm1378_vm15, %v1367_v18, %v1360_v1  ;;  %v1380_v62 = vsel %vm1378_vm15, 1, %v4163_v21 }
 0x8cf   :  { %v1372_v17 = vpop.permute.xlu0 %1371  ;;  %v1338_v41 = vpop.permute.xlu1 %1337 }
 0x8d0   :  { %v1374_v29 = vsel %vm219_vm5, 1e+30, %v1372_v17  ;;  %v1340_v51 = vsel %vm218_vm4, -1e+30, %v1338_v41 }
 0x8d1   :  { %vm1381_vm0 = vcmp.lt.f32.partialorder %v1374_v29, %v1379_v19  ;;  %v1341_v53 = vmax.f32 %v1335_v45, %v1340_v51 }
 0x8d2   :  { %v1382_v25 = vsel %vm1381_vm0, %v1374_v29, %v1379_v19  ;;  %v1383_v34 = vsel %vm1381_vm0, 2, %v1380_v62 }
 0x8d3   :  { %vm1384_vm1 = vcmp.lt.f32.partialorder %v1377_v0, %v1382_v25  ;;  %v1344_v6 = vpop.permute.xlu1 %1343 }
 0x8d4   :  { %v1386_v2 = vsel %vm1384_vm1, 3, %v1383_v34  ;;  %v1346_v40 = vsel %vm219_vm5, -1e+30, %v1344_v6  ;;  %v1385_v7 = vsel %vm1384_vm1, %v1377_v0, %v1382_v25 }
 0x8d5   :  { %vm1388_vm2 = vcmp.eq.s32.totalorder %v1386_v2, 1  ;;  %vm1389_vm3 = vcmp.eq.s32.totalorder %v1386_v2, 2  ;;  %v1347_v43 = vmax.f32 %v1341_v53, %v1346_v40  ;;  %vm1390_vm8 = vcmp.eq.s32.totalorder %v1386_v2, 3 }
 0x8d6   :  { %v1391_v28 = vsel %vm1388_vm2, %v2830_v12, %v2824_v8  ;;  %v1394_v1 = vmax.f32 %v1385_v7, 0.0001  ;;  %vm1387_vm11 = vcmp.eq.s32.totalorder %v1386_v2, 0  ;;  %v4175_v7 = vld [vmem:[#allocation18_spill] sm:$0xff] }
 0x8d7   :  { %v1392_v35 = vsel %vm1389_vm3, %v2846_v38, %v1391_v28  ;;  %v1349_v13 = vmax.f32 %v1347_v43, %v1348_v44 }
 0x8d8   :  { %v1393_v47 = vsel %vm1390_vm8, %v2832_v14, %v1392_v35  ;;  %v4174_v35 = vld [vmem:[#allocation17_spill] sm:$0xff] }
 0x8d9   :  { %vm1350_vm9 = vcmp.gt.f32.partialorder %v1349_v13, 0.0  ;;  %v1395_v17 = vmul.f32 %v1394_v1, %v1393_v47 }
 0x8da   :  { %v1351_v18 = vsel %vm1350_vm9, 1.0, %v4164_v24 }
 0x8db   :  { %v3512_v49 = vadd.f32 %v1351_v18, %v3388_v63 }
 0x8dd   :  { %vm1353_vm10 = vcmp.lt.f32.partialorder %v3512_v49, 1.0 }
 0x8de   :  { %v1396_v41 = vsel %vm1353_vm10, %v1395_v17, 0.0 }
 0x8df   :  { %v1397_v16 = vsel %vm1387_vm11, %v1396_v41, 0.0  ;;  %v3516_v29 = vadd.f32 %v1396_v41, %v3392_v58  ;;  %v1399_v63 = vsel %vm1388_vm2, %v1396_v41, 0.0  ;;  %v1401_v45 = vsel %vm1389_vm3, %v1396_v41, 0.0 }
 0x8e0   :  { %v3519_v19 = vadd.f32 %v1397_v16, %v3395_v11  ;;  %v3529_v0 = vadd.f32 %v1399_v63, %v3405_v20  ;;  %v3545_v20 = vadd.f32 %v1401_v45, %v3421_v52  ;;  %v1403_v53 = vsel %vm1390_vm8, %v1396_v41, 0.0 }
 0x8e1   :  { %v1439_v62 = vmul.f32 %v3516_v29, %v2727_v55  ;;  %v1406_v51 = vmul.f32 %v3516_v29, %v2724_v54  ;;  %v1472_v58 = vmul.f32 %v3516_v29, %v2730_v56  ;;  %v3555_v40 = vadd.f32 %v1403_v53, %v3431_v10 }
 0x8e2   :  { %v1445_v11 = vmul.f32 %v3519_v19, %v2859_v50  ;;  %v1418_v25 = vmul.f32 %v3529_v0, %v2868_v61  ;;  %v1412_v34 = vmul.f32 %v3519_v19, %v2853_v42  ;;  %v1478_v39 = vmul.f32 %v3519_v19, %v2884_v4 }
 0x8e3   :  { %1441 = vrot.lane.b32.xlu1 %v1439_v62, %s2567_s30  ;;  %1408 = vrot.lane.b32.xlu0 %v1406_v51, %s2568_s6  ;;  %v1451_v6 = vmul.f32 %v3529_v0, %v2880_v3  ;;  %v1457_v28 = vmul.f32 %v3545_v20, %v2902_v59  ;;  %v1424_v52 = vmul.f32 %v3545_v20, %v2892_v15 }
 0x8e4   :  { %v1430_v2 = vmul.f32 %v3555_v40, %v2918_v23  ;;  %v1484_v43 = vmul.f32 %v3529_v0, %v2914_v22  ;;  %v1490_v10 = vmul.f32 %v3545_v20, %v4167_v5  ;;  %v1463_v44 = vmul.f32 %v3555_v40, %v4174_v35 }
 0x8e5   :  { %v1496_v13 = vmul.f32 %v3555_v40, %v4175_v7 }
 0x8e7   :  { %1474 = vrot.lane.b32.xlu0 %v1472_v58, %s2569_s7  ;;  %1447 = vrot.lane.b32.xlu1 %v1445_v11, %s2567_s30 }
 0x8eb   :  { %1420 = vrot.lane.b32.xlu1 %v1418_v25, %s2568_s6  ;;  %1414 = vrot.lane.b32.xlu0 %v1412_v34, %s2568_s6 }
 0x8ef   :  { %1480 = vrot.lane.b32.xlu1 %v1478_v39, %s2569_s7  ;;  %1453 = vrot.lane.b32.xlu0 %v1451_v6, %s2567_s30 }
 0x8f3   :  { %1459 = vrot.lane.b32.xlu1 %v1457_v28, %s2567_s30  ;;  %1426 = vrot.lane.b32.xlu0 %v1424_v52, %s2568_s6 }
 0x8f7   :  { %1432 = vrot.lane.b32.xlu1 %v1430_v2, %s2568_s6  ;;  %1486 = vrot.lane.b32.xlu0 %v1484_v43, %s2569_s7 }
 0x8fb   :  { %1492 = vrot.lane.b32.xlu1 %v1490_v10, %s2569_s7  ;;  %1465 = vrot.lane.b32.xlu0 %v1463_v44, %s2567_s30 }
 0x8ff   :  { %1498 = vrot.lane.b32.xlu0 %v1496_v13, %s2569_s7 }
 0x955   :  { %v1442_v47 = vpop.permute.xlu1 %1441  ;;  %v1409_v1 = vpop.permute.xlu0 %1408 }
 0x956   :  { %v1411_v62 = vsub.f32 %v2774_v26, %v1409_v1  ;;  %v1444_v34 = vsub.f32 %v2777_v27, %v1442_v47 }
 0x959   :  { %v1475_v18 = vpop.permute.xlu0 %1474  ;;  %v1448_v17 = vpop.permute.xlu1 %1447 }
 0x95a   :  { %v1450_v39 = vadd.f32 %v1448_v17, %v1444_v34  ;;  %v1477_v52 = vsub.f32 %v2784_v33, %v1475_v18 }
 0x95d   :  { %v1421_v41 = vpop.permute.xlu1 %1420  ;;  %v1415_v16 = vpop.permute.xlu0 %1414 }
 0x95e   :  { %v1417_v58 = vadd.f32 %v1415_v16, %v1411_v62 }
 0x960   :  { %v1423_v45 = vadd.f32 %v1421_v41, %v1417_v58 }
 0x961   :  { %v1481_v51 = vpop.permute.xlu1 %1480  ;;  %v1454_v63 = vpop.permute.xlu0 %1453 }
 0x962   :  { %v1456_v2 = vadd.f32 %v1454_v63, %v1450_v39  ;;  %v1483_v10 = vadd.f32 %v1481_v51, %v1477_v52 }
 0x965   :  { %v1460_v11 = vpop.permute.xlu1 %1459  ;;  %v1427_v25 = vpop.permute.xlu0 %1426 }
 0x966   :  { %v1429_v6 = vadd.f32 %v1427_v25, %v1423_v45  ;;  %v1462_v44 = vadd.f32 %v1460_v11, %v1456_v2  ;;  %v1507_v2 = vmul.f32 %v3519_v19, %v2969_v60 }
 0x969   :  { %v1433_v53 = vpop.permute.xlu1 %1432  ;;  %v1487_v28 = vpop.permute.xlu0 %1486 }
 0x96a   :  { %v1435_v43 = vadd.f32 %v1433_v53, %v1429_v6  ;;  %v1489_v47 = vadd.f32 %v1487_v28, %v1483_v10  ;;  %v1505_v28 = vmul.f32 %v3516_v29, %v2733_v57  ;;  %v1509_v10 = vmul.f32 %v3529_v0, %v2976_v36 }
 0x96c   :  { %v1436_v13 = vsub.f32 %v1435_v43, %v2774_v26  ;;  %v1541_v1 = vand.u32 2147483647, %v1435_v43  ;;  %v1506_v52 = vsub.f32 %v2828_v9, %v1505_v28 }
 0x96d   :  { %v1493_v7 = vpop.permute.xlu1 %1492  ;;  %v1466_v16 = vpop.permute.xlu0 %1465 }
 0x96e   :  { %v1437_v62 = vmul.f32 1.02, %v1436_v13  ;;  %v1542_v35 = vmul.f32 %v2779_v30, %v1541_v1  ;;  %v1468_v41 = vadd.f32 %v1466_v16, %v1462_v44  ;;  %v1495_v17 = vadd.f32 %v1493_v7, %v1489_v47 }
 0x96f   :  { %v1508_v43 = vadd.f32 %v1507_v2, %v1506_v52  ;;  %v1511_v13 = vmul.f32 %v3545_v20, %v2982_v46  ;;  %v1513_v16 = vmul.f32 %v3555_v40, %v2707_v48 }
 0x970   :  { %v1469_v58 = vsub.f32 %v1468_v41, %v2777_v27  ;;  %v1548_v25 = vand.u32 2147483647, %v1468_v41  ;;  %1544 = vrot.lane.b32.xlu1 %v1542_v35, %s2566_s29  ;;  %v1438_v51 = vadd.f32 %v1437_v62, %v2774_v26 }
 0x971   :  { %v1499_v18 = vpop.permute.xlu0 %1498  ;;  %v1510_v44 = vadd.f32 %v1509_v10, %v1508_v43 }
 0x972   :  { %v1470_v63 = vmul.f32 1.02, %v1469_v58  ;;  %v1549_v11 = vmul.f32 %v2781_v31, %v1548_v25  ;;  %v1501_v34 = vadd.f32 %v1499_v18, %v1495_v17 }
 0x973   :  { %v1512_v1 = vadd.f32 %v1511_v13, %v1510_v44 }
 0x974   :  { %v1502_v45 = vsub.f32 %v1501_v34, %v2784_v33  ;;  %v1555_v39 = vand.u32 2147483647, %v1501_v34  ;;  %1519 = vrot.lane.b32.xlu1 %v1438_v51, %s2566_s29  ;;  %1551 = vrot.lane.b32.xlu0 %v1549_v11, %s2565_s2  ;;  %v1471_v7 = vadd.f32 %v1470_v63, %v2777_v27 }
 0x975   :  { %v1514_v62 = vadd.f32 %v1513_v16, %v1512_v1 }
 0x976   :  { %v1503_v6 = vmul.f32 1.02, %v1502_v45  ;;  %v1556_v53 = vmul.f32 %v2793_v37, %v1555_v39 }
 0x977   :  { %v1562_v41 = vand.u32 2147483647, %v1514_v62  ;;  %v1515_v25 = vsub.f32 %v1514_v62, %v2828_v9 }
 0x978   :  { %1524 = vrot.lane.b32.xlu0 %v1471_v7, %s2565_s2  ;;  %1558 = vrot.lane.b32.xlu1 %v1556_v53, %s2563_s28  ;;  %v1504_v35 = vadd.f32 %v1503_v6, %v2784_v33 }
 0x979   :  { %v1563_v63 = vmul.f32 %v2832_v14, %v1562_v41  ;;  %v1516_v45 = vmul.f32 1.02, %v1515_v25 }
 0x97b   :  { %v1517_v43 = vadd.f32 %v1516_v45, %v2828_v9 }
 0x97c   :  { %1530 = vrot.lane.b32.xlu0 %v1504_v35, %s2563_s28  ;;  %v1564_v35 = vsel %vm220_vm6, 1e+30, %v1563_v63 }
 0x97d   :  { %v1535_v41 = vsel %vm220_vm6, -1e+30, %v1517_v43 }
 0x9e2   :  { %v1545_v47 = vpop.permute.xlu1 %1544 }
 0x9e3   :  { %v1547_v18 = vsel %vm217_vm7, 1e+30, %v1545_v47 }
 0x9e6   :  { %v1520_v17 = vpop.permute.xlu1 %1519  ;;  %v1552_v58 = vpop.permute.xlu0 %1551 }
 0x9e7   :  { %v1554_v51 = vsel %vm218_vm4, 1e+30, %v1552_v58  ;;  %v1522_v2 = vsel %vm217_vm7, -1e+30, %v1520_v17 }
 0x9e8   :  { %vm1565_vm12 = vcmp.lt.f32.partialorder %v1554_v51, %v1547_v18 }
 0x9e9   :  { %v1566_v7 = vsel %vm1565_vm12, %v1554_v51, %v1547_v18  ;;  %v1567_v6 = vsel %vm1565_vm12, 1, %v4163_v21 }
 0x9ea   :  { %v1559_v11 = vpop.permute.xlu1 %1558  ;;  %v1525_v34 = vpop.permute.xlu0 %1524 }
 0x9eb   :  { %v1561_v39 = vsel %vm219_vm5, 1e+30, %v1559_v11  ;;  %v1527_v53 = vsel %vm218_vm4, -1e+30, %v1525_v34 }
 0x9ec   :  { %vm1568_vm13 = vcmp.lt.f32.partialorder %v1561_v39, %v1566_v7  ;;  %v1528_v13 = vmax.f32 %v1522_v2, %v1527_v53 }
 0x9ed   :  { %v1569_v28 = vsel %vm1568_vm13, %v1561_v39, %v1566_v7  ;;  %v1570_v52 = vsel %vm1568_vm13, 2, %v1567_v6 }
 0x9ee   :  { %vm1571_vm14 = vcmp.lt.f32.partialorder %v1564_v35, %v1569_v28  ;;  %v1531_v10 = vpop.permute.xlu0 %1530 }
 0x9ef   :  { %v1573_v44 = vsel %vm1571_vm14, 3, %v1570_v52  ;;  %v1533_v1 = vsel %vm219_vm5, -1e+30, %v1531_v10  ;;  %v1572_v17 = vsel %vm1571_vm14, %v1564_v35, %v1569_v28 }
 0x9f0   :  { %vm1575_vm15 = vcmp.eq.s32.totalorder %v1573_v44, 1  ;;  %vm1576_vm0 = vcmp.eq.s32.totalorder %v1573_v44, 2  ;;  %v1534_v62 = vmax.f32 %v1528_v13, %v1533_v1  ;;  %vm1577_vm1 = vcmp.eq.s32.totalorder %v1573_v44, 3 }
 0x9f1   :  { %v1578_v16 = vsel %vm1575_vm15, %v2830_v12, %v2824_v8  ;;  %v1581_v18 = vmax.f32 %v1572_v17, 0.0001  ;;  %vm1574_vm8 = vcmp.eq.s32.totalorder %v1573_v44, 0  ;;  %v4177_v17 = vld [vmem:[#allocation18_spill] sm:$0xff] }
 0x9f2   :  { %v1579_v47 = vsel %vm1576_vm0, %v2846_v38, %v1578_v16  ;;  %v1536_v58 = vmax.f32 %v1534_v62, %v1535_v41 }
 0x9f3   :  { %v1580_v25 = vsel %vm1577_vm1, %v2832_v14, %v1579_v47  ;;  %v4176_v47 = vld [vmem:[#allocation17_spill] sm:$0xff] }
 0x9f4   :  { %vm1537_vm2 = vcmp.gt.f32.partialorder %v1536_v58, 0.0  ;;  %v1582_v11 = vmul.f32 %v1581_v18, %v1580_v25 }
 0x9f5   :  { %v1538_v51 = vsel %vm1537_vm2, 1.0, %v4164_v24 }
 0x9f6   :  { %v3636_v63 = vadd.f32 %v1538_v51, %v3512_v49 }
 0x9f8   :  { %vm1540_vm3 = vcmp.lt.f32.partialorder %v3636_v63, 1.0 }
 0x9f9   :  { %v1583_v34 = vsel %vm1540_vm3, %v1582_v11, 0.0 }
 0x9fa   :  { %v1584_v45 = vsel %vm1574_vm8, %v1583_v34, 0.0  ;;  %v3640_v39 = vadd.f32 %v1583_v34, %v3516_v29  ;;  %v1586_v49 = vsel %vm1575_vm15, %v1583_v34, 0.0  ;;  %v1588_v2 = vsel %vm1576_vm0, %v1583_v34, 0.0 }
 0x9fb   :  { %v3643_v7 = vadd.f32 %v1584_v45, %v3519_v19  ;;  %v3653_v35 = vadd.f32 %v1586_v49, %v3529_v0  ;;  %v3669_v0 = vadd.f32 %v1588_v2, %v3545_v20  ;;  %v1590_v13 = vsel %vm1577_vm1, %v1583_v34, 0.0 }
 0x9fc   :  { %v1626_v6 = vmul.f32 %v3640_v39, %v2727_v55  ;;  %v1593_v53 = vmul.f32 %v3640_v39, %v2724_v54  ;;  %v1659_v29 = vmul.f32 %v3640_v39, %v2730_v56  ;;  %v3679_v1 = vadd.f32 %v1590_v13, %v3555_v40 }
 0x9fd   :  { %v1632_v19 = vmul.f32 %v3643_v7, %v2859_v50  ;;  %v1605_v28 = vmul.f32 %v3653_v35, %v2868_v61  ;;  %v1599_v52 = vmul.f32 %v3643_v7, %v2853_v42  ;;  %v1665_v43 = vmul.f32 %v3643_v7, %v2884_v4 }
 0x9fe   :  { %1628 = vrot.lane.b32.xlu0 %v1626_v6, %s2567_s30  ;;  %1595 = vrot.lane.b32.xlu1 %v1593_v53, %s2568_s6  ;;  %v1638_v10 = vmul.f32 %v3653_v35, %v2880_v3  ;;  %v1644_v16 = vmul.f32 %v3669_v0, %v2902_v59  ;;  %v1611_v20 = vmul.f32 %v3669_v0, %v2892_v15 }
 0x9ff   :  { %v1617_v44 = vmul.f32 %v3679_v1, %v2918_v23  ;;  %v1671_v62 = vmul.f32 %v3653_v35, %v2914_v22  ;;  %v1677_v40 = vmul.f32 %v3669_v0, %v4167_v5  ;;  %v1650_v41 = vmul.f32 %v3679_v1, %v4176_v47 }
 0xa00   :  { %v1683_v58 = vmul.f32 %v3679_v1, %v4177_v17 }
 0xa02   :  { %1661 = vrot.lane.b32.xlu1 %v1659_v29, %s2569_s7  ;;  %1634 = vrot.lane.b32.xlu0 %v1632_v19, %s2567_s30 }
 0xa06   :  { %1607 = vrot.lane.b32.xlu0 %v1605_v28, %s2568_s6  ;;  %1601 = vrot.lane.b32.xlu1 %v1599_v52, %s2568_s6 }
 0xa0a   :  { %1667 = vrot.lane.b32.xlu0 %v1665_v43, %s2569_s7  ;;  %1640 = vrot.lane.b32.xlu1 %v1638_v10, %s2567_s30 }
 0xa0e   :  { %1646 = vrot.lane.b32.xlu0 %v1644_v16, %s2567_s30  ;;  %1613 = vrot.lane.b32.xlu1 %v1611_v20, %s2568_s6 }
 0xa12   :  { %1619 = vrot.lane.b32.xlu0 %v1617_v44, %s2568_s6  ;;  %1673 = vrot.lane.b32.xlu1 %v1671_v62, %s2569_s7 }
 0xa16   :  { %1679 = vrot.lane.b32.xlu0 %v1677_v40, %s2569_s7  ;;  %1652 = vrot.lane.b32.xlu1 %v1650_v41, %s2567_s30 }
 0xa1a   :  { %1685 = vrot.lane.b32.xlu1 %v1683_v58, %s2569_s7 }
 0xa70   :  { %v1629_v25 = vpop.permute.xlu0 %1628  ;;  %v1596_v18 = vpop.permute.xlu1 %1595 }
 0xa71   :  { %v1598_v6 = vsub.f32 %v2774_v26, %v1596_v18  ;;  %v1631_v52 = vsub.f32 %v2777_v27, %v1629_v25 }
 0xa74   :  { %v1662_v51 = vpop.permute.xlu1 %1661  ;;  %v1635_v11 = vpop.permute.xlu0 %1634 }
 0xa75   :  { %v1637_v43 = vadd.f32 %v1635_v11, %v1631_v52  ;;  %v1664_v20 = vsub.f32 %v2784_v33, %v1662_v51 }
 0xa78   :  { %v1608_v34 = vpop.permute.xlu0 %1607  ;;  %v1602_v45 = vpop.permute.xlu1 %1601 }
 0xa79   :  { %v1604_v29 = vadd.f32 %v1602_v45, %v1598_v6 }
 0xa7b   :  { %v1610_v2 = vadd.f32 %v1608_v34, %v1604_v29 }
 0xa7c   :  { %v1668_v53 = vpop.permute.xlu0 %1667  ;;  %v1641_v49 = vpop.permute.xlu1 %1640 }
 0xa7d   :  { %v1643_v44 = vadd.f32 %v1641_v49, %v1637_v43  ;;  %v1670_v40 = vadd.f32 %v1668_v53, %v1664_v20 }
 0xa80   :  { %v1647_v19 = vpop.permute.xlu0 %1646  ;;  %v1614_v28 = vpop.permute.xlu1 %1613 }
 0xa81   :  { %v1616_v10 = vadd.f32 %v1614_v28, %v1610_v2  ;;  %v1649_v41 = vadd.f32 %v1647_v19, %v1643_v44  ;;  %v1694_v44 = vmul.f32 %v3643_v7, %v2969_v60 }
 0xa84   :  { %v1620_v13 = vpop.permute.xlu0 %1619  ;;  %v1674_v16 = vpop.permute.xlu1 %1673 }
 0xa85   :  { %v1622_v62 = vadd.f32 %v1620_v13, %v1616_v10  ;;  %v1676_v25 = vadd.f32 %v1674_v16, %v1670_v40  ;;  %v1692_v16 = vmul.f32 %v3640_v39, %v2733_v57  ;;  %v1696_v40 = vmul.f32 %v3653_v35, %v2976_v36 }
 0xa87   :  { %v1623_v58 = vsub.f32 %v1622_v62, %v2774_v26  ;;  %v1728_v18 = vand.u32 2147483647, %v1622_v62  ;;  %v1693_v20 = vsub.f32 %v2828_v9, %v1692_v16 }
 0xa88   :  { %v1680_v17 = vpop.permute.xlu0 %1679  ;;  %v1653_v45 = vpop.permute.xlu1 %1652 }
 0xa89   :  { %v1624_v6 = vmul.f32 1.02, %v1623_v58  ;;  %v1729_v47 = vmul.f32 %v2779_v30, %v1728_v18  ;;  %v1655_v34 = vadd.f32 %v1653_v45, %v1649_v41  ;;  %v1682_v11 = vadd.f32 %v1680_v17, %v1676_v25 }
 0xa8a   :  { %v1695_v62 = vadd.f32 %v1694_v44, %v1693_v20  ;;  %v1698_v58 = vmul.f32 %v3669_v0, %v2982_v46  ;;  %v1700_v45 = vmul.f32 %v3679_v1, %v2707_v48 }
 0xa8b   :  { %v1656_v29 = vsub.f32 %v1655_v34, %v2777_v27  ;;  %v1735_v28 = vand.u32 2147483647, %v1655_v34  ;;  %1731 = vrot.lane.b32.xlu0 %v1729_v47, %s2566_s29  ;;  %v1625_v53 = vadd.f32 %v1624_v6, %v2774_v26 }
 0xa8c   :  { %v1686_v51 = vpop.permute.xlu1 %1685  ;;  %v1697_v41 = vadd.f32 %v1696_v40, %v1695_v62 }
 0xa8d   :  { %v1657_v49 = vmul.f32 1.02, %v1656_v29  ;;  %v1736_v19 = vmul.f32 %v2781_v31, %v1735_v28  ;;  %v1688_v52 = vadd.f32 %v1686_v51, %v1682_v11 }
 0xa8e   :  { %v1699_v18 = vadd.f32 %v1698_v58, %v1697_v41 }
 0xa8f   :  { %v1689_v2 = vsub.f32 %v1688_v52, %v2784_v33  ;;  %v1742_v43 = vand.u32 2147483647, %v1688_v52  ;;  %1706 = vrot.lane.b32.xlu0 %v1625_v53, %s2566_s29  ;;  %1738 = vrot.lane.b32.xlu1 %v1736_v19, %s2565_s2  ;;  %v1658_v17 = vadd.f32 %v1657_v49, %v2777_v27 }
 0xa90   :  { %v1701_v6 = vadd.f32 %v1700_v45, %v1699_v18 }
 0xa91   :  { %v1690_v10 = vmul.f32 1.02, %v1689_v2  ;;  %v1743_v13 = vmul.f32 %v2793_v37, %v1742_v43 }
 0xa92   :  { %v1749_v34 = vand.u32 2147483647, %v1701_v6  ;;  %v1702_v28 = vsub.f32 %v1701_v6, %v2828_v9 }
 0xa93   :  { %1711 = vrot.lane.b32.xlu1 %v1658_v17, %s2565_s2  ;;  %1745 = vrot.lane.b32.xlu0 %v1743_v13, %s2563_s28  ;;  %v1691_v47 = vadd.f32 %v1690_v10, %v2784_v33 }
 0xa94   :  { %v1750_v49 = vmul.f32 %v2832_v14, %v1749_v34  ;;  %v1703_v2 = vmul.f32 1.02, %v1702_v28 }
 0xa96   :  { %v1704_v62 = vadd.f32 %v1703_v2, %v2828_v9 }
 0xa97   :  { %1717 = vrot.lane.b32.xlu1 %v1691_v47, %s2563_s28  ;;  %v1751_v47 = vsel %vm220_vm6, 1e+30, %v1750_v49 }
 0xa98   :  { %v1722_v34 = vsel %vm220_vm6, -1e+30, %v1704_v62 }
 0xafd   :  { %v1732_v25 = vpop.permute.xlu0 %1731 }
 0xafe   :  { %v1734_v51 = vsel %vm217_vm7, 1e+30, %v1732_v25 }
 0xb01   :  { %v1707_v11 = vpop.permute.xlu0 %1706  ;;  %v1739_v29 = vpop.permute.xlu1 %1738 }
 0xb02   :  { %v1741_v53 = vsel %vm218_vm4, 1e+30, %v1739_v29  ;;  %v1709_v44 = vsel %vm217_vm7, -1e+30, %v1707_v11 }
 0xb03   :  { %vm1752_vm9 = vcmp.lt.f32.partialorder %v1741_v53, %v1734_v51 }
 0xb04   :  { %v1753_v17 = vsel %vm1752_vm9, %v1741_v53, %v1734_v51  ;;  %v1754_v10 = vsel %vm1752_vm9, 1, %v4163_v21 }
 0xb05   :  { %v1746_v19 = vpop.permute.xlu0 %1745  ;;  %v1712_v52 = vpop.permute.xlu1 %1711 }
 0xb06   :  { %v1748_v43 = vsel %vm219_vm5, 1e+30, %v1746_v19  ;;  %v1714_v13 = vsel %vm218_vm4, -1e+30, %v1712_v52 }
 0xb07   :  { %vm1755_vm10 = vcmp.lt.f32.partialorder %v1748_v43, %v1753_v17  ;;  %v1715_v58 = vmax.f32 %v1709_v44, %v1714_v13 }
 0xb08   :  { %v1756_v16 = vsel %vm1755_vm10, %v1748_v43, %v1753_v17  ;;  %v1757_v20 = vsel %vm1755_vm10, 2, %v1754_v10 }
 0xb09   :  { %vm1758_vm11 = vcmp.lt.f32.partialorder %v1751_v47, %v1756_v16  ;;  %v1718_v40 = vpop.permute.xlu1 %1717 }
 0xb0a   :  { %v1760_v41 = vsel %vm1758_vm11, 3, %v1757_v20  ;;  %v1720_v18 = vsel %vm219_vm5, -1e+30, %v1718_v40  ;;  %v1759_v11 = vsel %vm1758_vm11, %v1751_v47, %v1756_v16 }
 0xb0b   :  { %vm1762_vm12 = vcmp.eq.s32.totalorder %v1760_v41, 1  ;;  %vm1763_vm13 = vcmp.eq.s32.totalorder %v1760_v41, 2  ;;  %v1721_v6 = vmax.f32 %v1715_v58, %v1720_v18  ;;  %vm1764_vm14 = vcmp.eq.s32.totalorder %v1760_v41, 3 }
 0xb0c   :  { %v1765_v45 = vsel %vm1762_vm12, %v2830_v12, %v2824_v8  ;;  %v1768_v51 = vmax.f32 %v1759_v11, 0.0001  ;;  %vm1761_vm1 = vcmp.eq.s32.totalorder %v1760_v41, 0  ;;  %v4179_v11 = vld [vmem:[#allocation18_spill] sm:$0xff] }
 0xb0d   :  { %v1766_v25 = vsel %vm1763_vm13, %v2846_v38, %v1765_v45  ;;  %v1723_v29 = vmax.f32 %v1721_v6, %v1722_v34 }
 0xb0e   :  { %v1767_v28 = vsel %vm1764_vm14, %v2832_v14, %v1766_v25  ;;  %v4178_v25 = vld [vmem:[#allocation17_spill] sm:$0xff] }
 0xb0f   :  { %vm1724_vm15 = vcmp.gt.f32.partialorder %v1723_v29, 0.0  ;;  %v1769_v19 = vmul.f32 %v1768_v51, %v1767_v28 }
 0xb10   :  { %v1725_v53 = vsel %vm1724_vm15, 1.0, %v4164_v24 }
 0xb11   :  { %v3760_v49 = vadd.f32 %v1725_v53, %v3636_v63 }
 0xb13   :  { %vm1727_vm0 = vcmp.lt.f32.partialorder %v3760_v49, 1.0 }
 0xb14   :  { %v1770_v52 = vsel %vm1727_vm0, %v1769_v19, 0.0 }
 0xb15   :  { %v1771_v2 = vsel %vm1761_vm1, %v1770_v52, 0.0  ;;  %v3764_v43 = vadd.f32 %v1770_v52, %v3640_v39  ;;  %v1773_v63 = vsel %vm1762_vm12, %v1770_v52, 0.0  ;;  %v1775_v44 = vsel %vm1763_vm13, %v1770_v52, 0.0 }
 0xb16   :  { %v3767_v17 = vadd.f32 %v1771_v2, %v3643_v7  ;;  %v3777_v47 = vadd.f32 %v1773_v63, %v3653_v35  ;;  %v3793_v35 = vadd.f32 %v1775_v44, %v3669_v0  ;;  %v1777_v58 = vsel %vm1764_vm14, %v1770_v52, 0.0 }
 0xb17   :  { %v1813_v10 = vmul.f32 %v3764_v43, %v2727_v55  ;;  %v1780_v13 = vmul.f32 %v3764_v43, %v2724_v54  ;;  %v1846_v39 = vmul.f32 %v3764_v43, %v2730_v56  ;;  %v3803_v18 = vadd.f32 %v1777_v58, %v3679_v1 }
 0xb18   :  { %v1819_v7 = vmul.f32 %v3767_v17, %v2859_v50  ;;  %v1792_v16 = vmul.f32 %v3777_v47, %v2868_v61  ;;  %v1786_v20 = vmul.f32 %v3767_v17, %v2853_v42  ;;  %v1852_v62 = vmul.f32 %v3767_v17, %v2884_v4 }
 0xb19   :  { %1815 = vrot.lane.b32.xlu1 %v1813_v10, %s2567_s30  ;;  %1782 = vrot.lane.b32.xlu0 %v1780_v13, %s2568_s6  ;;  %v1825_v40 = vmul.f32 %v3777_v47, %v2880_v3  ;;  %v1831_v45 = vmul.f32 %v3793_v35, %v2902_v59  ;;  %v1798_v0 = vmul.f32 %v3793_v35, %v2892_v15 }
 0xb1a   :  { %v1804_v41 = vmul.f32 %v3803_v18, %v2918_v23  ;;  %v1858_v6 = vmul.f32 %v3777_v47, %v2914_v22  ;;  %v1864_v1 = vmul.f32 %v3793_v35, %v4167_v5  ;;  %v1837_v34 = vmul.f32 %v3803_v18, %v4178_v25 }
 0xb1b   :  { %v1870_v29 = vmul.f32 %v3803_v18, %v4179_v11 }
 0xb1d   :  { %1848 = vrot.lane.b32.xlu0 %v1846_v39, %s2569_s7  ;;  %1821 = vrot.lane.b32.xlu1 %v1819_v7, %s2567_s30 }
 0xb21   :  { %1794 = vrot.lane.b32.xlu1 %v1792_v16, %s2568_s6  ;;  %1788 = vrot.lane.b32.xlu0 %v1786_v20, %s2568_s6 }
 0xb25   :  { %1854 = vrot.lane.b32.xlu1 %v1852_v62, %s2569_s7  ;;  %1827 = vrot.lane.b32.xlu0 %v1825_v40, %s2567_s30 }
 0xb29   :  { %1833 = vrot.lane.b32.xlu1 %v1831_v45, %s2567_s30  ;;  %1800 = vrot.lane.b32.xlu0 %v1798_v0, %s2568_s6 }
 0xb2d   :  { %1806 = vrot.lane.b32.xlu1 %v1804_v41, %s2568_s6  ;;  %1860 = vrot.lane.b32.xlu0 %v1858_v6, %s2569_s7 }
 0xb31   :  { %1866 = vrot.lane.b32.xlu1 %v1864_v1, %s2569_s7  ;;  %1839 = vrot.lane.b32.xlu0 %v1837_v34, %s2567_s30 }
 0xb35   :  { %1872 = vrot.lane.b32.xlu0 %v1870_v29, %s2569_s7 }
 0xb8b   :  { %v1816_v28 = vpop.permute.xlu1 %1815  ;;  %v1783_v51 = vpop.permute.xlu0 %1782 }
 0xb8c   :  { %v1785_v10 = vsub.f32 %v2774_v26, %v1783_v51  ;;  %v1818_v20 = vsub.f32 %v2777_v27, %v1816_v28 }
 0xb8f   :  { %v1849_v53 = vpop.permute.xlu0 %1848  ;;  %v1822_v19 = vpop.permute.xlu1 %1821 }
 0xb90   :  { %v1824_v62 = vadd.f32 %v1822_v19, %v1818_v20  ;;  %v1851_v0 = vsub.f32 %v2784_v33, %v1849_v53 }
 0xb93   :  { %v1795_v52 = vpop.permute.xlu1 %1794  ;;  %v1789_v2 = vpop.permute.xlu0 %1788 }
 0xb94   :  { %v1791_v39 = vadd.f32 %v1789_v2, %v1785_v10 }
 0xb96   :  { %v1797_v44 = vadd.f32 %v1795_v52, %v1791_v39 }
 0xb97   :  { %v1855_v13 = vpop.permute.xlu1 %1854  ;;  %v1828_v63 = vpop.permute.xlu0 %1827 }
 0xb98   :  { %v1830_v41 = vadd.f32 %v1828_v63, %v1824_v62  ;;  %v1857_v1 = vadd.f32 %v1855_v13, %v1851_v0 }
 0xb9b   :  { %v1834_v7 = vpop.permute.xlu1 %1833  ;;  %v1801_v16 = vpop.permute.xlu0 %1800 }
 0xb9c   :  { %v1803_v40 = vadd.f32 %v1801_v16, %v1797_v44  ;;  %v1836_v34 = vadd.f32 %v1834_v7, %v1830_v41  ;;  %v1881_v41 = vmul.f32 %v3767_v17, %v2969_v60 }
 0xb9f   :  { %v1807_v58 = vpop.permute.xlu1 %1806  ;;  %v1861_v45 = vpop.permute.xlu0 %1860 }
 0xba0   :  { %v1809_v6 = vadd.f32 %v1807_v58, %v1803_v40  ;;  %v1863_v28 = vadd.f32 %v1861_v45, %v1857_v1  ;;  %v1879_v45 = vmul.f32 %v3764_v43, %v2733_v57  ;;  %v1883_v1 = vmul.f32 %v3777_v47, %v2976_v36 }
 0xba2   :  { %v1810_v29 = vsub.f32 %v1809_v6, %v2774_v26  ;;  %v1915_v51 = vand.u32 2147483647, %v1809_v6  ;;  %v1880_v0 = vsub.f32 %v2828_v9, %v1879_v45 }
 0xba3   :  { %v1867_v11 = vpop.permute.xlu1 %1866  ;;  %v1840_v2 = vpop.permute.xlu0 %1839 }
 0xba4   :  { %v1811_v10 = vmul.f32 1.02, %v1810_v29  ;;  %v1916_v25 = vmul.f32 %v2779_v30, %v1915_v51  ;;  %v1842_v52 = vadd.f32 %v1840_v2, %v1836_v34  ;;  %v1869_v19 = vadd.f32 %v1867_v11, %v1863_v28 }
 0xba5   :  { %v1882_v6 = vadd.f32 %v1881_v41, %v1880_v0  ;;  %v1885_v29 = vmul.f32 %v3793_v35, %v2982_v46  ;;  %v1887_v2 = vmul.f32 %v3803_v18, %v2707_v48 }
 0xba6   :  { %v1843_v39 = vsub.f32 %v1842_v52, %v2777_v27  ;;  %v1922_v16 = vand.u32 2147483647, %v1842_v52  ;;  %1918 = vrot.lane.b32.xlu1 %v1916_v25, %s2566_s29  ;;  %v1812_v13 = vadd.f32 %v1811_v10, %v2774_v26 }
 0xba7   :  { %v1873_v53 = vpop.permute.xlu0 %1872  ;;  %v1884_v34 = vadd.f32 %v1883_v1, %v1882_v6 }
 0xba8   :  { %v1844_v63 = vmul.f32 1.02, %v1843_v39  ;;  %v1923_v7 = vmul.f32 %v2781_v31, %v1922_v16  ;;  %v1875_v20 = vadd.f32 %v1873_v53, %v1869_v19 }
 0xba9   :  { %v1886_v51 = vadd.f32 %v1885_v29, %v1884_v34 }
 0xbaa   :  { %v1876_v44 = vsub.f32 %v1875_v20, %v2784_v33  ;;  %v1929_v62 = vand.u32 2147483647, %v1875_v20  ;;  %1893 = vrot.lane.b32.xlu1 %v1812_v13, %s2566_s29  ;;  %1925 = vrot.lane.b32.xlu0 %v1923_v7, %s2565_s2  ;;  %v1845_v11 = vadd.f32 %v1844_v63, %v2777_v27 }
 0xbab   :  { %v1888_v10 = vadd.f32 %v1887_v2, %v1886_v51 }
 0xbac   :  { %v1877_v40 = vmul.f32 1.02, %v1876_v44  ;;  %v1930_v58 = vmul.f32 %v2793_v37, %v1929_v62 }
 0xbad   :  { %v1936_v52 = vand.u32 2147483647, %v1888_v10  ;;  %v1889_v16 = vsub.f32 %v1888_v10, %v2828_v9 }
 0xbae   :  { %1898 = vrot.lane.b32.xlu0 %v1845_v11, %s2565_s2  ;;  %1932 = vrot.lane.b32.xlu1 %v1930_v58, %s2563_s28  ;;  %v1878_v25 = vadd.f32 %v1877_v40, %v2784_v33 }
 0xbaf   :  { %v1937_v63 = vmul.f32 %v2832_v14, %v1936_v52  ;;  %v1890_v44 = vmul.f32 1.02, %v1889_v16 }
 0xbb1   :  { %v1891_v6 = vadd.f32 %v1890_v44, %v2828_v9 }
 0xbb2   :  { %1904 = vrot.lane.b32.xlu0 %v1878_v25, %s2563_s28  ;;  %v1938_v25 = vsel %vm220_vm6, 1e+30, %v1937_v63 }
 0xbb3   :  { %v1909_v52 = vsel %vm220_vm6, -1e+30, %v1891_v6 }
 0xc18   :  { %v1919_v28 = vpop.permute.xlu1 %1918 }
 0xc19   :  { %v1921_v53 = vsel %vm217_vm7, 1e+30, %v1919_v28 }
 0xc1c   :  { %v1894_v19 = vpop.permute.xlu1 %1893  ;;  %v1926_v39 = vpop.permute.xlu0 %1925 }
 0xc1d   :  { %v1928_v13 = vsel %vm218_vm4, 1e+30, %v1926_v39  ;;  %v1896_v41 = vsel %vm217_vm7, -1e+30, %v1894_v19 }
 0xc1e   :  { %vm1939_vm2 = vcmp.lt.f32.partialorder %v1928_v13, %v1921_v53 }
 0xc1f   :  { %v1940_v11 = vsel %vm1939_vm2, %v1928_v13, %v1921_v53  ;;  %v1941_v40 = vsel %vm1939_vm2, 1, %v4163_v21 }
 0xc20   :  { %v1933_v7 = vpop.permute.xlu1 %1932  ;;  %v1899_v20 = vpop.permute.xlu0 %1898 }
 0xc21   :  { %v1935_v62 = vsel %vm219_vm5, 1e+30, %v1933_v7  ;;  %v1901_v58 = vsel %vm218_vm4, -1e+30, %v1899_v20 }
 0xc22   :  { %vm1942_vm3 = vcmp.lt.f32.partialorder %v1935_v62, %v1940_v11  ;;  %v1902_v29 = vmax.f32 %v1896_v41, %v1901_v58 }
 0xc23   :  { %v1943_v45 = vsel %vm1942_vm3, %v1935_v62, %v1940_v11  ;;  %v1944_v0 = vsel %vm1942_vm3, 2, %v1941_v40 }
 0xc24   :  { %vm1945_vm8 = vcmp.lt.f32.partialorder %v1938_v25, %v1943_v45  ;;  %v1905_v1 = vpop.permute.xlu0 %1904 }
 0xc25   :  { %v1947_v34 = vsel %vm1945_vm8, 3, %v1944_v0  ;;  %v1907_v51 = vsel %vm219_vm5, -1e+30, %v1905_v1  ;;  %v1946_v19 = vsel %vm1945_vm8, %v1938_v25, %v1943_v45 }
 0xc26   :  { %vm1949_vm9 = vcmp.eq.s32.totalorder %v1947_v34, 1  ;;  %vm1950_vm10 = vcmp.eq.s32.totalorder %v1947_v34, 2  ;;  %v1908_v10 = vmax.f32 %v1902_v29, %v1907_v51  ;;  %vm1951_vm11 = vcmp.eq.s32.totalorder %v1947_v34, 3 }
 0xc27   :  { %v1952_v2 = vsel %vm1949_vm9, %v2830_v12, %v2824_v8  ;;  %v1955_v53 = vmax.f32 %v1946_v19, 0.0001  ;;  %vm1948_vm14 = vcmp.eq.s32.totalorder %v1947_v34, 0  ;;  %v4181_v19 = vld [vmem:[#allocation18_spill] sm:$0xff] }
 0xc28   :  { %v1953_v28 = vsel %vm1950_vm10, %v2846_v38, %v1952_v2  ;;  %v1910_v39 = vmax.f32 %v1908_v10, %v1909_v52 }
 0xc29   :  { %v1954_v16 = vsel %vm1951_vm11, %v2832_v14, %v1953_v28  ;;  %v4180_v28 = vld [vmem:[#allocation17_spill] sm:$0xff] }
 0xc2a   :  { %vm1911_vm12 = vcmp.gt.f32.partialorder %v1910_v39, 0.0  ;;  %v1956_v7 = vmul.f32 %v1955_v53, %v1954_v16 }
 0xc2b   :  { %v1912_v13 = vsel %vm1911_vm12, 1.0, %v4164_v24 }
 0xc2c   :  { %v3884_v63 = vadd.f32 %v1912_v13, %v3760_v49 }
 0xc2e   :  { %vm1914_vm13 = vcmp.lt.f32.partialorder %v3884_v63, 1.0 }
 0xc2f   :  { %v1957_v20 = vsel %vm1914_vm13, %v1956_v7, 0.0 }
 0xc30   :  { %v1958_v44 = vsel %vm1948_vm14, %v1957_v20, 0.0  ;;  %v3888_v62 = vadd.f32 %v1957_v20, %v3764_v43  ;;  %v1960_v49 = vsel %vm1949_vm9, %v1957_v20, 0.0  ;;  %v1962_v41 = vsel %vm1950_vm10, %v1957_v20, 0.0 }
 0xc31   :  { %v3891_v11 = vadd.f32 %v1958_v44, %v3767_v17  ;;  %v3901_v25 = vadd.f32 %v1960_v49, %v3777_v47  ;;  %v3917_v47 = vadd.f32 %v1962_v41, %v3793_v35  ;;  %v1964_v29 = vsel %vm1951_vm11, %v1957_v20, 0.0 }
 0xc32   :  { %v2000_v40 = vmul.f32 %v3888_v62, %v2727_v55  ;;  %v1967_v58 = vmul.f32 %v3888_v62, %v2724_v54  ;;  %v2033_v43 = vmul.f32 %v3888_v62, %v2730_v56  ;;  %v3927_v51 = vadd.f32 %v1964_v29, %v3803_v18 }
 0xc33   :  { %v2006_v17 = vmul.f32 %v3891_v11, %v2859_v50  ;;  %v1979_v45 = vmul.f32 %v3901_v25, %v2868_v61  ;;  %v1973_v0 = vmul.f32 %v3891_v11, %v2853_v42  ;;  %v2039_v6 = vmul.f32 %v3891_v11, %v2884_v4 }
 0xc34   :  { %2002 = vrot.lane.b32.xlu0 %v2000_v40, %s2567_s30  ;;  %1969 = vrot.lane.b32.xlu1 %v1967_v58, %s2568_s6  ;;  %v2012_v1 = vmul.f32 %v3901_v25, %v2880_v3  ;;  %v2018_v2 = vmul.f32 %v3917_v47, %v2902_v59  ;;  %v1985_v35 = vmul.f32 %v3917_v47, %v2892_v15 }
 0xc35   :  { %v1991_v34 = vmul.f32 %v3927_v51, %v2918_v23  ;;  %v2045_v10 = vmul.f32 %v3901_v25, %v2914_v22  ;;  %v2051_v18 = vmul.f32 %v3917_v47, %v4167_v5  ;;  %v2024_v52 = vmul.f32 %v3927_v51, %v4180_v28 }
 0xc36   :  { %v2057_v39 = vmul.f32 %v3927_v51, %v4181_v19 }
 0xc38   :  { %2035 = vrot.lane.b32.xlu1 %v2033_v43, %s2569_s7  ;;  %2008 = vrot.lane.b32.xlu0 %v2006_v17, %s2567_s30 }
 0xc3c   :  { %1981 = vrot.lane.b32.xlu0 %v1979_v45, %s2568_s6  ;;  %1975 = vrot.lane.b32.xlu1 %v1973_v0, %s2568_s6 }
 0xc40   :  { %2041 = vrot.lane.b32.xlu0 %v2039_v6, %s2569_s7  ;;  %2014 = vrot.lane.b32.xlu1 %v2012_v1, %s2567_s30 }
 0xc44   :  { %2020 = vrot.lane.b32.xlu0 %v2018_v2, %s2567_s30  ;;  %1987 = vrot.lane.b32.xlu1 %v1985_v35, %s2568_s6 }
 0xc48   :  { %1993 = vrot.lane.b32.xlu0 %v1991_v34, %s2568_s6  ;;  %2047 = vrot.lane.b32.xlu1 %v2045_v10, %s2569_s7 }
 0xc4c   :  { %2053 = vrot.lane.b32.xlu0 %v2051_v18, %s2569_s7  ;;  %2026 = vrot.lane.b32.xlu1 %v2024_v52, %s2567_s30 }
 0xc50   :  { %2059 = vrot.lane.b32.xlu1 %v2057_v39, %s2569_s7 }
 0xca6   :  { %v2003_v16 = vpop.permute.xlu0 %2002  ;;  %v1970_v53 = vpop.permute.xlu1 %1969 }
 0xca7   :  { %v1972_v40 = vsub.f32 %v2774_v26, %v1970_v53  ;;  %v2005_v0 = vsub.f32 %v2777_v27, %v2003_v16 }
 0xcaa   :  { %v2036_v13 = vpop.permute.xlu1 %2035  ;;  %v2009_v7 = vpop.permute.xlu0 %2008 }
 0xcab   :  { %v2011_v6 = vadd.f32 %v2009_v7, %v2005_v0  ;;  %v2038_v35 = vsub.f32 %v2784_v33, %v2036_v13 }
 0xcae   :  { %v1982_v20 = vpop.permute.xlu0 %1981  ;;  %v1976_v44 = vpop.permute.xlu1 %1975 }
 0xcaf   :  { %v1978_v43 = vadd.f32 %v1976_v44, %v1972_v40 }
 0xcb1   :  { %v1984_v41 = vadd.f32 %v1982_v20, %v1978_v43 }
 0xcb2   :  { %v2042_v58 = vpop.permute.xlu0 %2041  ;;  %v2015_v49 = vpop.permute.xlu1 %2014 }
 0xcb3   :  { %v2017_v34 = vadd.f32 %v2015_v49, %v2011_v6  ;;  %v2044_v18 = vadd.f32 %v2042_v58, %v2038_v35 }
 0xcb6   :  { %v2021_v17 = vpop.permute.xlu0 %2020  ;;  %v1988_v45 = vpop.permute.xlu1 %1987 }
 0xcb7   :  { %v1990_v1 = vadd.f32 %v1988_v45, %v1984_v41  ;;  %v2023_v52 = vadd.f32 %v2021_v17, %v2017_v34 }
 0xcba   :  { %v1994_v29 = vpop.permute.xlu0 %1993  ;;  %v2048_v2 = vpop.permute.xlu1 %2047 }
 0xcbb   :  { %v1996_v10 = vadd.f32 %v1994_v29, %v1990_v1  ;;  %v2050_v16 = vadd.f32 %v2048_v2, %v2044_v18  ;;  %v2068_v2 = vmul.f32 %v3891_v11, %v2969_v60 }
 0xcbd   :  { %v1997_v39 = vsub.f32 %v1996_v10, %v2774_v26  ;;  %v2102_v53 = vand.u32 2147483647, %v1996_v10  ;;  %v2072_v10 = vmul.f32 %v3917_v47, %v2982_v46 }
 0xcbe   :  { %v2054_v5 = vpop.permute.xlu0 %2053  ;;  %v2027_v44 = vpop.permute.xlu1 %2026 }
 0xcbf   :  { %v1998_v40 = vmul.f32 1.02, %v1997_v39  ;;  %v2103_v4 = vmul.f32 %v2779_v30, %v2102_v53  ;;  %v2029_v20 = vadd.f32 %v2027_v44, %v2023_v52  ;;  %v2056_v7 = vadd.f32 %v2054_v5, %v2050_v16 }
 0xcc0   :  { %v2074_v52 = vmul.f32 %v3927_v51, %v2707_v48 }
 0xcc1   :  { %v2030_v43 = vsub.f32 %v2029_v20, %v2777_v27  ;;  %v2109_v45 = vand.u32 2147483647, %v2029_v20  ;;  %2105 = vrot.lane.b32.xlu0 %v2103_v4, %s2566_s29  ;;  %v1999_v58 = vadd.f32 %v1998_v40, %v2774_v26 }
 0xcc2   :  { %v2060_v13 = vpop.permute.xlu1 %2059 }
 0xcc3   :  { %v2031_v49 = vmul.f32 1.02, %v2030_v43  ;;  %v2110_v17 = vmul.f32 %v2781_v31, %v2109_v45  ;;  %v2062_v0 = vadd.f32 %v2060_v13, %v2056_v7  ;;  %v2066_v31 = vmul.f32 %v3888_v62, %v2733_v57 }
 0xcc5   :  { %v2063_v41 = vsub.f32 %v2062_v0, %v2784_v33  ;;  %v2116_v6 = vand.u32 2147483647, %v2062_v0  ;;  %2080 = vrot.lane.b32.xlu0 %v1999_v58, %s2566_s29  ;;  %2112 = vrot.lane.b32.xlu1 %v2110_v17, %s2565_s2  ;;  %v2032_v30 = vadd.f32 %v2031_v49, %v2777_v27  ;;  %v2067_v29 = vsub.f32 %v2828_v9, %v2066_v31 }
 0xcc7   :  { %v2064_v5 = vmul.f32 1.02, %v2063_v41  ;;  %v2117_v1 = vmul.f32 %v2793_v37, %v2116_v6  ;;  %v2069_v35 = vadd.f32 %v2068_v2, %v2067_v29  ;;  %v2070_v37 = vmul.f32 %v3901_v25, %v2976_v36 }
 0xcc9   :  { %2085 = vrot.lane.b32.xlu1 %v2032_v30, %s2565_s2  ;;  %2119 = vrot.lane.b32.xlu0 %v2117_v1, %s2563_s28  ;;  %v2065_v4 = vadd.f32 %v2064_v5, %v2784_v33  ;;  %v2071_v34 = vadd.f32 %v2070_v37, %v2069_v35 }
 0xccb   :  { %v2073_v18 = vadd.f32 %v2072_v10, %v2071_v34 }
 0xccd   :  { %2091 = vrot.lane.b32.xlu1 %v2065_v4, %s2563_s28  ;;  %v2075_v39 = vadd.f32 %v2074_v52, %v2073_v18 }
 0xccf   :  { %v2123_v44 = vand.u32 2147483647, %v2075_v39  ;;  %v2076_v20 = vsub.f32 %v2075_v39, %v2828_v9 }
 0xcd1   :  { %v2124_v45 = vmul.f32 %v2832_v14, %v2123_v44  ;;  %v2077_v49 = vmul.f32 1.02, %v2076_v20 }
 0xcd3   :  { %v2125_v30 = vsel %vm220_vm6, 1e+30, %v2124_v45  ;;  %v2078_v31 = vadd.f32 %v2077_v49, %v2828_v9 }
 0xcd5   :  { %v2096_v52 = vsel %vm220_vm6, -1e+30, %v2078_v31 }
 0xd33   :  { %v2106_v53 = vpop.permute.xlu0 %2105 }
 0xd34   :  { %v2108_v7 = vsel %vm217_vm7, 1e+30, %v2106_v53 }
 0xd37   :  { %v2081_v40 = vpop.permute.xlu0 %2080  ;;  %v2113_v16 = vpop.permute.xlu1 %2112 }
 0xd38   :  { %v2115_v43 = vsel %vm218_vm4, 1e+30, %v2113_v16  ;;  %v2083_v4 = vsel %vm217_vm7, -1e+30, %v2081_v40 }
 0xd39   :  { %vm2126_vm15 = vcmp.lt.f32.partialorder %v2115_v43, %v2108_v7 }
 0xd3a   :  { %v2127_v0 = vsel %vm2126_vm15, %v2115_v43, %v2108_v7  ;;  %v2128_v41 = vsel %vm2126_vm15, 1, %v4163_v21 }
 0xd3b   :  { %v2120_v13 = vpop.permute.xlu0 %2119  ;;  %v2086_v58 = vpop.permute.xlu1 %2085 }
 0xd3c   :  { %v2122_v17 = vsel %vm219_vm5, 1e+30, %v2120_v13  ;;  %v2088_v6 = vsel %vm218_vm4, -1e+30, %v2086_v58 }
 0xd3d   :  { %vm2129_vm0 = vcmp.lt.f32.partialorder %v2122_v17, %v2127_v0  ;;  %v2089_v35 = vmax.f32 %v2083_v4, %v2088_v6 }
 0xd3e   :  { %v2130_v5 = vsel %vm2129_vm0, %v2122_v17, %v2127_v0  ;;  %v2131_v1 = vsel %vm2129_vm0, 2, %v2128_v41 }
 0xd3f   :  { %vm2132_vm1 = vcmp.lt.f32.partialorder %v2125_v30, %v2130_v5  ;;  %v2092_v29 = vpop.permute.xlu1 %2091 }
 0xd40   :  { %v2134_v2 = vsel %vm2132_vm1, 3, %v2131_v1  ;;  %v2094_v37 = vsel %vm219_vm5, -1e+30, %v2092_v29  ;;  %v2133_v39 = vsel %vm2132_vm1, %v2125_v30, %v2130_v5  ;;  %v4183_v29 = vld [vmem:[#allocation16_spill] sm:$0xff] }
 0xd41   :  { %vm2136_vm2 = vcmp.eq.s32.totalorder %v2134_v2, 1  ;;  %vm2137_vm3 = vcmp.eq.s32.totalorder %v2134_v2, 2  ;;  %v2095_v10 = vmax.f32 %v2089_v35, %v2094_v37  ;;  %vm2138_vm7 = vcmp.eq.s32.totalorder %v2134_v2, 3 }
 0xd42   :  { %v2139_v34 = vsel %vm2136_vm2, %v2830_v12, %v2824_v8  ;;  %v2142_v40 = vmax.f32 %v2133_v39, 0.0001  ;;  %vm2135_vm10 = vcmp.eq.s32.totalorder %v2134_v2, 0 }
 0xd43   :  { %v2140_v18 = vsel %vm2137_vm3, %v2846_v38, %v2139_v34  ;;  %v2097_v53 = vmax.f32 %v2095_v10, %v2096_v52 }
 0xd44   :  { %v2141_v44 = vsel %vm2138_vm7, %v2832_v14, %v2140_v18 }
 0xd45   :  { %vm2098_vm8 = vcmp.gt.f32.partialorder %v2097_v53, 0.0  ;;  %v2143_v8 = vmul.f32 %v2142_v40, %v2141_v44 }
 0xd46   :  { %v2099_v16 = vsel %vm2098_vm8, 1.0, %v4164_v24 }
 0xd47   :  { %v2100_v20 = vadd.f32 %v2099_v16, %v3884_v63  ;;  %v2570_v16 = vmov 3  }
 0xd48   :  { %2458 = vset.pattern.permute.xlu0 %v2570_v16  ;;  %2457 = vset.pattern.permute.xlu1 %v2570_v16 }
 0xd49   :  { %vm2101_vm9 = vcmp.lt.f32.partialorder %v2100_v20, 1.0 }
 0xd4a   :  { %v2144_v12 = vsel %vm2101_vm9, %v2143_v8, 0.0 }
 0xd4b   :  { %v2145_v38 = vsel %vm2135_vm10, %v2144_v12, 0.0  ;;  %v2149_v7 = vsel %vm2137_vm3, %v2144_v12, 0.0  ;;  %v2147_v45 = vsel %vm2136_vm2, %v2144_v12, 0.0  ;;  %v4014_v14 = vadd.f32 %v2144_v12, %v3888_v62 }
 0xd4c   :  { %v4010_v43 = vadd.f32 %v2145_v38, %v3891_v11  ;;  %v4017_v13 = vadd.f32 %v2149_v7, %v3917_v47  ;;  %v4022_v63 = vadd.f32 %v2147_v45, %v3901_v25  ;;  %v2151_v11 = vsel %vm2138_vm7, %v2144_v12, 0.0 }
 0xd4d   :  { %v2154_v58 = vmul.f32 %v4014_v14, %v2724_v54  ;;  %v4032_v47 = vadd.f32 %v2151_v11, %v3927_v51  ;;  %v2187_v54 = vmul.f32 %v4014_v14, %v2727_v55 }
 0xd4e   :  { %v2160_v24 = vmul.f32 %v4010_v43, %v2853_v42  ;;  %v2172_v62 = vmul.f32 %v4017_v13, %v2892_v15  ;;  %v2166_v42 = vmul.f32 %v4022_v63, %v2868_v61  ;;  %v2199_v15 = vmul.f32 %v4022_v63, %v2880_v3 }
 0xd4f   :  { %2156 = vrot.lane.b32.xlu0 %v2154_v58, %s2568_s6  ;;  %v2178_v25 = vmul.f32 %v4032_v47, %v2918_v23  ;;  %v2193_v61 = vmul.f32 %v4010_v43, %v2859_v50  ;;  %v2211_v55 = vmul.f32 %v4032_v47, %v4180_v28  ;;  %v2205_v23 = vmul.f32 %v4017_v13, %v2902_v59 }
 0xd50   :  { %2162 = vrot.lane.b32.xlu1 %v2160_v24, %s2568_s6  ;;  %v2220_v3 = vmul.f32 %v4014_v14, %v2730_v56  ;;  %v2232_v50 = vmul.f32 %v4022_v63, %v2914_v22  ;;  %v2244_v51 = vmul.f32 %v4032_v47, %v4181_v19  ;;  %v4182_v19 = vld [vmem:[#allocation15_spill] sm:$0xff]  ;;  %v2238_v2 = vmul.f32 %v4017_v13, %v4183_v29 }
 0xd51   :  { %v2226_v31 = vmul.f32 %v4010_v43, %v4182_v19 }
 0xd53   :  { %2168 = vrot.lane.b32.xlu0 %v2166_v42, %s2568_s6 }
 0xd54   :  { %2174 = vrot.lane.b32.xlu1 %v2172_v62, %s2568_s6 }
 0xd57   :  { %2180 = vrot.lane.b32.xlu0 %v2178_v25, %s2568_s6 }
 0xd58   :  { %2189 = vrot.lane.b32.xlu1 %v2187_v54, %s2567_s30 }
 0xd5b   :  { %2195 = vrot.lane.b32.xlu0 %v2193_v61, %s2567_s30 }
 0xd5c   :  { %2201 = vrot.lane.b32.xlu1 %v2199_v15, %s2567_s30 }
 0xd5f   :  { %2207 = vrot.lane.b32.xlu0 %v2205_v23, %s2567_s30 }
 0xd60   :  { %2213 = vrot.lane.b32.xlu1 %v2211_v55, %s2567_s30 }
 0xd64   :  { %2222 = vrot.lane.b32.xlu1 %v2220_v3, %s2569_s7 }
 0xd68   :  { %2234 = vrot.lane.b32.xlu1 %v2232_v50, %s2569_s7 }
 0xd6c   :  { %2246 = vrot.lane.b32.xlu1 %v2244_v51, %s2569_s7 }
 0xdc1   :  { %v2157_v28 = vpop.permute.xlu0 %2156 }
 0xdc2   :  { %v2163_v59 = vpop.permute.xlu1 %2162  ;;  %v2159_v49 = vsub.f32 %v2774_v26, %v2157_v28  ;;  %v2327_v28 = vsel %vm219_vm5, 1, %v4163_v21 }
 0xdc4   :  { %v2165_v17 = vadd.f32 %v2163_v59, %v2159_v49  ;;  %v2315_v49 = vsel %vm218_vm4, 1, %v4163_v21 }
 0xdc5   :  { %v2169_v0 = vpop.permute.xlu0 %2168 }
 0xdc6   :  { %v2175_v41 = vpop.permute.xlu1 %2174  ;;  %v2171_v56 = vadd.f32 %v2169_v0, %v2165_v17  ;;  %v2255_v0 = vmul.f32 %v4010_v43, %v2969_v60 }
 0xdc8   :  { %v2177_v6 = vadd.f32 %v2175_v41, %v2171_v56  ;;  %v2257_v56 = vmul.f32 %v4022_v63, %v2976_v36 }
 0xdc9   :  { %v2181_v30 = vpop.permute.xlu0 %2180 }
 0xdca   :  { %v2183_v5 = vadd.f32 %v2181_v30, %v2177_v6  ;;  %v2190_v35 = vpop.permute.xlu1 %2189  ;;  %v2259_v30 = vmul.f32 %v4017_v13, %v2982_v46 }
 0xdcb   :  { %v2192_v37 = vsub.f32 %v2777_v27, %v2190_v35 }
 0xdcc   :  { %v2184_v22 = vsub.f32 %v2183_v5, %v2774_v26 }
 0xdcd   :  { %v2196_v34 = vpop.permute.xlu0 %2195 }
 0xdce   :  { %v2185_v1 = vmul.f32 1.02, %v2184_v22  ;;  %v2198_v10 = vadd.f32 %v2196_v34, %v2192_v37  ;;  %v2202_v18 = vpop.permute.xlu1 %2201  ;;  %v2261_v22 = vmul.f32 %v4032_v47, %v2707_v48  ;;  %v2469_v34 = vld [vmem:[#allocation5] sm:$0xf] }
 0xdd0   :  { %v2186_v4 = vadd.f32 %v2185_v1, %v2774_v26  ;;  %v2204_v52 = vadd.f32 %v2202_v18, %v2198_v10  ;;  %v4184_v10 = vld [vmem:[#allocation14_spill] sm:$0xff] }
 0xdd1   :  { %v2208_v26 = vpop.permute.xlu0 %2207 }
 0xdd2   :  { %2267 = vrot.lane.b32.xlu0 %v2186_v4, %s2563_s28  ;;  %v2210_v39 = vadd.f32 %v2208_v26, %v2204_v52  ;;  %v2214_v53 = vpop.permute.xlu1 %2213  ;;  %v4186_v52 = vsub.s32 1, %v4184_v10 }
 0xdd4   :  { %v2216_v44 = vadd.f32 %v2214_v53, %v2210_v39 }
 0xdd6   :  { %2228 = vrot.lane.b32.xlu0 %v2226_v31, %s2569_s7  ;;  %v2217_v40 = vsub.f32 %v2216_v44, %v2777_v27  ;;  %v2223_v45 = vpop.permute.xlu1 %2222 }
 0xdd7   :  { %v2225_v58 = vsub.f32 %v2784_v33, %v2223_v45 }
 0xdd8   :  { %v2218_v20 = vmul.f32 1.02, %v2217_v40 }
 0xdda   :  { %2240 = vrot.lane.b32.xlu0 %v2238_v2, %s2569_s7  ;;  %v2219_v8 = vadd.f32 %v2218_v20, %v2777_v27  ;;  %v2235_v62 = vpop.permute.xlu1 %2234  ;;  %v2339_v2 = vsel %vm220_vm6, 1, %v4163_v21 }
 0xdde   :  { %v2247_v15 = vpop.permute.xlu1 %2246 }
 0xe44   :  { %v2268_v12 = vpop.permute.xlu0 %2267 }
 0xe45   :  { %vm2270_vm11 = vcmp.gt.f32.partialorder %v2219_v8, %v2268_v12 }
 0xe46   :  { %v2271_v38 = vsel %vm2270_vm11, %v2219_v8, %v2268_v12  ;;  %v2272_v7 = vsel %vm2270_vm11, 1, %v4163_v21 }
 0xe47   :  { %2279 = vrot.lane.b32.xlu1 %v2272_v7, %s2563_s28  ;;  %2274 = vrot.lane.b32.xlu0 %v2271_v38, %s2563_s28 }
 0xe48   :  { %v2229_v24 = vpop.permute.xlu0 %2228 }
 0xe49   :  { %v2231_v11 = vadd.f32 %v2229_v24, %v2225_v58 }
 0xe4b   :  { %v2237_v42 = vadd.f32 %v2235_v62, %v2231_v11 }
 0xe4c   :  { %v2241_v54 = vpop.permute.xlu0 %2240 }
 0xe4d   :  { %v2243_v25 = vadd.f32 %v2241_v54, %v2237_v42 }
 0xe4f   :  { %v2249_v27 = vadd.f32 %v2247_v15, %v2243_v25 }
 0xe51   :  { %v2250_v61 = vsub.f32 %v2249_v27, %v2784_v33 }
 0xe53   :  { %v2251_v55 = vmul.f32 1.02, %v2250_v61 }
 0xe55   :  { %v2252_v23 = vadd.f32 %v2251_v55, %v2784_v33  ;;  %v2253_v33 = vmul.f32 %v4014_v14, %v2733_v57 }
 0xe57   :  { %v2254_v17 = vsub.f32 %v2828_v9, %v2253_v33 }
 0xe59   :  { %v2256_v41 = vadd.f32 %v2255_v0, %v2254_v17 }
 0xe5b   :  { %v2258_v6 = vadd.f32 %v2257_v56, %v2256_v41 }
 0xe5d   :  { %v2260_v5 = vadd.f32 %v2259_v30, %v2258_v6 }
 0xe5f   :  { %v2262_v1 = vadd.f32 %v2261_v22, %v2260_v5 }
 0xe61   :  { %v2263_v57 = vsub.f32 %v2262_v1, %v2828_v9 }
 0xe63   :  { %v2264_v4 = vmul.f32 1.02, %v2263_v57 }
 0xe65   :  { %v2265_v19 = vadd.f32 %v2264_v4, %v2828_v9  ;;  %v2352_v9 = vsub.f32 0.0, %v4014_v14  ;;  %v2300_v14 = vrot.slane %v2469_v34, %v4186_v52 }
 0xeb9   :  { %v2275_v3 = vpop.permute.xlu0 %2274  ;;  %v2280_v50 = vpop.permute.xlu1 %2279 }
 0xeba   :  { %vm2277_vm12 = vcmp.gt.f32.partialorder %v2252_v23, %v2275_v3 }
 0xebb   :  { %v2281_v51 = vsel %vm2277_vm12, 2, %v2280_v50  ;;  %v2278_v59 = vsel %vm2277_vm12, %v2252_v23, %v2275_v3 }
 0xebc   :  { %2283 = vrot.lane.b32.xlu0 %v2278_v59, %s2563_s28  ;;  %2287 = vrot.lane.b32.xlu1 %v2281_v51, %s2563_s28  ;;  %v2470_v59 = vld [vmem:[#allocation2] sm:$0xff] }
 0xec0   :  { %2329 = vperm.xlu0 %2458, %v2327_v28   ;;  %2317 = vperm.xlu1 %2457, %v2315_v49  }
 0xf2e   :  { %v2284_v31 = vpop.permute.xlu0 %2283  ;;  %v2288_v60 = vpop.permute.xlu1 %2287 }
 0xf2f   :  { %vm2286_vm4 = vcmp.gt.f32.partialorder %v2265_v19, %v2284_v31 }
 0xf30   :  { %v2289_v29 = vsel %vm2286_vm4, 3, %v2288_v60 }
 0xf31   :  { %vm2290_vm5 = vcmp.eq.s32.totalorder %v2289_v29, 1  ;;  %vm2291_vm13 = vcmp.eq.s32.totalorder %v2289_v29, 2  ;;  %vm2292_vm14 = vcmp.eq.s32.totalorder %v2289_v29, 3 }
 0xf32   :  { %v2321_v36 = vsel %vm2291_vm13, 1, %v4163_v21  ;;  %v2309_v46 = vsel %vm2290_vm5, 1, %v4163_v21  ;;  %v2333_v48 = vsel %vm2292_vm14, 1, %v4163_v21  ;;  %v4185_v21 = vsub.s32 0, %v4184_v10 }
 0xf33   :  { %2323 = vperm.xlu1 %2457, %v2321_v36   ;;  %2311 = vperm.xlu0 %2458, %v2309_v46  }
 0xf34   :  { %v2296_v18 = vrot.slane %v2469_v34, %v4185_v21 }
 0xf37   :  { %2335 = vperm.xlu1 %2457, %v2333_v48   ;;  %2341 = vperm.xlu0 %2458, %v2339_v2  }
 0xf3b   :  { %2355 = vperm.xlu0 %2458, %v2352_v9   ;;  %v2330_v35 = vpop.permute.xlu0 %2329  ;;  %v2318_v37 = vpop.permute.xlu1 %2317 }
 0xf3c   :  { %vm2319_vm6 = vcmp.eq.s32.totalorder %v2318_v37, 1  ;;  %vm2331_vm0 = vcmp.eq.s32.totalorder %v2330_v35, 1 }
 0xf3f   :  { %2361 = vperm.xlu0 %2458, %v4010_v43  }
 0xf43   :  { %2368 = vperm.xlu0 %2458, %v4022_v63   ;;  %v4187_v63 = vsub.s32 2, %v4184_v10 }
 0xf47   :  { %2375 = vperm.xlu0 %2458, %v4017_v13   ;;  %v2304_v13 = vrot.slane %v2469_v34, %v4187_v63 }
 0xf4b   :  { %2382 = vperm.xlu0 %2458, %v4032_v47   ;;  %v4188_v47 = vsub.s32 3, %v4184_v10 }
 0xf4d   :  { %v2308_v39 = vrot.slane %v2469_v34, %v4188_v47 }
 0xf4f   :  { %2391 = vperm.xlu0 %2458, %v2662_v32   ;;  %v2320_v32 = vsel %vm2319_vm6, %v2300_v14, %v2296_v18 }
 0xf50   :  { %v2332_v20 = vsel %vm2331_vm0, %v2304_v13, %v2320_v32 }
 0xfae   :  { %v2312_v26 = vpop.permute.xlu0 %2311  ;;  %v2324_v43 = vpop.permute.xlu1 %2323 }
 0xfaf   :  { %vm2313_vm15 = vcmp.eq.s32.totalorder %v2312_v26, 1  ;;  %vm2325_vm1 = vcmp.eq.s32.totalorder %v2324_v43, 1 }
 0xfb0   :  { %v2314_v53 = vsel %vm2313_vm15, %v2300_v14, %v2296_v18 }
 0xfb1   :  { %v2326_v16 = vsel %vm2325_vm1, %v2304_v13, %v2314_v53 }
 0xfb2   :  { %v2342_v44 = vpop.permute.xlu0 %2341  ;;  %v2336_v40 = vpop.permute.xlu1 %2335 }
 0xfb3   :  { %vm2343_vm2 = vcmp.eq.s32.totalorder %v2342_v44, 1  ;;  %vm2337_vm3 = vcmp.eq.s32.totalorder %v2336_v40, 1 }
 0xfb4   :  { %v2338_v8 = vsel %vm2337_vm3, %v2308_v39, %v2326_v16  ;;  %v2344_v12 = vsel %vm2343_vm2, %v2308_v39, %v2332_v20 }
 0xfb5   :  { %v2345_v38 = vsub.f32 %v2338_v8, %v2344_v12 }
 0xfb6   :  { %v2356_v7 = vpop.permute.xlu0 %2355 }
 0xfb7   :  { %v2346_v45 = vmul.f32 %v2345_v38, %v2345_v38  ;;  %v2358_v62 = vmul.f32 %v2356_v7, %v2344_v12 }
 0xfb9   :  { %2347 = vadd.xlane.f32.xlu1 %v2346_v45 }
 0xfba   :  { %v2362_v24 = vpop.permute.xlu0 %2361 }
 0xfbb   :  { %v2364_v11 = vmul.f32 %v2362_v24, %v2296_v18 }
 0xfbd   :  { %v2365_v25 = vadd.f32 %v2364_v11, %v2358_v62 }
 0xfbe   :  { %v2369_v58 = vpop.permute.xlu0 %2368 }
 0xfbf   :  { %v2371_v42 = vmul.f32 %v2369_v58, %v2300_v14 }
 0xfc1   :  { %v2372_v27 = vadd.f32 %v2371_v42, %v2365_v25 }
 0xfc2   :  { %v2376_v54 = vpop.permute.xlu0 %2375 }
 0xfc3   :  { %v2378_v15 = vmul.f32 %v2376_v54, %v2304_v13 }
 0xfc5   :  { %v2379_v55 = vadd.f32 %v2378_v15, %v2372_v27 }
 0xfc6   :  { %v2383_v61 = vpop.permute.xlu0 %2382 }
 0xfc7   :  { %v2385_v23 = vmul.f32 %v2383_v61, %v2308_v39 }
 0xfc9   :  { %v2386_v3 = vadd.f32 %v2385_v23, %v2379_v55 }
 0xfca   :  { %v2392_v50 = vpop.permute.xlu0 %2391 }
 0xfcb   :  { %v2387_v51 = vmul.f32 1.02, %v2386_v3  ;;  %2393 = vst [vmem:[%s4139_s5] sm:$0xff] %v2392_v50 }
 0xfcd   :  { %v2388_v28 = vadd.f32 %v2470_v59, %v2387_v51 }
 0xfcf   :  { %2389 = vst [vmem:[#allocation8] sm:$0xff] %v2388_v28 }
 0xfd0   :  { %2522 = shalt.err (!%p2519_p0)
}
 0xfd1   :  { %2413 = dma.vmem_to_hbm [thread:$0]  %s2411_s11, 128, %s4138_s4, [#allocation9]  }
 0xfd2   :  { %s2572_s5 = smov [#allocation7]  }
 0xfd3   :  { %s2400_s15 = sshll.u32 %s2572_s5, 4  ;;  %s2401_s15 = int_to_ptr.vmem [resolvable:$true] %s2400_s15 }
 0xfd4   :  { %s2531_s16 = scalar_lea.vmem %s2401_s15, 128  ;;  %p2536_p2 = scmp.lt.s32.totalorder %s2401_s15, %s2401_s15 }
 0xfd5   :  { %p2532_p1 = scmp.ne.s32.totalorder %s2401_s15, %s2531_s16  ;;  %p2537_p3 = scmp.lt.s32.totalorder %s2531_s16, %s2531_s16 }
 0xfd7   :  { %p2538_p4 = por %p2537_p3, %p2536_p2 }
 0xfd9   :  { %p2539_p5 = pnand %p2538_p4, %p2532_p1 }
0x1042   :  { %v2348_v49 = vpop.xlane.xlu1 %2347 }
0x1043   :  { %2467 = vrsqrt.f32 %v2348_v49 }
0x1050   :  { %v2468_v33 = vpop.eup %2467 }
0x1051   :  { %v2350_v17 = vmul.f32 %v2468_v33, %v2345_v38 }
0x1053   :  { %2351 = vst [vmem:[#allocation7] sm:$0xff] %v2350_v17 }
0x1054   :  { %2542 = shalt.err (!%p2539_p5)
}
0x1055   :  { %2403 = dma.vmem_to_hbm [thread:$0]  %s2401_s15, 128, %s4137_s3, [#allocation4]  }
0x1056   :  { %2555 = dma.done.wait [#allocation4], 128  }
0x1057   :  { %2556 = vsyncadd [#allocation4], 4294967168 }
0x1058   :  { %2557 = dma.done.wait [#allocation9], 128  }
0x1059   :  { %2558 = vsyncadd [#allocation9], 4294967168 }
0x105a   :  { %2424 = vsyncpa [#allocation3], 1 }
0x105b   :  { %2425 = vsyncpa [#allocation6], 1 }
0x105c   :  { %2426 = vsyncpa [#allocation4], 1 }
0x105d   :  { %2427 = vsyncpa [#allocation9], 1 }

</bundles_post_ra>
